<compile_context>
chip_gen: v6e
topology: v6e:2x2x1
jax: 0.10.0
libtpu: 0.0.40
codegen_flags: <defaults>
</compile_context>

<pallas_src>
import math
import jax
import jax.numpy as jnp
from jax.experimental import pallas as pl
from jax.experimental.pallas import tpu as pltpu

# ----------------------------- model config (small, synthetic) --------------
PAD_ID = 0
VOCAB = 50            # logical vocab (token ids live in [0, VOCAB))
VOCAB_PAD = 64        # lane-friendly padded vocab for the one-hot matmul
D = 32                # word_dim (hidden size of the "BERT")
NL = 2                # number of transformer layers
H = 2                 # attention heads
HD = D // H           # per-head dim
F = 64                # FFN hidden size
OUT = 128             # out_dim of linear_text (lane-dense)
L = 8                 # sequence length (lans)
BS, NANS = 2, 3       # answer batch / number of answers

# --- f32 parameter-slab row layout (one 128-wide row per vector) -------------
# per layer l (8 rows starting at l*8):
#   +0 bqkv (width 3D, same head-major [q|k|v] column order as the weight slab)
#   +1 bo (width D)
#   +2 ln1_g  +3 ln1_b     (post-attention LayerNorm)
#   +4 ln2_g  +5 ln2_b     (post-FFN LayerNorm)
#   +6 b1 (width F)  +7 b2 (width D)
ROW_POS = NL * 8                 # rows [ROW_POS, ROW_POS+L): position embeddings
ROW_LN_EMB = ROW_POS + L         # embedding LayerNorm gain / bias
ROW_BT = ROW_LN_EMB + 2          # linear_text bias (width OUT = 128)
FP_ROWS = 32                     # padded to a sublane multiple


# ----------------------------- Pallas kernel ---------------------------------
def _layer_norm(v, g, b):
    mu = jnp.mean(v, axis=-1, keepdims=True)
    var = jnp.mean((v - mu) ** 2, axis=-1, keepdims=True)
    return (v - mu) * jax.lax.rsqrt(var + 1e-12) * g + b


def lanmodel_kernel(tok_ref, wemb_ref, wa_ref, wb_ref, wt_ref, fp_ref,
                    tok_out_ref, pool_out_ref):
    f32 = jnp.float32
    bf16 = jnp.bfloat16
    b, seq = tok_ref.shape
    vocab, d = wemb_ref.shape
    bl = b * seq
    scale = 1.0 / math.sqrt(HD)

    fp = fp_ref[...]                                     # (32, 128) f32 param slab
    tok = tok_ref[...]                                   # (B, L) int32

    # ---- embedding lookup as a one-hot MXU matmul (in-kernel "gather") ----
    vids = jax.lax.broadcasted_iota(jnp.int32, (b, seq, vocab), 2)
    onehot = (vids == tok[:, :, None]).astype(bf16).reshape(bl, vocab)
    x = jnp.dot(onehot, wemb_ref[...], preferred_element_type=f32)       # (BL, D)

    # position embeddings (broadcast over batch) + embedding LayerNorm
    pos = fp[ROW_POS:ROW_POS + seq, :d]                  # (L, D)
    x = (x.reshape(b, seq, d) + pos[None]).reshape(bl, d)
    x = _layer_norm(x, fp[ROW_LN_EMB:ROW_LN_EMB + 1, :d],
                    fp[ROW_LN_EMB + 1:ROW_LN_EMB + 2, :d])

    # additive key mask, replicated over heads on the (head-major) batch axis
    neg = jnp.where(tok == PAD_ID, -1e9, 0.0).astype(f32)[:, None, :]    # (B,1,L)
    neg_h = jnp.concatenate([neg] * H, axis=0)                           # (H*B,1,L)

    for l in range(NL):                                  # static layer loop (NL=2)
        base = l * 8
        wa = wa_ref[l]                                   # (D, 4D+F) bf16 slab
        x16 = x.astype(bf16)

        # ---- fused QKV projection (columns packed head-major [q_h|k_h|v_h]) ----
        qkv = (jnp.dot(x16, wa[:, :3 * d], preferred_element_type=f32)
               + fp[base:base + 1, :3 * d])
        qkv16 = qkv.astype(bf16)                         # (BL, 3D), one bf16 cast

        # stack heads onto the batch axis -> single batched attention einsums
        qkv_h = jnp.concatenate(
            [qkv16[:, h * 3 * HD:(h + 1) * 3 * HD].reshape(b, seq, 3 * HD)
             for h in range(H)], axis=0)                 # (H*B, L, 3*HD)
        qh = qkv_h[..., 0:HD]
        kh = qkv_h[..., HD:2 * HD]
        vh = qkv_h[..., 2 * HD:3 * HD]

        s = (jnp.einsum('ble,bme->blm', qh, kh, preferred_element_type=f32)
             * scale + neg_h)                            # (H*B, L, L)
        m = jnp.max(s, axis=-1, keepdims=True)
        e = jnp.exp(s - m)
        p = e * pl.reciprocal(jnp.sum(e, axis=-1, keepdims=True), approx=True)
        ctx = jnp.einsum('blm,bme->ble', p.astype(bf16), vh,
                         preferred_element_type=f32)     # (H*B, L, HD)
        ctx16 = ctx.astype(bf16)

        # output projection: per-head row blocks of Wo, summed (no lane concat)
        attn = fp[base + 1:base + 2, :d]
        for h in range(H):
            attn = attn + jnp.dot(
                ctx16[h * b:(h + 1) * b].reshape(bl, HD),
                wa[h * HD:(h + 1) * HD, 3 * d:4 * d],
                preferred_element_type=f32)
        x = _layer_norm(x + attn, fp[base + 2:base + 3, :d],
                        fp[base + 3:base + 4, :d])

        # ---- feed forward ----
        # TODO(synk): HF BERT uses exact erf GELU; tanh approximation used here.
        x16 = x.astype(bf16)
        hdn = jax.nn.gelu(
            jnp.dot(x16, wa[:, 4 * d:4 * d + F], preferred_element_type=f32)
            + fp[base + 6:base + 7, :F], approximate=True)
        y = (jnp.dot(hdn.astype(bf16), wb_ref[l], preferred_element_type=f32)
             + fp[base + 7:base + 8, :d])
        x = _layer_norm(x + y, fp[base + 4:base + 5, :d],
                        fp[base + 5:base + 6, :d])

    # ---- linear_text projection (lane-dense OUT=128) + mean pool ----
    proj = (jnp.dot(x.astype(bf16), wt_ref[...], preferred_element_type=f32)
            + fp[ROW_BT:ROW_BT + 1, :])                  # (BL, OUT)
    tok_out_ref[...] = proj

    # plain mean over the sequence dim (matches torch `answer.mean(dim=1)`,
    # PAD positions included); rows padded so the store is a full unmasked vst.
    pool = jnp.mean(proj.reshape(b, seq, -1), axis=1)    # (B, OUT)
    pad_rows = pool_out_ref.shape[0] - b
    if pad_rows:
        pool = jnp.concatenate(
            [pool, jnp.zeros((pad_rows, pool.shape[-1]), f32)], axis=0)
    pool_out_ref[...] = pool


# ----------------------------- parameters ------------------------------------
def init_params(key):
    ks = jax.random.split(key, 7)
    s = 0.02
    bf = jnp.bfloat16

    wemb = jax.random.normal(ks[0], (VOCAB_PAD, D), jnp.float32) * s
    # fused QKV weights; columns packed head-major: per head h, [Wq_h|Wk_h|Wv_h]
    wqkv = jax.random.normal(ks[1], (NL, D, 3 * D), jnp.float32) * s
    wo = jax.random.normal(ks[2], (NL, D, D), jnp.float32) * s
    w1 = jax.random.normal(ks[3], (NL, D, F), jnp.float32) * s
    w2 = jax.random.normal(ks[4], (NL, F, D), jnp.float32) * s
    wt = jax.random.normal(ks[5], (D, OUT), jnp.float32) * s
    pos = jax.random.normal(ks[6], (L, D), jnp.float32) * s

    # bf16 MXU-operand slabs: wA = [Wqkv | Wo | W1] per layer, wB = W2
    wa = jnp.concatenate([wqkv, wo, w1], axis=-1).astype(bf)   # (NL, D, 4D+F)
    wb = w2.astype(bf)                                         # (NL, F, D)

    # f32 bias / LayerNorm / positional-embedding slab (one 128-wide row each)
    fp = jnp.zeros((FP_ROWS, 128), jnp.float32)
    for l in range(NL):
        base = l * 8
        fp = fp.at[base + 2, :D].set(1.0)   # post-attn LN gain
        fp = fp.at[base + 4, :D].set(1.0)   # post-FFN LN gain
    fp = fp.at[ROW_POS:ROW_POS + L, :D].set(pos)
    fp = fp.at[ROW_LN_EMB, :D].set(1.0)     # embedding LN gain
    # all biases (rows +0, +1, +6, +7, ROW_LN_EMB+1, ROW_BT) stay zero

    return {"wemb": wemb.astype(bf), "wa": wa, "wb": wb,
            "wt": wt.astype(bf), "fp": fp}


# ----------------------------- wrapper ---------------------------------------
def lan_model_forward(answer, params):
    """answer: int32 [bs, nans, lans] token ids. Returns (answer_g, answer_tok)."""
    bs, nans, lans = answer.shape
    B = bs * nans
    BL = B * lans
    B_PAD = ((B + 7) // 8) * 8          # full-sublane pooled-output store

    tok = answer.reshape(B, lans).astype(jnp.int32)

    vmem = pltpu.MemorySpace.VMEM
    # Single invocation, no grid: the whole problem (~40 KiB incl. weights)
    # is VMEM-resident for the entire call on v5e/v6e/v7x.
    # TODO(synk): on v7x (2 TensorCores/chip) a grid=(2,) batch split with
    # dimension_semantics=("parallel",) would use both cores; intentionally not
    # applied here since it only adds per-step overhead on single-core v5e/v6e.
    kernel = pl.pallas_call(
        lanmodel_kernel,
        out_shape=(jax.ShapeDtypeStruct((BL, OUT), jnp.float32),
                   jax.ShapeDtypeStruct((B_PAD, OUT), jnp.float32)),
        in_specs=[pl.BlockSpec(memory_space=vmem)] * 6,
        out_specs=(pl.BlockSpec(memory_space=vmem),
                   pl.BlockSpec(memory_space=vmem)),
    )

    tok_out, pool_out = kernel(tok, params["wemb"], params["wa"],
                               params["wb"], params["wt"], params["fp"])

    answer_g = pool_out[:B].reshape(bs, nans, OUT)       # mean over seq dim
    answer_tok = tok_out.reshape(bs, nans, lans, OUT)    # per-token embeddings
    return answer_g, answer_tok


# ----------------------------- main -------------------------------------------
if __name__ == "__main__":
    key = jax.random.PRNGKey(0)
    pkey, tkey = jax.random.split(key)

    params = init_params(pkey)

    # deterministic token ids in [1, VOCAB), with trailing pads (id 0)
    answer = jax.random.randint(tkey, (BS, NANS, L), 1, VOCAB, dtype=jnp.int32)
    answer = answer.at[:, :, -2:].set(PAD_ID)            # simulate padding

    fwd = jax.jit(lan_model_forward)
    answer_g, answer_tok = fwd(answer, params)
    jax.block_until_ready(answer_g)
    jax.block_until_ready(answer_tok)

    assert answer_g.shape == (BS, NANS, OUT)
    assert answer_tok.shape == (BS, NANS, L, OUT)
    assert bool(jnp.all(jnp.isfinite(answer_g)))
    assert bool(jnp.all(jnp.isfinite(answer_tok)))
    # TODO(synk): pretrained HF BERT checkpoint weights are replaced by
    # deterministic synthetic parameters (no .pt/.pth checkpoint loading).
    print("KERNEL_OK")
</pallas_src>

<mosaic_0001>
module attributes {stable_mosaic.version = 11 : i64} {
  func.func @lanmodel_kernel(%arg0: memref<6x8xi32, #tpu.memory_space<vmem>>, %arg1: memref<64x32xbf16, #tpu.memory_space<vmem>>, %arg2: memref<2x32x192xbf16, #tpu.memory_space<vmem>>, %arg3: memref<2x64x32xbf16, #tpu.memory_space<vmem>>, %arg4: memref<32x128xbf16, #tpu.memory_space<vmem>>, %arg5: memref<32x128xf32, #tpu.memory_space<vmem>>, %arg6: memref<48x128xf32, #tpu.memory_space<vmem>>, %arg7: memref<8x128xf32, #tpu.memory_space<vmem>>) attributes {dimension_semantics = [], scalar_prefetch = 0 : i64, scratch_operands = 0 : i64, tpu.core_type = #tpu.core_type<tc>} {
    %c0 = arith.constant 0 : index
    %c0_0 = arith.constant 0 : index
    %0 = vector.load %arg5[%c0, %c0_0] : memref<32x128xf32, #tpu.memory_space<vmem>>, vector<32x128xf32>
    %c0_1 = arith.constant 0 : index
    %c0_2 = arith.constant 0 : index
    %1 = vector.load %arg0[%c0_1, %c0_2] : memref<6x8xi32, #tpu.memory_space<vmem>>, vector<6x8xi32>
    %2 = tpu.iota {dimensions = array<i32: 2>} : vector<6x8x64xi32>
    %3 = vector.shape_cast %1 : vector<6x8xi32> to vector<6x8x1xi32>
    %4 = vector.broadcast %3 : vector<6x8x1xi32> to vector<6x8x64xi32>
    %5 = arith.cmpi eq, %2, %4 : vector<6x8x64xi32>
    %6 = arith.extui %5 : vector<6x8x64xi1> to vector<6x8x64xi32>
    %7 = arith.sitofp %6 : vector<6x8x64xi32> to vector<6x8x64xf32>
    %8 = arith.truncf %7 : vector<6x8x64xf32> to vector<6x8x64xbf16>
    %9 = vector.shape_cast %8 : vector<6x8x64xbf16> to vector<48x64xbf16>
    %c0_3 = arith.constant 0 : index
    %c0_4 = arith.constant 0 : index
    %10 = vector.load %arg1[%c0_3, %c0_4] : memref<64x32xbf16, #tpu.memory_space<vmem>>, vector<64x32xbf16>
    %cst = arith.constant dense<0.000000e+00> : vector<48x32xf32>
    %11 = tpu.matmul %9, %10, %cst {dimension_numbers = #tpu.dot_dimension_numbers<[1], [0], [0], [1], [0, 0, 1, 1], [], []>} : vector<48x64xbf16>, vector<64x32xbf16>, vector<48x32xf32> -> vector<48x32xf32>
    %12 = vector.extract_strided_slice %0 {offsets = [16, 0], sizes = [8, 32], strides = [1, 1]} : vector<32x128xf32> to vector<8x32xf32>
    %13 = vector.shape_cast %11 : vector<48x32xf32> to vector<6x8x32xf32>
    %14 = vector.shape_cast %12 : vector<8x32xf32> to vector<1x8x32xf32>
    %15 = vector.broadcast %14 : vector<1x8x32xf32> to vector<6x8x32xf32>
    %16 = arith.addf %13, %15 : vector<6x8x32xf32>
    %17 = vector.shape_cast %16 : vector<6x8x32xf32> to vector<48x32xf32>
    %18 = vector.extract_strided_slice %0 {offsets = [24, 0], sizes = [1, 32], strides = [1, 1]} : vector<32x128xf32> to vector<1x32xf32>
    %19 = vector.extract_strided_slice %0 {offsets = [25, 0], sizes = [1, 32], strides = [1, 1]} : vector<32x128xf32> to vector<1x32xf32>
    %cst_5 = arith.constant dense<0.000000e+00> : vector<48xf32>
    %20 = vector.multi_reduction <add>, %17, %cst_5 [1] : vector<48x32xf32> to vector<48xf32>
    %21 = vector.shape_cast %20 : vector<48xf32> to vector<48x1xf32>
    %cst_6 = arith.constant 3.200000e+01 : f32
    %22 = vector.broadcast %cst_6 : f32 to vector<48x1xf32>
    %23 = arith.divf %21, %22 : vector<48x1xf32>
    %24 = vector.broadcast %23 : vector<48x1xf32> to vector<48x32xf32>
    %25 = arith.subf %17, %24 : vector<48x32xf32>
    %26 = arith.mulf %25, %25 : vector<48x32xf32>
    %cst_7 = arith.constant dense<0.000000e+00> : vector<48xf32>
    %27 = vector.multi_reduction <add>, %26, %cst_7 [1] : vector<48x32xf32> to vector<48xf32>
    %28 = vector.shape_cast %27 : vector<48xf32> to vector<48x1xf32>
    %cst_8 = arith.constant 3.200000e+01 : f32
    %29 = vector.broadcast %cst_8 : f32 to vector<48x1xf32>
    %30 = arith.divf %28, %29 : vector<48x1xf32>
    %31 = vector.broadcast %23 : vector<48x1xf32> to vector<48x32xf32>
    %32 = arith.subf %17, %31 : vector<48x32xf32>
    %cst_9 = arith.constant 9.99999996E-13 : f32
    %33 = vector.broadcast %cst_9 : f32 to vector<48x1xf32>
    %34 = arith.addf %30, %33 : vector<48x1xf32>
    %35 = math.rsqrt %34 : vector<48x1xf32>
    %36 = vector.broadcast %35 : vector<48x1xf32> to vector<48x32xf32>
    %37 = arith.mulf %32, %36 : vector<48x32xf32>
    %38 = vector.broadcast %18 : vector<1x32xf32> to vector<48x32xf32>
    %39 = arith.mulf %37, %38 : vector<48x32xf32>
    %40 = vector.broadcast %19 : vector<1x32xf32> to vector<48x32xf32>
    %41 = arith.addf %39, %40 : vector<48x32xf32>
    %c0_i32 = arith.constant 0 : i32
    %42 = vector.broadcast %c0_i32 : i32 to vector<6x8xi32>
    %43 = arith.cmpi eq, %1, %42 : vector<6x8xi32>
    %cst_10 = arith.constant -1.000000e+09 : f32
    %cst_11 = arith.constant 0.000000e+00 : f32
    %44 = vector.broadcast %cst_10 : f32 to vector<6x8xf32>
    %45 = vector.broadcast %cst_11 : f32 to vector<6x8xf32>
    %46 = arith.select %43, %44, %45 : vector<6x8xi1>, vector<6x8xf32>
    %47 = vector.shape_cast %46 : vector<6x8xf32> to vector<6x1x8xf32>
    %48 = tpu.concatenate %47, %47 in 0 : vector<6x1x8xf32>, vector<6x1x8xf32> -> vector<12x1x8xf32>
    %c0_12 = arith.constant 0 : index
    %c0_13 = arith.constant 0 : index
    %c0_14 = arith.constant 0 : index
    %49 = vector.load %arg2[%c0_12, %c0_13, %c0_14] : memref<2x32x192xbf16, #tpu.memory_space<vmem>>, vector<1x32x192xbf16>
    %50 = vector.shape_cast %49 : vector<1x32x192xbf16> to vector<32x192xbf16>
    %51 = arith.truncf %41 : vector<48x32xf32> to vector<48x32xbf16>
    %52 = vector.extract_strided_slice %50 {offsets = [0, 0], sizes = [32, 96], strides = [1, 1]} : vector<32x192xbf16> to vector<32x96xbf16>
    %cst_15 = arith.constant dense<0.000000e+00> : vector<48x96xf32>
    %53 = tpu.matmul %51, %52, %cst_15 {dimension_numbers = #tpu.dot_dimension_numbers<[1], [0], [0], [1], [0, 0, 1, 1], [], []>} : vector<48x32xbf16>, vector<32x96xbf16>, vector<48x96xf32> -> vector<48x96xf32>
    %54 = vector.extract_strided_slice %0 {offsets = [0, 0], sizes = [1, 96], strides = [1, 1]} : vector<32x128xf32> to vector<1x96xf32>
    %55 = vector.broadcast %54 : vector<1x96xf32> to vector<48x96xf32>
    %56 = arith.addf %53, %55 : vector<48x96xf32>
    %57 = arith.truncf %56 : vector<48x96xf32> to vector<48x96xbf16>
    %58 = vector.extract_strided_slice %57 {offsets = [0, 0], sizes = [48, 48], strides = [1, 1]} : vector<48x96xbf16> to vector<48x48xbf16>
    %59 = vector.shape_cast %58 : vector<48x48xbf16> to vector<6x8x48xbf16>
    %60 = vector.extract_strided_slice %57 {offsets = [0, 48], sizes = [48, 48], strides = [1, 1]} : vector<48x96xbf16> to vector<48x48xbf16>
    %61 = vector.shape_cast %60 : vector<48x48xbf16> to vector<6x8x48xbf16>
    %62 = tpu.concatenate %59, %61 in 0 : vector<6x8x48xbf16>, vector<6x8x48xbf16> -> vector<12x8x48xbf16>
    %63 = vector.extract_strided_slice %62 {offsets = [0, 0, 0], sizes = [12, 8, 16], strides = [1, 1, 1]} : vector<12x8x48xbf16> to vector<12x8x16xbf16>
    %64 = vector.extract_strided_slice %62 {offsets = [0, 0, 16], sizes = [12, 8, 16], strides = [1, 1, 1]} : vector<12x8x48xbf16> to vector<12x8x16xbf16>
    %65 = vector.extract_strided_slice %62 {offsets = [0, 0, 32], sizes = [12, 8, 16], strides = [1, 1, 1]} : vector<12x8x48xbf16> to vector<12x8x16xbf16>
    "tpu.trace_start"() <{level = 10 : i32, message = "ble,bme->blm"}> : () -> ()
    %cst_16 = arith.constant dense<0.000000e+00> : vector<12x8x8xf32>
    %66 = tpu.matmul %63, %64, %cst_16 {dimension_numbers = #tpu.dot_dimension_numbers<[2], [2], [1], [1], [0, 0, 0, 1, 1, 1], [0], [0]>} : vector<12x8x16xbf16>, vector<12x8x16xbf16>, vector<12x8x8xf32> -> vector<12x8x8xf32>
    "tpu.trace_stop"() : () -> ()
    %cst_17 = arith.constant 2.500000e-01 : f32
    %67 = vector.broadcast %cst_17 : f32 to vector<12x8x8xf32>
    %68 = arith.mulf %66, %67 : vector<12x8x8xf32>
    %69 = vector.broadcast %48 : vector<12x1x8xf32> to vector<12x8x8xf32>
    %70 = arith.addf %68, %69 : vector<12x8x8xf32>
    %cst_18 = arith.constant dense<0xFF800000> : vector<12x8xf32>
    %71 = vector.multi_reduction <maximumf>, %70, %cst_18 [2] : vector<12x8x8xf32> to vector<12x8xf32>
    %72 = vector.shape_cast %71 : vector<12x8xf32> to vector<12x8x1xf32>
    %73 = vector.broadcast %72 : vector<12x8x1xf32> to vector<12x8x8xf32>
    %74 = arith.subf %70, %73 : vector<12x8x8xf32>
    %75 = math.exp %74 : vector<12x8x8xf32>
    %cst_19 = arith.constant dense<0.000000e+00> : vector<12x8xf32>
    %76 = vector.multi_reduction <add>, %75, %cst_19 [2] : vector<12x8x8xf32> to vector<12x8xf32>
    %77 = vector.shape_cast %76 : vector<12x8xf32> to vector<12x8x1xf32>
    %78 = tpu.reciprocal %77 {approx = true} : vector<12x8x1xf32> -> vector<12x8x1xf32>
    %79 = vector.broadcast %78 : vector<12x8x1xf32> to vector<12x8x8xf32>
    %80 = arith.mulf %75, %79 : vector<12x8x8xf32>
    %81 = arith.truncf %80 : vector<12x8x8xf32> to vector<12x8x8xbf16>
    "tpu.trace_start"() <{level = 10 : i32, message = "blm,bme->ble"}> : () -> ()
    %cst_20 = arith.constant dense<0.000000e+00> : vector<12x8x16xf32>
    %82 = tpu.matmul %81, %65, %cst_20 {dimension_numbers = #tpu.dot_dimension_numbers<[2], [1], [1], [2], [0, 0, 0, 1, 1, 2], [0], [0]>} : vector<12x8x8xbf16>, vector<12x8x16xbf16>, vector<12x8x16xf32> -> vector<12x8x16xf32>
    "tpu.trace_stop"() : () -> ()
    %83 = arith.truncf %82 : vector<12x8x16xf32> to vector<12x8x16xbf16>
    %84 = vector.extract_strided_slice %0 {offsets = [1, 0], sizes = [1, 32], strides = [1, 1]} : vector<32x128xf32> to vector<1x32xf32>
    %85 = vector.extract_strided_slice %83 {offsets = [0, 0, 0], sizes = [6, 8, 16], strides = [1, 1, 1]} : vector<12x8x16xbf16> to vector<6x8x16xbf16>
    %86 = vector.shape_cast %85 : vector<6x8x16xbf16> to vector<48x16xbf16>
    %87 = vector.extract_strided_slice %50 {offsets = [0, 96], sizes = [16, 32], strides = [1, 1]} : vector<32x192xbf16> to vector<16x32xbf16>
    %cst_21 = arith.constant dense<0.000000e+00> : vector<48x32xf32>
    %88 = tpu.matmul %86, %87, %cst_21 {dimension_numbers = #tpu.dot_dimension_numbers<[1], [0], [0], [1], [0, 0, 1, 1], [], []>} : vector<48x16xbf16>, vector<16x32xbf16>, vector<48x32xf32> -> vector<48x32xf32>
    %89 = vector.broadcast %84 : vector<1x32xf32> to vector<48x32xf32>
    %90 = arith.addf %89, %88 : vector<48x32xf32>
    %91 = vector.extract_strided_slice %83 {offsets = [6, 0, 0], sizes = [6, 8, 16], strides = [1, 1, 1]} : vector<12x8x16xbf16> to vector<6x8x16xbf16>
    %92 = vector.shape_cast %91 : vector<6x8x16xbf16> to vector<48x16xbf16>
    %93 = vector.extract_strided_slice %50 {offsets = [16, 96], sizes = [16, 32], strides = [1, 1]} : vector<32x192xbf16> to vector<16x32xbf16>
    %cst_22 = arith.constant dense<0.000000e+00> : vector<48x32xf32>
    %94 = tpu.matmul %92, %93, %cst_22 {dimension_numbers = #tpu.dot_dimension_numbers<[1], [0], [0], [1], [0, 0, 1, 1], [], []>} : vector<48x16xbf16>, vector<16x32xbf16>, vector<48x32xf32> -> vector<48x32xf32>
    %95 = arith.addf %90, %94 : vector<48x32xf32>
    %96 = arith.addf %41, %95 : vector<48x32xf32>
    %97 = vector.extract_strided_slice %0 {offsets = [2, 0], sizes = [1, 32], strides = [1, 1]} : vector<32x128xf32> to vector<1x32xf32>
    %98 = vector.extract_strided_slice %0 {offsets = [3, 0], sizes = [1, 32], strides = [1, 1]} : vector<32x128xf32> to vector<1x32xf32>
    %cst_23 = arith.constant dense<0.000000e+00> : vector<48xf32>
    %99 = vector.multi_reduction <add>, %96, %cst_23 [1] : vector<48x32xf32> to vector<48xf32>
    %100 = vector.shape_cast %99 : vector<48xf32> to vector<48x1xf32>
    %cst_24 = arith.constant 3.200000e+01 : f32
    %101 = vector.broadcast %cst_24 : f32 to vector<48x1xf32>
    %102 = arith.divf %100, %101 : vector<48x1xf32>
    %103 = vector.broadcast %102 : vector<48x1xf32> to vector<48x32xf32>
    %104 = arith.subf %96, %103 : vector<48x32xf32>
    %105 = arith.mulf %104, %104 : vector<48x32xf32>
    %cst_25 = arith.constant dense<0.000000e+00> : vector<48xf32>
    %106 = vector.multi_reduction <add>, %105, %cst_25 [1] : vector<48x32xf32> to vector<48xf32>
    %107 = vector.shape_cast %106 : vector<48xf32> to vector<48x1xf32>
    %cst_26 = arith.constant 3.200000e+01 : f32
    %108 = vector.broadcast %cst_26 : f32 to vector<48x1xf32>
    %109 = arith.divf %107, %108 : vector<48x1xf32>
    %110 = vector.broadcast %102 : vector<48x1xf32> to vector<48x32xf32>
    %111 = arith.subf %96, %110 : vector<48x32xf32>
    %cst_27 = arith.constant 9.99999996E-13 : f32
    %112 = vector.broadcast %cst_27 : f32 to vector<48x1xf32>
    %113 = arith.addf %109, %112 : vector<48x1xf32>
    %114 = math.rsqrt %113 : vector<48x1xf32>
    %115 = vector.broadcast %114 : vector<48x1xf32> to vector<48x32xf32>
    %116 = arith.mulf %111, %115 : vector<48x32xf32>
    %117 = vector.broadcast %97 : vector<1x32xf32> to vector<48x32xf32>
    %118 = arith.mulf %116, %117 : vector<48x32xf32>
    %119 = vector.broadcast %98 : vector<1x32xf32> to vector<48x32xf32>
    %120 = arith.addf %118, %119 : vector<48x32xf32>
    %121 = arith.truncf %120 : vector<48x32xf32> to vector<48x32xbf16>
    %122 = vector.extract_strided_slice %50 {offsets = [0, 128], sizes = [32, 64], strides = [1, 1]} : vector<32x192xbf16> to vector<32x64xbf16>
    %cst_28 = arith.constant dense<0.000000e+00> : vector<48x64xf32>
    %123 = tpu.matmul %121, %122, %cst_28 {dimension_numbers = #tpu.dot_dimension_numbers<[1], [0], [0], [1], [0, 0, 1, 1], [], []>} : vector<48x32xbf16>, vector<32x64xbf16>, vector<48x64xf32> -> vector<48x64xf32>
    %124 = vector.extract_strided_slice %0 {offsets = [6, 0], sizes = [1, 64], strides = [1, 1]} : vector<32x128xf32> to vector<1x64xf32>
    %125 = vector.broadcast %124 : vector<1x64xf32> to vector<48x64xf32>
    %126 = arith.addf %123, %125 : vector<48x64xf32>
    %127 = arith.mulf %126, %126 : vector<48x64xf32>
    %128 = arith.mulf %126, %127 : vector<48x64xf32>
    %cst_29 = arith.constant 4.471500e-02 : f32
    %129 = vector.broadcast %cst_29 : f32 to vector<48x64xf32>
    %130 = arith.mulf %129, %128 : vector<48x64xf32>
    %131 = arith.addf %126, %130 : vector<48x64xf32>
    %cst_30 = arith.constant 0.797884583 : f32
    %132 = vector.broadcast %cst_30 : f32 to vector<48x64xf32>
    %133 = arith.mulf %132, %131 : vector<48x64xf32>
    %134 = math.tanh %133 : vector<48x64xf32>
    %cst_31 = arith.constant 1.000000e+00 : f32
    %135 = vector.broadcast %cst_31 : f32 to vector<48x64xf32>
    %136 = arith.addf %135, %134 : vector<48x64xf32>
    %cst_32 = arith.constant 5.000000e-01 : f32
    %137 = vector.broadcast %cst_32 : f32 to vector<48x64xf32>
    %138 = arith.mulf %137, %136 : vector<48x64xf32>
    %139 = arith.mulf %126, %138 : vector<48x64xf32>
    %140 = arith.truncf %139 : vector<48x64xf32> to vector<48x64xbf16>
    %c0_33 = arith.constant 0 : index
    %c0_34 = arith.constant 0 : index
    %c0_35 = arith.constant 0 : index
    %141 = vector.load %arg3[%c0_33, %c0_34, %c0_35] : memref<2x64x32xbf16, #tpu.memory_space<vmem>>, vector<1x64x32xbf16>
    %142 = vector.shape_cast %141 : vector<1x64x32xbf16> to vector<64x32xbf16>
    %cst_36 = arith.constant dense<0.000000e+00> : vector<48x32xf32>
    %143 = tpu.matmul %140, %142, %cst_36 {dimension_numbers = #tpu.dot_dimension_numbers<[1], [0], [0], [1], [0, 0, 1, 1], [], []>} : vector<48x64xbf16>, vector<64x32xbf16>, vector<48x32xf32> -> vector<48x32xf32>
    %144 = vector.extract_strided_slice %0 {offsets = [7, 0], sizes = [1, 32], strides = [1, 1]} : vector<32x128xf32> to vector<1x32xf32>
    %145 = vector.broadcast %144 : vector<1x32xf32> to vector<48x32xf32>
    %146 = arith.addf %143, %145 : vector<48x32xf32>
    %147 = arith.addf %120, %146 : vector<48x32xf32>
    %148 = vector.extract_strided_slice %0 {offsets = [4, 0], sizes = [1, 32], strides = [1, 1]} : vector<32x128xf32> to vector<1x32xf32>
    %149 = vector.extract_strided_slice %0 {offsets = [5, 0], sizes = [1, 32], strides = [1, 1]} : vector<32x128xf32> to vector<1x32xf32>
    %cst_37 = arith.constant dense<0.000000e+00> : vector<48xf32>
    %150 = vector.multi_reduction <add>, %147, %cst_37 [1] : vector<48x32xf32> to vector<48xf32>
    %151 = vector.shape_cast %150 : vector<48xf32> to vector<48x1xf32>
    %cst_38 = arith.constant 3.200000e+01 : f32
    %152 = vector.broadcast %cst_38 : f32 to vector<48x1xf32>
    %153 = arith.divf %151, %152 : vector<48x1xf32>
    %154 = vector.broadcast %153 : vector<48x1xf32> to vector<48x32xf32>
    %155 = arith.subf %147, %154 : vector<48x32xf32>
    %156 = arith.mulf %155, %155 : vector<48x32xf32>
    %cst_39 = arith.constant dense<0.000000e+00> : vector<48xf32>
    %157 = vector.multi_reduction <add>, %156, %cst_39 [1] : vector<48x32xf32> to vector<48xf32>
    %158 = vector.shape_cast %157 : vector<48xf32> to vector<48x1xf32>
    %cst_40 = arith.constant 3.200000e+01 : f32
    %159 = vector.broadcast %cst_40 : f32 to vector<48x1xf32>
    %160 = arith.divf %158, %159 : vector<48x1xf32>
    %161 = vector.broadcast %153 : vector<48x1xf32> to vector<48x32xf32>
    %162 = arith.subf %147, %161 : vector<48x32xf32>
    %cst_41 = arith.constant 9.99999996E-13 : f32
    %163 = vector.broadcast %cst_41 : f32 to vector<48x1xf32>
    %164 = arith.addf %160, %163 : vector<48x1xf32>
    %165 = math.rsqrt %164 : vector<48x1xf32>
    %166 = vector.broadcast %165 : vector<48x1xf32> to vector<48x32xf32>
    %167 = arith.mulf %162, %166 : vector<48x32xf32>
    %168 = vector.broadcast %148 : vector<1x32xf32> to vector<48x32xf32>
    %169 = arith.mulf %167, %168 : vector<48x32xf32>
    %170 = vector.broadcast %149 : vector<1x32xf32> to vector<48x32xf32>
    %171 = arith.addf %169, %170 : vector<48x32xf32>
    %c1 = arith.constant 1 : index
    %c0_42 = arith.constant 0 : index
    %c0_43 = arith.constant 0 : index
    %172 = vector.load %arg2[%c1, %c0_42, %c0_43] : memref<2x32x192xbf16, #tpu.memory_space<vmem>>, vector<1x32x192xbf16>
    %173 = vector.shape_cast %172 : vector<1x32x192xbf16> to vector<32x192xbf16>
    %174 = arith.truncf %171 : vector<48x32xf32> to vector<48x32xbf16>
    %175 = vector.extract_strided_slice %173 {offsets = [0, 0], sizes = [32, 96], strides = [1, 1]} : vector<32x192xbf16> to vector<32x96xbf16>
    %cst_44 = arith.constant dense<0.000000e+00> : vector<48x96xf32>
    %176 = tpu.matmul %174, %175, %cst_44 {dimension_numbers = #tpu.dot_dimension_numbers<[1], [0], [0], [1], [0, 0, 1, 1], [], []>} : vector<48x32xbf16>, vector<32x96xbf16>, vector<48x96xf32> -> vector<48x96xf32>
    %177 = vector.extract_strided_slice %0 {offsets = [8, 0], sizes = [1, 96], strides = [1, 1]} : vector<32x128xf32> to vector<1x96xf32>
    %178 = vector.broadcast %177 : vector<1x96xf32> to vector<48x96xf32>
    %179 = arith.addf %176, %178 : vector<48x96xf32>
    %180 = arith.truncf %179 : vector<48x96xf32> to vector<48x96xbf16>
    %181 = vector.extract_strided_slice %180 {offsets = [0, 0], sizes = [48, 48], strides = [1, 1]} : vector<48x96xbf16> to vector<48x48xbf16>
    %182 = vector.shape_cast %181 : vector<48x48xbf16> to vector<6x8x48xbf16>
    %183 = vector.extract_strided_slice %180 {offsets = [0, 48], sizes = [48, 48], strides = [1, 1]} : vector<48x96xbf16> to vector<48x48xbf16>
    %184 = vector.shape_cast %183 : vector<48x48xbf16> to vector<6x8x48xbf16>
    %185 = tpu.concatenate %182, %184 in 0 : vector<6x8x48xbf16>, vector<6x8x48xbf16> -> vector<12x8x48xbf16>
    %186 = vector.extract_strided_slice %185 {offsets = [0, 0, 0], sizes = [12, 8, 16], strides = [1, 1, 1]} : vector<12x8x48xbf16> to vector<12x8x16xbf16>
    %187 = vector.extract_strided_slice %185 {offsets = [0, 0, 16], sizes = [12, 8, 16], strides = [1, 1, 1]} : vector<12x8x48xbf16> to vector<12x8x16xbf16>
    %188 = vector.extract_strided_slice %185 {offsets = [0, 0, 32], sizes = [12, 8, 16], strides = [1, 1, 1]} : vector<12x8x48xbf16> to vector<12x8x16xbf16>
    "tpu.trace_start"() <{level = 10 : i32, message = "ble,bme->blm"}> : () -> ()
    %cst_45 = arith.constant dense<0.000000e+00> : vector<12x8x8xf32>
    %189 = tpu.matmul %186, %187, %cst_45 {dimension_numbers = #tpu.dot_dimension_numbers<[2], [2], [1], [1], [0, 0, 0, 1, 1, 1], [0], [0]>} : vector<12x8x16xbf16>, vector<12x8x16xbf16>, vector<12x8x8xf32> -> vector<12x8x8xf32>
    "tpu.trace_stop"() : () -> ()
    %cst_46 = arith.constant 2.500000e-01 : f32
    %190 = vector.broadcast %cst_46 : f32 to vector<12x8x8xf32>
    %191 = arith.mulf %189, %190 : vector<12x8x8xf32>
    %192 = vector.broadcast %48 : vector<12x1x8xf32> to vector<12x8x8xf32>
    %193 = arith.addf %191, %192 : vector<12x8x8xf32>
    %cst_47 = arith.constant dense<0xFF800000> : vector<12x8xf32>
    %194 = vector.multi_reduction <maximumf>, %193, %cst_47 [2] : vector<12x8x8xf32> to vector<12x8xf32>
    %195 = vector.shape_cast %194 : vector<12x8xf32> to vector<12x8x1xf32>
    %196 = vector.broadcast %195 : vector<12x8x1xf32> to vector<12x8x8xf32>
    %197 = arith.subf %193, %196 : vector<12x8x8xf32>
    %198 = math.exp %197 : vector<12x8x8xf32>
    %cst_48 = arith.constant dense<0.000000e+00> : vector<12x8xf32>
    %199 = vector.multi_reduction <add>, %198, %cst_48 [2] : vector<12x8x8xf32> to vector<12x8xf32>
    %200 = vector.shape_cast %199 : vector<12x8xf32> to vector<12x8x1xf32>
    %201 = tpu.reciprocal %200 {approx = true} : vector<12x8x1xf32> -> vector<12x8x1xf32>
    %202 = vector.broadcast %201 : vector<12x8x1xf32> to vector<12x8x8xf32>
    %203 = arith.mulf %198, %202 : vector<12x8x8xf32>
    %204 = arith.truncf %203 : vector<12x8x8xf32> to vector<12x8x8xbf16>
    "tpu.trace_start"() <{level = 10 : i32, message = "blm,bme->ble"}> : () -> ()
    %cst_49 = arith.constant dense<0.000000e+00> : vector<12x8x16xf32>
    %205 = tpu.matmul %204, %188, %cst_49 {dimension_numbers = #tpu.dot_dimension_numbers<[2], [1], [1], [2], [0, 0, 0, 1, 1, 2], [0], [0]>} : vector<12x8x8xbf16>, vector<12x8x16xbf16>, vector<12x8x16xf32> -> vector<12x8x16xf32>
    "tpu.trace_stop"() : () -> ()
    %206 = arith.truncf %205 : vector<12x8x16xf32> to vector<12x8x16xbf16>
    %207 = vector.extract_strided_slice %0 {offsets = [9, 0], sizes = [1, 32], strides = [1, 1]} : vector<32x128xf32> to vector<1x32xf32>
    %208 = vector.extract_strided_slice %206 {offsets = [0, 0, 0], sizes = [6, 8, 16], strides = [1, 1, 1]} : vector<12x8x16xbf16> to vector<6x8x16xbf16>
    %209 = vector.shape_cast %208 : vector<6x8x16xbf16> to vector<48x16xbf16>
    %210 = vector.extract_strided_slice %173 {offsets = [0, 96], sizes = [16, 32], strides = [1, 1]} : vector<32x192xbf16> to vector<16x32xbf16>
    %cst_50 = arith.constant dense<0.000000e+00> : vector<48x32xf32>
    %211 = tpu.matmul %209, %210, %cst_50 {dimension_numbers = #tpu.dot_dimension_numbers<[1], [0], [0], [1], [0, 0, 1, 1], [], []>} : vector<48x16xbf16>, vector<16x32xbf16>, vector<48x32xf32> -> vector<48x32xf32>
    %212 = vector.broadcast %207 : vector<1x32xf32> to vector<48x32xf32>
    %213 = arith.addf %212, %211 : vector<48x32xf32>
    %214 = vector.extract_strided_slice %206 {offsets = [6, 0, 0], sizes = [6, 8, 16], strides = [1, 1, 1]} : vector<12x8x16xbf16> to vector<6x8x16xbf16>
    %215 = vector.shape_cast %214 : vector<6x8x16xbf16> to vector<48x16xbf16>
    %216 = vector.extract_strided_slice %173 {offsets = [16, 96], sizes = [16, 32], strides = [1, 1]} : vector<32x192xbf16> to vector<16x32xbf16>
    %cst_51 = arith.constant dense<0.000000e+00> : vector<48x32xf32>
    %217 = tpu.matmul %215, %216, %cst_51 {dimension_numbers = #tpu.dot_dimension_numbers<[1], [0], [0], [1], [0, 0, 1, 1], [], []>} : vector<48x16xbf16>, vector<16x32xbf16>, vector<48x32xf32> -> vector<48x32xf32>
    %218 = arith.addf %213, %217 : vector<48x32xf32>
    %219 = arith.addf %171, %218 : vector<48x32xf32>
    %220 = vector.extract_strided_slice %0 {offsets = [10, 0], sizes = [1, 32], strides = [1, 1]} : vector<32x128xf32> to vector<1x32xf32>
    %221 = vector.extract_strided_slice %0 {offsets = [11, 0], sizes = [1, 32], strides = [1, 1]} : vector<32x128xf32> to vector<1x32xf32>
    %cst_52 = arith.constant dense<0.000000e+00> : vector<48xf32>
    %222 = vector.multi_reduction <add>, %219, %cst_52 [1] : vector<48x32xf32> to vector<48xf32>
    %223 = vector.shape_cast %222 : vector<48xf32> to vector<48x1xf32>
    %cst_53 = arith.constant 3.200000e+01 : f32
    %224 = vector.broadcast %cst_53 : f32 to vector<48x1xf32>
    %225 = arith.divf %223, %224 : vector<48x1xf32>
    %226 = vector.broadcast %225 : vector<48x1xf32> to vector<48x32xf32>
    %227 = arith.subf %219, %226 : vector<48x32xf32>
    %228 = arith.mulf %227, %227 : vector<48x32xf32>
    %cst_54 = arith.constant dense<0.000000e+00> : vector<48xf32>
    %229 = vector.multi_reduction <add>, %228, %cst_54 [1] : vector<48x32xf32> to vector<48xf32>
    %230 = vector.shape_cast %229 : vector<48xf32> to vector<48x1xf32>
    %cst_55 = arith.constant 3.200000e+01 : f32
    %231 = vector.broadcast %cst_55 : f32 to vector<48x1xf32>
    %232 = arith.divf %230, %231 : vector<48x1xf32>
    %233 = vector.broadcast %225 : vector<48x1xf32> to vector<48x32xf32>
    %234 = arith.subf %219, %233 : vector<48x32xf32>
    %cst_56 = arith.constant 9.99999996E-13 : f32
    %235 = vector.broadcast %cst_56 : f32 to vector<48x1xf32>
    %236 = arith.addf %232, %235 : vector<48x1xf32>
    %237 = math.rsqrt %236 : vector<48x1xf32>
    %238 = vector.broadcast %237 : vector<48x1xf32> to vector<48x32xf32>
    %239 = arith.mulf %234, %238 : vector<48x32xf32>
    %240 = vector.broadcast %220 : vector<1x32xf32> to vector<48x32xf32>
    %241 = arith.mulf %239, %240 : vector<48x32xf32>
    %242 = vector.broadcast %221 : vector<1x32xf32> to vector<48x32xf32>
    %243 = arith.addf %241, %242 : vector<48x32xf32>
    %244 = arith.truncf %243 : vector<48x32xf32> to vector<48x32xbf16>
    %245 = vector.extract_strided_slice %173 {offsets = [0, 128], sizes = [32, 64], strides = [1, 1]} : vector<32x192xbf16> to vector<32x64xbf16>
    %cst_57 = arith.constant dense<0.000000e+00> : vector<48x64xf32>
    %246 = tpu.matmul %244, %245, %cst_57 {dimension_numbers = #tpu.dot_dimension_numbers<[1], [0], [0], [1], [0, 0, 1, 1], [], []>} : vector<48x32xbf16>, vector<32x64xbf16>, vector<48x64xf32> -> vector<48x64xf32>
    %247 = vector.extract_strided_slice %0 {offsets = [14, 0], sizes = [1, 64], strides = [1, 1]} : vector<32x128xf32> to vector<1x64xf32>
    %248 = vector.broadcast %247 : vector<1x64xf32> to vector<48x64xf32>
    %249 = arith.addf %246, %248 : vector<48x64xf32>
    %250 = arith.mulf %249, %249 : vector<48x64xf32>
    %251 = arith.mulf %249, %250 : vector<48x64xf32>
    %cst_58 = arith.constant 4.471500e-02 : f32
    %252 = vector.broadcast %cst_58 : f32 to vector<48x64xf32>
    %253 = arith.mulf %252, %251 : vector<48x64xf32>
    %254 = arith.addf %249, %253 : vector<48x64xf32>
    %cst_59 = arith.constant 0.797884583 : f32
    %255 = vector.broadcast %cst_59 : f32 to vector<48x64xf32>
    %256 = arith.mulf %255, %254 : vector<48x64xf32>
    %257 = math.tanh %256 : vector<48x64xf32>
    %cst_60 = arith.constant 1.000000e+00 : f32
    %258 = vector.broadcast %cst_60 : f32 to vector<48x64xf32>
    %259 = arith.addf %258, %257 : vector<48x64xf32>
    %cst_61 = arith.constant 5.000000e-01 : f32
    %260 = vector.broadcast %cst_61 : f32 to vector<48x64xf32>
    %261 = arith.mulf %260, %259 : vector<48x64xf32>
    %262 = arith.mulf %249, %261 : vector<48x64xf32>
    %263 = arith.truncf %262 : vector<48x64xf32> to vector<48x64xbf16>
    %c1_62 = arith.constant 1 : index
    %c0_63 = arith.constant 0 : index
    %c0_64 = arith.constant 0 : index
    %264 = vector.load %arg3[%c1_62, %c0_63, %c0_64] : memref<2x64x32xbf16, #tpu.memory_space<vmem>>, vector<1x64x32xbf16>
    %265 = vector.shape_cast %264 : vector<1x64x32xbf16> to vector<64x32xbf16>
    %cst_65 = arith.constant dense<0.000000e+00> : vector<48x32xf32>
    %266 = tpu.matmul %263, %265, %cst_65 {dimension_numbers = #tpu.dot_dimension_numbers<[1], [0], [0], [1], [0, 0, 1, 1], [], []>} : vector<48x64xbf16>, vector<64x32xbf16>, vector<48x32xf32> -> vector<48x32xf32>
    %267 = vector.extract_strided_slice %0 {offsets = [15, 0], sizes = [1, 32], strides = [1, 1]} : vector<32x128xf32> to vector<1x32xf32>
    %268 = vector.broadcast %267 : vector<1x32xf32> to vector<48x32xf32>
    %269 = arith.addf %266, %268 : vector<48x32xf32>
    %270 = arith.addf %243, %269 : vector<48x32xf32>
    %271 = vector.extract_strided_slice %0 {offsets = [12, 0], sizes = [1, 32], strides = [1, 1]} : vector<32x128xf32> to vector<1x32xf32>
    %272 = vector.extract_strided_slice %0 {offsets = [13, 0], sizes = [1, 32], strides = [1, 1]} : vector<32x128xf32> to vector<1x32xf32>
    %cst_66 = arith.constant dense<0.000000e+00> : vector<48xf32>
    %273 = vector.multi_reduction <add>, %270, %cst_66 [1] : vector<48x32xf32> to vector<48xf32>
    %274 = vector.shape_cast %273 : vector<48xf32> to vector<48x1xf32>
    %cst_67 = arith.constant 3.200000e+01 : f32
    %275 = vector.broadcast %cst_67 : f32 to vector<48x1xf32>
    %276 = arith.divf %274, %275 : vector<48x1xf32>
    %277 = vector.broadcast %276 : vector<48x1xf32> to vector<48x32xf32>
    %278 = arith.subf %270, %277 : vector<48x32xf32>
    %279 = arith.mulf %278, %278 : vector<48x32xf32>
    %cst_68 = arith.constant dense<0.000000e+00> : vector<48xf32>
    %280 = vector.multi_reduction <add>, %279, %cst_68 [1] : vector<48x32xf32> to vector<48xf32>
    %281 = vector.shape_cast %280 : vector<48xf32> to vector<48x1xf32>
    %cst_69 = arith.constant 3.200000e+01 : f32
    %282 = vector.broadcast %cst_69 : f32 to vector<48x1xf32>
    %283 = arith.divf %281, %282 : vector<48x1xf32>
    %284 = vector.broadcast %276 : vector<48x1xf32> to vector<48x32xf32>
    %285 = arith.subf %270, %284 : vector<48x32xf32>
    %cst_70 = arith.constant 9.99999996E-13 : f32
    %286 = vector.broadcast %cst_70 : f32 to vector<48x1xf32>
    %287 = arith.addf %283, %286 : vector<48x1xf32>
    %288 = math.rsqrt %287 : vector<48x1xf32>
    %289 = vector.broadcast %288 : vector<48x1xf32> to vector<48x32xf32>
    %290 = arith.mulf %285, %289 : vector<48x32xf32>
    %291 = vector.broadcast %271 : vector<1x32xf32> to vector<48x32xf32>
    %292 = arith.mulf %290, %291 : vector<48x32xf32>
    %293 = vector.broadcast %272 : vector<1x32xf32> to vector<48x32xf32>
    %294 = arith.addf %292, %293 : vector<48x32xf32>
    %295 = arith.truncf %294 : vector<48x32xf32> to vector<48x32xbf16>
    %c0_71 = arith.constant 0 : index
    %c0_72 = arith.constant 0 : index
    %296 = vector.load %arg4[%c0_71, %c0_72] : memref<32x128xbf16, #tpu.memory_space<vmem>>, vector<32x128xbf16>
    %cst_73 = arith.constant dense<0.000000e+00> : vector<48x128xf32>
    %297 = tpu.matmul %295, %296, %cst_73 {dimension_numbers = #tpu.dot_dimension_numbers<[1], [0], [0], [1], [0, 0, 1, 1], [], []>} : vector<48x32xbf16>, vector<32x128xbf16>, vector<48x128xf32> -> vector<48x128xf32>
    %298 = vector.extract_strided_slice %0 {offsets = [26, 0], sizes = [1, 128], strides = [1, 1]} : vector<32x128xf32> to vector<1x128xf32>
    %299 = vector.broadcast %298 : vector<1x128xf32> to vector<48x128xf32>
    %300 = arith.addf %297, %299 : vector<48x128xf32>
    %c0_74 = arith.constant 0 : index
    %c0_75 = arith.constant 0 : index
    %301 = vector.load %arg6[%c0_74, %c0_75] : memref<48x128xf32, #tpu.memory_space<vmem>>, vector<48x128xf32>
    tpu.vector_store %arg6[%c0_74, %c0_75], %300 {strides = array<i32>} : memref<48x128xf32, #tpu.memory_space<vmem>>, vector<48x128xf32>,
    %302 = vector.shape_cast %300 : vector<48x128xf32> to vector<6x8x128xf32>
    %cst_76 = arith.constant dense<0.000000e+00> : vector<6x128xf32>
    %303 = vector.multi_reduction <add>, %302, %cst_76 [1] : vector<6x8x128xf32> to vector<6x128xf32>
    %cst_77 = arith.constant 8.000000e+00 : f32
    %304 = vector.broadcast %cst_77 : f32 to vector<6x128xf32>
    %305 = arith.divf %303, %304 : vector<6x128xf32>
    %cst_78 = arith.constant 0.000000e+00 : f32
    %306 = vector.broadcast %cst_78 : f32 to vector<2x128xf32>
    %307 = tpu.concatenate %305, %306 in 0 : vector<6x128xf32>, vector<2x128xf32> -> vector<8x128xf32>
    %c0_79 = arith.constant 0 : index
    %c0_80 = arith.constant 0 : index
    %308 = vector.load %arg7[%c0_79, %c0_80] : memref<8x128xf32, #tpu.memory_space<vmem>>, vector<8x128xf32>
    tpu.vector_store %arg7[%c0_79, %c0_80], %307 {strides = array<i32>} : memref<8x128xf32, #tpu.memory_space<vmem>>, vector<8x128xf32>,
    return
  }
}

</mosaic_0001>

<bundles_post_ra>
// kernel: lan_model_forward.1
= control target key start
LH: loop header
LB: loop body
LE: loop exit
PB: predicated region body
PF: predicated region fallthrough
CT: control target
= control target key end

     0   :  { %v32_v0 = vlaneseq  ;;  %v5853_v1 = vmov 0.0   ;;  %vm5854_vm0 = vmmov 0   ;;  %s7198_s0 = inlined_call_operand.vmem [shape: s32[6,8], index: 0, kind: input, shape index: {}]   ;;  %s7199_s1 = inlined_call_operand.vmem [shape: bf16[64,32], index: 1, kind: input, shape index: {}]   ;;  %s7200_s2 = inlined_call_operand.vmem [shape: bf16[2,32,192], index: 2, kind: input, shape index: {}]   ;;  %s7201_s3 = inlined_call_operand.vmem [shape: bf16[2,64,32], index: 3, kind: input, shape index: {}]   ;;  %s7202_s4 = inlined_call_operand.vmem [shape: bf16[32,128], index: 4, kind: input, shape index: {}]   ;;  %s7203_s5 = inlined_call_operand.vmem [shape: f32[32,128], index: 5, kind: input, shape index: {}]   ;;  %s7204_s6 = inlined_call_operand.hbm [shape: f32[48,128], index: 6, kind: output, shape index: {0}]   ;;  %s7205_s7 = inlined_call_operand.vmem [shape: f32[8,128], index: 7, kind: output, shape index: {1}]  }
   0x1   :  { %5121 = vmatprep.subr.bf16.mxu0 %v5853_v1  ;;  %5605 = vmatprep.subr.bf16.mxu1 %v5853_v1  ;;  %v5623_v3 = vld [vmem:[%s7199_s1 + $0x18] sm:$0xff]   ;;  %v5917_v4 = vld [vmem:[%s7198_s0] sm:$0x3f]  ;;  %v5624_v10 = vld [vmem:[%s7199_s1 + $0x10] sm:$0xff]  }
   0x2   :  { %v5905_v2 = vshrl.u32 %v32_v0, 7  ;;  %5129 = vmatprep.mubr.msk.bf16.mxu0 %vm5854_vm0, %v5853_v1  ;;  %5137 = vmatprep.mubr.msk.bf16.mxu1 %vm5854_vm0, %v5853_v1  ;;  %v5928_v7 = vld [vmem:[%s7203_s5 + $0x18] sm:$0xff]  ;;  %v5625_v15 = vld [vmem:[%s7199_s1 + $0x8] sm:$0xff]   ;;  %v5626_v19 = vld [vmem:[%s7199_s1] sm:$0xff]  }
   0x3   :  { %5122 = vmatpush3.bf16.msra.mxu0 %v5623_v3  ;;  %5609 = vmatpush3.bf16.msra.mxu1 %v5623_v3 }
   0x4   :  { %v5920_v5 = vsub.s32 0, %v5905_v2  ;;  %v5923_v6 = vsub.s32 2, %v5905_v2  ;;  %v5931_v8 = vsub.s32 1, %v5905_v2  ;;  %v5934_v9 = vsub.s32 3, %v5905_v2  ;;  %5123 = vmatprep.subr.bf16.mxu0 %v5853_v1  ;;  %5606 = vmatprep.subr.bf16.mxu1 %v5853_v1 }
   0x5   :  { %v5950_v14 = vsub.s32 5, %v5905_v2  ;;  %v5960_v18 = vsub.s32 4, %v5905_v2 }
   0x6   :  { %v37_v11 = vrot.slane %v5917_v4, %v5920_v5  ;;  %v51_v12 = vrot.slane %v5917_v4, %v5923_v6  ;;  %v5947_v13 = vrot.slane %v5928_v7, %v5923_v6  ;;  %v44_v16 = vrot.slane %v5917_v4, %v5931_v8 }
   0x7   :  { %v58_v17 = vrot.slane %v5917_v4, %v5934_v9  ;;  %5124 = vmatpush3.bf16.msra.mxu0 %v5624_v10  ;;  %5610 = vmatpush3.bf16.msra.mxu1 %v5624_v10  ;;  %v72_v20 = vrot.slane %v5917_v4, %v5950_v14  ;;  %v65_v21 = vrot.slane %v5917_v4, %v5960_v18 }
   0x8   :  { %39 = vbcast.lane.b32.xlu0 %v37_v11, 256  ;;  %53 = vbcast.lane.b32.xlu1 %v51_v12, 256 }
   0x9   :  { %5125 = vmatprep.subr.bf16.mxu0 %v5853_v1  ;;  %5607 = vmatprep.subr.bf16.mxu1 %v5853_v1 }
   0xb   :  { %5126 = vmatpush3.bf16.msra.mxu0 %v5625_v15  ;;  %5611 = vmatpush3.bf16.msra.mxu1 %v5625_v15 }
   0xc   :  { %46 = vbcast.lane.b32.xlu0 %v44_v16, 256  ;;  %60 = vbcast.lane.b32.xlu1 %v58_v17, 256 }
   0xd   :  { %5127 = vmatprep.subr.bf16.mxu0 %v5853_v1 }
  0x10   :  { %74 = vbcast.lane.b32.xlu1 %v72_v20, 256  ;;  %67 = vbcast.lane.b32.xlu0 %v65_v21, 256 }
  0x11   :  { %13 = vsyncpa [#allocation3], 0  ;;  %5128 = vmatpush3.bf16.msra.mxu0 %v5626_v19  ;;  %5608 = vmatprep.subr.bf16.mxu1 %v5853_v1  ;;  %v33_v22 = vand.u32 127, %v32_v0  ;;  %vm147_vm3 = vcmask 523264   ;;  %v29_v38 = vld [vmem:[%s7203_s5 + $0x10] sm:$0xff]  ;;  %vm220_vm8 = vcmask 261120  }
  0x12   :  { %5163 = vmatprep.subr.bf16.mxu0 %v5853_v1  ;;  %5612 = vmatpush3.bf16.msra.mxu1 %v5626_v19  ;;  %s5855_s19 = smov 80   ;;  %s5856_s20 = smov 112   ;;  %vm491_vm9 = vcmask 130048   ;;  %vm1282_vm10 = vcmask 1043456   ;;  %vm320_vm11 = vcmp.eq.s32.totalorder %v5917_v4, 0  ;;  %vm1132_vm12 = vcmask 64512  }
  0x13   :  { %5141 = vmatprep.subr.bf16.mxu1 %v5853_v1  ;;  %s5857_s21 = smov 96   ;;  %s5859_s22 = smov 32  }
  0x7a   :  { %v40_v23 = vpop.permute.xlu0 %39  ;;  %v54_v24 = vpop.permute.xlu1 %53 }
  0x7b   :  { %vm76_vm1 = vcmp.eq.s32.totalorder %v33_v22, %v40_v23  ;;  %vm78_vm4 = vcmp.eq.s32.totalorder %v33_v22, %v54_v24 }
  0x7c   :  { %v4773_v27 = vsel %vm76_vm1, 1.0, %v5853_v1  ;;  %v4775_v32 = vsel %vm78_vm4, 1.0, %v5853_v1 }
  0x7e   :  { %v47_v25 = vpop.permute.xlu0 %46  ;;  %v61_v26 = vpop.permute.xlu1 %60 }
  0x7f   :  { %vm77_vm2 = vcmp.eq.s32.totalorder %v33_v22, %v47_v25  ;;  %vm79_vm5 = vcmp.eq.s32.totalorder %v33_v22, %v61_v26 }
  0x80   :  { %v4774_v28 = vsel %vm77_vm2, 1.0, %v5853_v1  ;;  %v4776_v33 = vsel %vm79_vm5, 1.0, %v5853_v1 }
  0x81   :  { %v4936_v29 = vpack.c.bf16 %v4774_v28, %v4773_v27  ;;  %v4937_v37 = vpack.c.bf16 %v4776_v33, %v4775_v32 }
  0x82   :  { %v75_v30 = vpop.permute.xlu1 %74  ;;  %v68_v31 = vpop.permute.xlu0 %67 }
  0x83   :  { %5130 = vmatmul.mubr.msk.bf16.vlgmr.msra.gmra.mxu0 %vm147_vm3, %v4936_v29  ;;  %vm81_vm6 = vcmp.eq.s32.totalorder %v33_v22, %v75_v30  ;;  %vm80_vm7 = vcmp.eq.s32.totalorder %v33_v22, %v68_v31 }
  0x84   :  { %v4778_v34 = vsel %vm81_vm6, 1.0, %v5853_v1  ;;  %v4777_v35 = vsel %vm80_vm7, 1.0, %v5853_v1  ;;  %5133 = vmatprep.mubr.msk.bf16.mxu0 %vm5854_vm0, %v5853_v1 }
  0x85   :  { %v4938_v36 = vpack.c.bf16 %v4778_v34, %v4777_v35 }
  0x87   :  { %5138 = vmatmul.mubr.msk.bf16.vlgmr.msra.gmra.mxu1 %vm147_vm3, %v4938_v36 }
  0x88   :  { %5145 = vmatprep.mubr.msk.bf16.mxu1 %vm5854_vm0, %v5853_v1 }
  0x8b   :  { %5134 = vmatmul.mubr.msk.bf16.gmra.mxu0 %vm147_vm3, %v4937_v37 }
  0x8c   :  { %5165 = vmatprep.mubr.msk.bf16.mxu0 %vm5854_vm0, %v5853_v1 }
 0x143   :  { %v191_v39 = vpop.f32.mrf.mxu0 }
 0x144   :  { %v214_v40 = vadd.f32 %v191_v39, %v29_v38 }
 0x145   :  { %v5131_v41 = vpop.f32.mrf.mxu0 }
 0x146   :  { %v221_v42 = vsel %vm220_vm8, %v214_v40, 0.0  ;;  %v6026_v41 = vld [vmem:[%s7200_s2] ss:$8 sps:$4 sm:$0xff]  }
 0x147   :  { %v194_v43 = vpop.f32.mrf.mxu0  ;;  %222 = vadd.xlane.f32.xlu0 %v221_v42  ;;  %v207_v44 = vpop.f32.mrf.mxu1 }
 0x148   :  { %v215_v45 = vadd.f32 %v194_v43, %v29_v38  ;;  %v218_v46 = vadd.f32 %v207_v44, %v29_v38 }
 0x149   :  { %v5132_v47 = vpop.f32.mrf.mxu0  ;;  %v5139_v48 = vpop.f32.mrf.mxu1 }
 0x14a   :  { %v224_v49 = vsel %vm220_vm8, %v215_v45, 0.0  ;;  %v233_v53 = vsel %vm220_vm8, %v218_v46, 0.0 }
 0x14b   :  { %v199_v50 = vpop.f32.mrf.mxu0  ;;  %225 = vadd.xlane.f32.xlu1 %v224_v49  ;;  %v210_v51 = vpop.f32.mrf.mxu1 }
 0x14c   :  { %v216_v52 = vadd.f32 %v199_v50, %v29_v38  ;;  %v219_v59 = vadd.f32 %v210_v51, %v29_v38 }
 0x14d   :  { %v5135_v54 = vpop.f32.mrf.mxu0  ;;  %v5140_v55 = vpop.f32.mrf.mxu1 }
 0x14e   :  { %v227_v56 = vsel %vm220_vm8, %v216_v52, 0.0  ;;  %v236_v62 = vsel %vm220_vm8, %v219_v59, 0.0 }
 0x14f   :  { %v202_v57 = vpop.f32.mrf.mxu0  ;;  %234 = vadd.xlane.f32.xlu1 %v233_v53  ;;  %228 = vadd.xlane.f32.xlu0 %v227_v56 }
 0x150   :  { %v217_v58 = vadd.f32 %v202_v57, %v29_v38 }
 0x151   :  { %v5136_v60 = vpop.f32.mrf.mxu0 }
 0x152   :  { %v230_v61 = vsel %vm220_vm8, %v217_v58, 0.0  ;;  %v303_v60 = vrot.slane %v5928_v7, %v5920_v5 }
 0x153   :  { %231 = vadd.xlane.f32.xlu0 %v230_v61 }
 0x157   :  { %237 = vadd.xlane.f32.xlu0 %v236_v62 }
 0x1d0   :  { %v223_v63 = vpop.xlane.xlu0 %222 }
 0x1d1   :  { %v240_v0 = vmul.f32 0.03125, %v223_v63 }
 0x1d3   :  { %v5999_v3 = vsub.f32 %v214_v40, %v240_v0  ;;  %v6020_v40 = vld [vmem:[%s7200_s2 + $0x10] ss:$8 sps:$4 sm:$0xff]   ;;  %v313_v0 = vrot.slane %v5928_v7, %v5931_v8 }
 0x1d4   :  { %v226_v10 = vpop.xlane.xlu1 %225  ;;  %5142 = vmatpush3.bf16.msra.mxu1 %v6020_v40 }
 0x1d5   :  { %v241_v11 = vmul.f32 0.03125, %v226_v10  ;;  %v252_v12 = vmul.f32 %v5999_v3, %v5999_v3  ;;  %5143 = vmatprep.subr.bf16.mxu1 %v5853_v1 }
 0x1d7   :  { %v6003_v15 = vsub.f32 %v215_v45, %v241_v11  ;;  %v258_v16 = vsel %vm220_vm8, %v252_v12, 0.0 }
 0x1d8   :  { %v235_v17 = vpop.xlane.xlu1 %234  ;;  %259 = vadd.xlane.f32.xlu1 %v258_v16  ;;  %v229_v19 = vpop.xlane.xlu0 %228  ;;  %5144 = vmatpush3.bf16.msra.mxu1 %v6026_v41 }
 0x1d9   :  { %v244_v20 = vmul.f32 0.03125, %v235_v17  ;;  %v242_v21 = vmul.f32 0.03125, %v229_v19  ;;  %v253_v22 = vmul.f32 %v6003_v15, %v6003_v15  ;;  %5157 = vmatprep.subr.bf16.mxu1 %v5853_v1 }
 0x1db   :  { %v6008_v23 = vsub.f32 %v218_v46, %v244_v20  ;;  %v248_v24 = vsub.f32 %v216_v52, %v242_v21  ;;  %v261_v25 = vsel %vm220_vm8, %v253_v22, 0.0 }
 0x1dc   :  { %262 = vadd.xlane.f32.xlu0 %v261_v25  ;;  %v232_v26 = vpop.xlane.xlu0 %231 }
 0x1dd   :  { %v243_v27 = vmul.f32 0.03125, %v232_v26  ;;  %v254_v28 = vmul.f32 %v248_v24, %v248_v24  ;;  %v256_v31 = vmul.f32 %v6008_v23, %v6008_v23 }
 0x1df   :  { %v249_v29 = vsub.f32 %v217_v58, %v243_v27  ;;  %v264_v30 = vsel %vm220_vm8, %v254_v28, 0.0  ;;  %v270_v36 = vsel %vm220_vm8, %v256_v31, 0.0 }
 0x1e0   :  { %265 = vadd.xlane.f32.xlu1 %v264_v30  ;;  %v238_v32 = vpop.xlane.xlu0 %237 }
 0x1e1   :  { %v245_v33 = vmul.f32 0.03125, %v238_v32  ;;  %v255_v34 = vmul.f32 %v249_v29, %v249_v29 }
 0x1e3   :  { %v251_v35 = vsub.f32 %v219_v59, %v245_v33  ;;  %v267_v37 = vsel %vm220_vm8, %v255_v34, 0.0 }
 0x1e4   :  { %271 = vadd.xlane.f32.xlu1 %v270_v36  ;;  %268 = vadd.xlane.f32.xlu0 %v267_v37 }
 0x1e5   :  { %v257_v38 = vmul.f32 %v251_v35, %v251_v35 }
 0x1e7   :  { %v273_v39 = vsel %vm220_vm8, %v257_v38, 0.0 }
 0x1e8   :  { %274 = vadd.xlane.f32.xlu0 %v273_v39 }
 0x261   :  { %v260_v42 = vpop.xlane.xlu1 %259 }
 0x262   :  { %v276_v43 = vmul.f32 0.03125, %v260_v42 }
 0x264   :  { %v282_v44 = vadd.f32 1e-12, %v276_v43 }
 0x265   :  { %v263_v45 = vpop.xlane.xlu0 %262 }
 0x266   :  { %5649 = vrsqrt.f32 %v282_v44  ;;  %v277_v46 = vmul.f32 0.03125, %v263_v45 }
 0x268   :  { %v283_v47 = vadd.f32 1e-12, %v277_v46 }
 0x269   :  { %v266_v48 = vpop.xlane.xlu1 %265 }
 0x26a   :  { %5651 = vrsqrt.f32 %v283_v47  ;;  %v278_v49 = vmul.f32 0.03125, %v266_v48 }
 0x26c   :  { %v284_v50 = vadd.f32 1e-12, %v278_v49 }
 0x26d   :  { %v272_v51 = vpop.xlane.xlu1 %271  ;;  %v269_v52 = vpop.xlane.xlu0 %268 }
 0x26e   :  { %5653 = vrsqrt.f32 %v284_v50  ;;  %v280_v53 = vmul.f32 0.03125, %v272_v51  ;;  %v279_v54 = vmul.f32 0.03125, %v269_v52 }
 0x270   :  { %v285_v55 = vadd.f32 1e-12, %v279_v54  ;;  %v286_v56 = vadd.f32 1e-12, %v280_v53 }
 0x271   :  { %v275_v57 = vpop.xlane.xlu0 %274 }
 0x272   :  { %v281_v58 = vmul.f32 0.03125, %v275_v57  ;;  %5655 = vrsqrt.f32 %v285_v55 }
 0x273   :  { %v5650_v59 = vpop.eup %5649  ;;  %5657 = vrsqrt.f32 %v286_v56 }
 0x274   :  { %v294_v61 = vmul.f32 %v5650_v59, %v5999_v3  ;;  %v287_v62 = vadd.f32 1e-12, %v281_v58 }
 0x276   :  { %5659 = vrsqrt.f32 %v287_v62  ;;  %v304_v11 = vmul.f32 %v303_v60, %v294_v61 }
 0x277   :  { %v5652_v63 = vpop.eup %5651 }
 0x278   :  { %v295_v10 = vmul.f32 %v5652_v63, %v6003_v15  ;;  %v6037_v17 = vadd.f32 %v313_v0, %v304_v11 }
 0x27a   :  { %v305_v12 = vmul.f32 %v303_v60, %v295_v10 }
 0x27b   :  { %v5654_v16 = vpop.eup %5653 }
 0x27c   :  { %v6039_v19 = vadd.f32 %v313_v0, %v305_v12  ;;  %v296_v20 = vmul.f32 %v5654_v16, %v248_v24 }
 0x27e   :  { %v374_v3 = vpack.c.bf16 %v6039_v19, %v6037_v17  ;;  %v306_v22 = vmul.f32 %v303_v60, %v296_v20 }
 0x27f   :  { %v5656_v21 = vpop.eup %5655 }
 0x280   :  { %5146 = vmatmul.mubr.msk.bf16.vlgmr.msra.gmra.mxu1 %vm220_vm8, %v374_v3  ;;  %v297_v7 = vmul.f32 %v5656_v21, %v249_v29  ;;  %v5658_v15 = vpop.eup %5657  ;;  %v6046_v28 = vadd.f32 %v313_v0, %v306_v22 }
 0x281   :  { %5149 = vmatprep.mubr.msk.bf16.mxu1 %vm5854_vm0, %v5853_v1  ;;  %v298_v24 = vmul.f32 %v5658_v15, %v6008_v23  ;;  %v27_v23 = vld [vmem:[%s7203_s5] sm:$0xff] }
 0x282   :  { %v307_v26 = vmul.f32 %v303_v60, %v297_v7  ;;  %v380_v36 = vrot.slane %v27_v23, %v5920_v5 }
 0x283   :  { %v5660_v25 = vpop.eup %5659  ;;  %v308_v33 = vmul.f32 %v303_v60, %v298_v24 }
 0x284   :  { %v299_v27 = vmul.f32 %v5660_v25, %v251_v35  ;;  %v6048_v30 = vadd.f32 %v313_v0, %v307_v26 }
 0x285   :  { %v6058_v34 = vadd.f32 %v313_v0, %v308_v33 }
 0x286   :  { %v375_v31 = vpack.c.bf16 %v6048_v30, %v6046_v28  ;;  %v309_v32 = vmul.f32 %v303_v60, %v299_v27 }
 0x288   :  { %5150 = vmatmul.mubr.msk.bf16.gmra.mxu1 %vm220_vm8, %v375_v31  ;;  %v6056_v29 = vadd.f32 %v313_v0, %v309_v32 }
 0x289   :  { %5153 = vmatprep.mubr.msk.bf16.mxu1 %vm5854_vm0, %v5853_v1 }
 0x28a   :  { %v376_v35 = vpack.c.bf16 %v6056_v29, %v6058_v34 }
 0x290   :  { %5154 = vmatmul.mubr.msk.bf16.gmra.mxu1 %vm220_vm8, %v376_v35 }
 0x291   :  { %5159 = vmatprep.mubr.msk.bf16.mxu1 %vm5854_vm0, %v5853_v1 }
 0x340   :  { %v436_v37 = vpop.f32.mrf.mxu1 }
 0x341   :  { %v437_v38 = vadd.f32 %v436_v37, %v380_v36 }
 0x342   :  { %v5147_v39 = vpop.f32.mrf.mxu1 }
 0x343   :  { %v6069_v42 = vpack.c.bf16 %v437_v38, %v437_v38 }
 0x344   :  { %v439_v43 = vpop.f32.mrf.mxu1 }
 0x345   :  { %v440_v44 = vadd.f32 %v439_v43, %v380_v36  ;;  %477 = vrot.lane.b32.xlu1 %v6069_v42, %s5855_s19 }
 0x346   :  { %v5148_v45 = vpop.f32.mrf.mxu1 }
 0x347   :  { %v6073_v46 = vpack.c.bf16 %v440_v44, %v440_v44 }
 0x348   :  { %v444_v47 = vpop.f32.mrf.mxu1 }
 0x349   :  { %479 = vrot.lane.b32.xlu0 %v6073_v46, %s5855_s19  ;;  %v445_v48 = vadd.f32 %v444_v47, %v380_v36 }
 0x34a   :  { %v5151_v49 = vpop.f32.mrf.mxu1 }
 0x34b   :  { %v6077_v50 = vpack.c.bf16 %v445_v48, %v445_v48 }
 0x34c   :  { %v447_v51 = vpop.f32.mrf.mxu1 }
 0x34d   :  { %v448_v52 = vadd.f32 %v447_v51, %v380_v36  ;;  %481 = vrot.lane.b32.xlu1 %v6077_v50, %s5855_s19 }
 0x34e   :  { %v5152_v53 = vpop.f32.mrf.mxu1 }
 0x34f   :  { %v6081_v54 = vpack.c.bf16 %v448_v52, %v448_v52 }
 0x350   :  { %v452_v55 = vpop.f32.mrf.mxu1 }
 0x351   :  { %v453_v56 = vadd.f32 %v452_v55, %v380_v36  ;;  %483 = vrot.lane.b32.xlu1 %v6081_v54, %s5855_s19 }
 0x352   :  { %v5155_v57 = vpop.f32.mrf.mxu1 }
 0x353   :  { %v6085_v58 = vpack.c.bf16 %v453_v56, %v453_v56  ;;  %v5858_v57 = vmov 1966171168  }
 0x354   :  { %v455_v59 = vpop.f32.mrf.mxu1 }
 0x355   :  { %v456_v60 = vadd.f32 %v455_v59, %v380_v36  ;;  %485 = vrot.lane.b32.xlu0 %v6085_v58, %s5855_s19 }
 0x356   :  { %v5156_v61 = vpop.f32.mrf.mxu1 }
 0x357   :  { %v6089_v62 = vpack.c.bf16 %v456_v60, %v456_v60  ;;  %v321_v61 = vsel %vm320_vm11, -1e+09, %v5853_v1 }
 0x359   :  { %489 = vrot.lane.b32.xlu0 %v6069_v42, %s5856_s20  ;;  %487 = vrot.lane.b32.xlu1 %v6089_v62, %s5855_s19 }
 0x35d   :  { %586 = vrot.lane.b32.xlu0 %v6077_v50, %s5856_s20  ;;  %538 = vrot.lane.b32.xlu1 %v6073_v46, %s5856_s20 }
 0x361   :  { %682 = vrot.lane.b32.xlu0 %v6085_v58, %s5856_s20  ;;  %634 = vrot.lane.b32.xlu1 %v6081_v54, %s5856_s20 }
 0x365   :  { %730 = vrot.lane.b32.xlu1 %v6089_v62, %s5856_s20 }
 0x3b7   :  { %v6105_v63 = vpop.permute.xlu1 %477 }
 0x3b8   :  { %v6109_v0 = vcombine.low %v6105_v63, %v6105_v63 }
 0x3ba   :  { %780 = vrot.lane.b32.xlu0 %v6109_v0, %s5856_s20 }
 0x3bb   :  { %v6113_v10 = vpop.permute.xlu0 %479 }
 0x3bc   :  { %v6117_v11 = vcombine.low %v6113_v10, %v6113_v10 }
 0x3be   :  { %830 = vrot.lane.b32.xlu1 %v6117_v11, %s5856_s20 }
 0x3bf   :  { %v6121_v12 = vpop.permute.xlu1 %481 }
 0x3c0   :  { %v6125_v16 = vcombine.low %v6121_v12, %v6121_v12 }
 0x3c2   :  { %880 = vrot.lane.b32.xlu0 %v6125_v16, %s5856_s20 }
 0x3c3   :  { %v6129_v20 = vpop.permute.xlu1 %483 }
 0x3c4   :  { %v6133_v3 = vcombine.low %v6129_v20, %v6129_v20 }
 0x3c6   :  { %930 = vrot.lane.b32.xlu1 %v6133_v3, %s5856_s20 }
 0x3c7   :  { %v6137_v21 = vpop.permute.xlu0 %485 }
 0x3c8   :  { %v6141_v7 = vcombine.low %v6137_v21, %v6137_v21 }
 0x3ca   :  { %980 = vrot.lane.b32.xlu0 %v6141_v7, %s5856_s20 }
 0x3cb   :  { %v490_v22 = vpop.permute.xlu0 %489  ;;  %v6145_v15 = vpop.permute.xlu1 %487 }
 0x3cc   :  { %v496_v25 = vsel %vm491_vm9, %v490_v22, 0  ;;  %v6150_v26 = vcombine.low %v6145_v15, %v6145_v15 }
 0x3cd   :  { %5158 = vmatpush3.bf16.xpose.msra.mxu1 %v496_v25 }
 0x3ce   :  { %1326 = vrot.lane.b32.xlu0 %v6073_v46, %s5857_s21  ;;  %1030 = vrot.lane.b32.xlu1 %v6150_v26, %s5856_s20 }
 0x3cf   :  { %v539_v27 = vpop.permute.xlu1 %538  ;;  %5169 = vmatprep.subr.bf16.mxu1 %v5853_v1  ;;  %v587_v31 = vpop.permute.xlu0 %586 }
 0x3d0   :  { %v544_v24 = vsel %vm491_vm9, %v539_v27, 0  ;;  %v592_v32 = vsel %vm491_vm9, %v587_v31, 0  ;;  %v323_v31 = vcombine.high %v321_v61, %v321_v61 }
 0x3d1   :  { %5164 = vmatpush3.bf16.xpose.msra.mxu0 %v544_v24 }
 0x3d2   :  { %1422 = vrot.lane.b32.xlu0 %v6081_v54, %s5857_s21  ;;  %1277 = vrot.lane.b32.xlu1 %v6069_v42, %s5857_s21 }
 0x3d3   :  { %5175 = vmatprep.subr.bf16.mxu0 %v5853_v1  ;;  %v635_v33 = vpop.permute.xlu1 %634  ;;  %v683_v23 = vpop.permute.xlu0 %682 }
 0x3d4   :  { %5160 = vmatmul.mubr.msk.bf16.vlgmr.msra.gmra.mxu1 %vm491_vm9, %v6069_v42  ;;  %v640_v35 = vsel %vm491_vm9, %v635_v33, 0  ;;  %v688_v36 = vsel %vm491_vm9, %v683_v23, 0 }
 0x3d5   :  { %5170 = vmatpush3.bf16.xpose.msra.mxu1 %v592_v32  ;;  %5171 = vmatprep.mubr.msk.bf16.mxu1 %vm5854_vm0, %v5853_v1 }
 0x3d6   :  { %1374 = vrot.lane.b32.xlu1 %v6077_v50, %s5857_s21  ;;  %5181 = vmatprep.subr.bf16.mxu1 %v5853_v1 }
 0x3d7   :  { %v731_v37 = vpop.permute.xlu1 %730 }
 0x3d8   :  { %5166 = vmatmul.mubr.msk.bf16.vlgmr.msra.gmra.mxu0 %vm491_vm9, %v6073_v46  ;;  %v736_v38 = vsel %vm491_vm9, %v731_v37, 0 }
 0x3d9   :  { %5176 = vmatpush3.bf16.xpose.msra.mxu0 %v640_v35  ;;  %5177 = vmatprep.mubr.msk.bf16.mxu0 %vm5854_vm0, %v5853_v1 }
 0x3da   :  { %1470 = vrot.lane.b32.xlu1 %v6085_v58, %s5857_s21  ;;  %5187 = vmatprep.subr.bf16.mxu0 %v5853_v1 }
 0x3dc   :  { %5172 = vmatmul.mubr.msk.bf16.vlgmr.msra.gmra.mxu1 %vm491_vm9, %v6077_v50 }
 0x3dd   :  { %5182 = vmatpush3.bf16.xpose.msra.mxu1 %v688_v36  ;;  %5183 = vmatprep.mubr.msk.bf16.mxu1 %vm5854_vm0, %v5853_v1 }
 0x3de   :  { %5193 = vmatprep.subr.bf16.mxu1 %v5853_v1 }
 0x3e0   :  { %5178 = vmatmul.mubr.msk.bf16.vlgmr.msra.gmra.mxu0 %vm491_vm9, %v6081_v54 }
 0x3e1   :  { %5188 = vmatpush3.bf16.xpose.msra.mxu0 %v736_v38  ;;  %5189 = vmatprep.mubr.msk.bf16.mxu0 %vm5854_vm0, %v5853_v1 }
 0x3e2   :  { %5199 = vmatprep.subr.bf16.mxu0 %v5853_v1 }
 0x3e4   :  { %5184 = vmatmul.mubr.msk.bf16.vlgmr.msra.gmra.mxu1 %vm491_vm9, %v6085_v58  ;;  %v325_v58 = vunpack.c.l.s4 %v5858_v57 }
 0x3e5   :  { %5195 = vmatprep.mubr.msk.bf16.mxu1 %vm5854_vm0, %v5853_v1 }
 0x3e6   :  { %v326_v59 = vunpack.c.0.s8 %v325_v58 }
 0x3e8   :  { %5190 = vmatmul.mubr.msk.bf16.vlgmr.msra.gmra.mxu0 %vm491_vm9, %v6089_v62  ;;  %v329_v60 = vsub.s32 %v326_v59, %v5905_v2 }
 0x3e9   :  { %5201 = vmatprep.mubr.msk.bf16.mxu0 %vm5854_vm0, %v5853_v1 }
 0x42c   :  { %v781_v39 = vpop.permute.xlu0 %780 }
 0x42d   :  { %v786_v42 = vsel %vm491_vm9, %v781_v39, 0 }
 0x42e   :  { %5194 = vmatpush3.bf16.xpose.msra.mxu1 %v786_v42 }
 0x42f   :  { %5205 = vmatprep.subr.bf16.mxu1 %v5853_v1 }
 0x430   :  { %v831_v43 = vpop.permute.xlu1 %830 }
 0x431   :  { %v836_v44 = vsel %vm491_vm9, %v831_v43, 0  ;;  %v337_v43 = vrot.slane %v323_v31, %v329_v60 }
 0x432   :  { %5200 = vmatpush3.bf16.xpose.msra.mxu0 %v836_v44 }
 0x433   :  { %5211 = vmatprep.subr.bf16.mxu0 %v5853_v1 }
 0x434   :  { %v881_v45 = vpop.permute.xlu0 %880 }
 0x435   :  { %5196 = vmatmul.mubr.msk.bf16.vlgmr.msra.gmra.mxu1 %vm491_vm9, %v6105_v63  ;;  %v886_v46 = vsel %vm491_vm9, %v881_v45, 0  ;;  %v330_v63 = vrot.slane %v321_v61, %v329_v60 }
 0x436   :  { %5207 = vmatprep.mubr.msk.bf16.mxu1 %vm5854_vm0, %v5853_v1  ;;  %5206 = vmatpush3.bf16.xpose.msra.mxu1 %v886_v46 }
 0x437   :  { %5217 = vmatprep.subr.bf16.mxu1 %v5853_v1 }
 0x438   :  { %v931_v47 = vpop.permute.xlu1 %930 }
 0x439   :  { %5202 = vmatmul.mubr.msk.bf16.vlgmr.msra.gmra.mxu0 %vm491_vm9, %v6113_v10  ;;  %v936_v48 = vsel %vm491_vm9, %v931_v47, 0  ;;  %v346_v10 = vrot.slane %v330_v63, %v329_v60 }
 0x43a   :  { %5213 = vmatprep.mubr.msk.bf16.mxu0 %vm5854_vm0, %v5853_v1  ;;  %5212 = vmatpush3.bf16.xpose.msra.mxu0 %v936_v48 }
 0x43b   :  { %5223 = vmatprep.subr.bf16.mxu0 %v5853_v1  ;;  %v368_v24 = vcombine.high %v346_v10, %v346_v10 }
 0x43c   :  { %v981_v49 = vpop.permute.xlu0 %980 }
 0x43d   :  { %v986_v50 = vsel %vm491_vm9, %v981_v49, 0  ;;  %5208 = vmatmul.mubr.msk.bf16.vlgmr.msra.gmra.mxu1 %vm491_vm9, %v6121_v12  ;;  %v338_v12 = vcombine.high %v330_v63, %v330_v63  ;;  %v6257_v39 = vrot.slane %v368_v24, %v5920_v5 }
 0x43e   :  { %5218 = vmatpush3.bf16.xpose.msra.mxu1 %v986_v50  ;;  %5219 = vmatprep.mubr.msk.bf16.mxu1 %vm5854_vm0, %v5853_v1 }
 0x43f   :  { %5229 = vmatprep.subr.bf16.mxu1 %v5853_v1 }
 0x440   :  { %v1031_v51 = vpop.permute.xlu1 %1030  ;;  %v1327_v55 = vpop.permute.xlu0 %1326 }
 0x441   :  { %v1036_v52 = vsel %vm491_vm9, %v1031_v51, 0  ;;  %5214 = vmatmul.mubr.msk.bf16.vlgmr.msra.gmra.mxu0 %vm491_vm9, %v6129_v20  ;;  %v1332_v56 = vsel %vm1282_vm10, %v1327_v55, 0  ;;  %v6243_v20 = vrot.slane %v346_v10, %v5920_v5 }
 0x442   :  { %5224 = vmatpush3.bf16.xpose.msra.mxu0 %v1036_v52  ;;  %5225 = vmatprep.mubr.msk.bf16.mxu0 %vm5854_vm0, %v5853_v1  ;;  %v353_v52 = vrot.slane %v337_v43, %v329_v60 }
 0x443   :  { %5235 = vmatprep.subr.bf16.mxu0 %v5853_v1 }
 0x444   :  { %v1278_v53 = vpop.permute.xlu1 %1277  ;;  %v6273_v63 = vrot.slane %v353_v52, %v5920_v5 }
 0x445   :  { %v1284_v54 = vsel %vm1282_vm10, %v1278_v53, 0  ;;  %5220 = vmatmul.mubr.msk.bf16.vlgmr.msra.gmra.mxu1 %vm491_vm9, %v6137_v21  ;;  %v360_v21 = vrot.slane %v338_v12, %v329_v60  ;;  %v339_v53 = vcombine.high %v337_v43, %v337_v43 }
 0x446   :  { %5230 = vmatpush3.bf16.msra.mxu1 %v1284_v54  ;;  %5231 = vmatprep.mubr.msk.bf16.mxu1 %vm5854_vm0, %v5853_v1 }
 0x447   :  { %5241 = vmatprep.subr.bf16.mxu1 %v5853_v1  ;;  %v6249_v4 = vrot.slane %v360_v21, %v5920_v5  ;;  %v369_v42 = vcombine.high %v360_v21, %v360_v21  ;;  %v367_v10 = vrot.slane %v339_v53, %v329_v60 }
 0x449   :  { %5226 = vmatmul.mubr.msk.bf16.vlgmr.msra.gmra.mxu0 %vm491_vm9, %v6145_v15  ;;  %v6265_v51 = vrot.slane %v369_v42, %v5920_v5 }
 0x44a   :  { %5236 = vmatpush3.bf16.msra.mxu0 %v1332_v56  ;;  %5237 = vmatprep.mubr.msk.bf16.mxu0 %vm5854_vm0, %v5853_v1 }
 0x44b   :  { %5247 = vmatprep.subr.bf16.mxu0 %v5853_v1 }
 0x494   :  { %v532_v22 = vpop.f32.mrf.mxu1 }
 0x495   :  { %v1078_v15 = vmul.f32 0.25, %v532_v22 }
 0x496   :  { %v5161_v25 = vpop.f32.mrf.mxu1 }
 0x497   :  { %v6246_v27 = vadd.f32 %v6243_v20, %v1078_v15 }
 0x498   :  { %v535_v32 = vpop.f32.mrf.mxu1  ;;  %v580_v33 = vpop.f32.mrf.mxu0 }
 0x499   :  { %v1079_v35 = vmul.f32 0.25, %v580_v33  ;;  %v1133_v23 = vsel %vm1132_vm12, %v6246_v27, -inf  ;;  %v6281_v32 = vrot.slane %v367_v10, %v5920_v5 }
 0x49a   :  { %v5162_v36 = vpop.f32.mrf.mxu1  ;;  %1134 = vmax.xlane.f32.xlu0 %v1133_v23  ;;  %v5167_v37 = vpop.f32.mrf.mxu0 }
 0x49b   :  { %v6254_v38 = vadd.f32 %v6249_v4, %v1079_v35 }
 0x49c   :  { %v583_v44 = vpop.f32.mrf.mxu0  ;;  %v628_v45 = vpop.f32.mrf.mxu1 }
 0x49d   :  { %v1080_v46 = vmul.f32 0.25, %v628_v45  ;;  %v1136_v47 = vsel %vm1132_vm12, %v6254_v38, -inf }
 0x49e   :  { %v5173_v48 = vpop.f32.mrf.mxu1  ;;  %1137 = vmax.xlane.f32.xlu1 %v1136_v47  ;;  %v5168_v49 = vpop.f32.mrf.mxu0 }
 0x49f   :  { %v6262_v50 = vadd.f32 %v6257_v39, %v1080_v46 }
 0x4a0   :  { %v631_v54 = vpop.f32.mrf.mxu1  ;;  %v676_v55 = vpop.f32.mrf.mxu0 }
 0x4a1   :  { %v1081_v56 = vmul.f32 0.25, %v676_v55  ;;  %v1139_v57 = vsel %vm1132_vm12, %v6262_v50, -inf }
 0x4a2   :  { %v5174_v58 = vpop.f32.mrf.mxu1  ;;  %1140 = vmax.xlane.f32.xlu0 %v1139_v57  ;;  %v5179_v59 = vpop.f32.mrf.mxu0 }
 0x4a3   :  { %v6270_v61 = vadd.f32 %v6265_v51, %v1081_v56 }
 0x4a4   :  { %v679_v12 = vpop.f32.mrf.mxu0  ;;  %v724_v21 = vpop.f32.mrf.mxu1 }
 0x4a5   :  { %v1082_v22 = vmul.f32 0.25, %v724_v21  ;;  %v1142_v15 = vsel %vm1132_vm12, %v6270_v61, -inf }
 0x4a6   :  { %v5185_v25 = vpop.f32.mrf.mxu1  ;;  %1143 = vmax.xlane.f32.xlu0 %v1142_v15  ;;  %v5180_v24 = vpop.f32.mrf.mxu0 }
 0x4a7   :  { %v6278_v31 = vadd.f32 %v6273_v63, %v1082_v22 }
 0x4a8   :  { %v727_v33 = vpop.f32.mrf.mxu1  ;;  %v772_v35 = vpop.f32.mrf.mxu0 }
 0x4a9   :  { %v1083_v23 = vmul.f32 0.25, %v772_v35  ;;  %v1145_v60 = vsel %vm1132_vm12, %v6278_v31, -inf }
 0x4aa   :  { %v5186_v36 = vpop.f32.mrf.mxu1  ;;  %1146 = vmax.xlane.f32.xlu1 %v1145_v60  ;;  %v5191_v37 = vpop.f32.mrf.mxu0 }
 0x4ab   :  { %v6286_v42 = vadd.f32 %v6281_v32, %v1083_v23 }
 0x4ac   :  { %v775_v43 = vpop.f32.mrf.mxu0 }
 0x4ad   :  { %v1148_v44 = vsel %vm1132_vm12, %v6286_v42, -inf }
 0x4ae   :  { %1149 = vmax.xlane.f32.xlu0 %v1148_v44  ;;  %v5192_v45 = vpop.f32.mrf.mxu0 }
 0x4f5   :  { %v822_v46 = vpop.f32.mrf.mxu1 }
 0x4f6   :  { %v1084_v47 = vmul.f32 0.25, %v822_v46 }
 0x4f7   :  { %v5197_v48 = vpop.f32.mrf.mxu1 }
 0x4f8   :  { %v6291_v49 = vadd.f32 %v6243_v20, %v1084_v47 }
 0x4f9   :  { %v825_v52 = vpop.f32.mrf.mxu1  ;;  %v872_v53 = vpop.f32.mrf.mxu0 }
 0x4fa   :  { %v1085_v54 = vmul.f32 0.25, %v872_v53  ;;  %v1151_v55 = vsel %vm1132_vm12, %v6291_v49, -inf }
 0x4fb   :  { %v5198_v56 = vpop.f32.mrf.mxu1  ;;  %1152 = vmax.xlane.f32.xlu1 %v1151_v55  ;;  %v5203_v57 = vpop.f32.mrf.mxu0 }
 0x4fc   :  { %v6296_v58 = vadd.f32 %v6249_v4, %v1085_v54 }
 0x4fd   :  { %v875_v59 = vpop.f32.mrf.mxu0  ;;  %v922_v10 = vpop.f32.mrf.mxu1 }
 0x4fe   :  { %v1154_v12 = vsel %vm1132_vm12, %v6296_v58, -inf  ;;  %v1086_v21 = vmul.f32 0.25, %v922_v10 }
 0x4ff   :  { %1155 = vmax.xlane.f32.xlu0 %v1154_v12  ;;  %v5204_v22 = vpop.f32.mrf.mxu0  ;;  %v5209_v15 = vpop.f32.mrf.mxu1 }
 0x500   :  { %v6301_v25 = vadd.f32 %v6257_v39, %v1086_v21  ;;  %v6322_v15 = vpop.permute.xlu1 %1374 }
 0x501   :  { %v925_v24 = vpop.f32.mrf.mxu1  ;;  %v972_v33 = vpop.f32.mrf.mxu0 }
 0x502   :  { %v1087_v35 = vmul.f32 0.25, %v972_v33  ;;  %v1157_v23 = vsel %vm1132_vm12, %v6301_v25, -inf  ;;  %v6326_v24 = vpop.permute.xlu0 %1422 }
 0x503   :  { %v5210_v60 = vpop.f32.mrf.mxu1  ;;  %1158 = vmax.xlane.f32.xlu1 %v1157_v23  ;;  %v5215_v36 = vpop.f32.mrf.mxu0 }
 0x504   :  { %v6306_v37 = vadd.f32 %v6265_v51, %v1087_v35  ;;  %v6328_v33 = vpop.permute.xlu1 %1470 }
 0x505   :  { %v975_v43 = vpop.f32.mrf.mxu0  ;;  %v1022_v44 = vpop.f32.mrf.mxu1 }
 0x506   :  { %v1088_v45 = vmul.f32 0.25, %v1022_v44  ;;  %v1160_v46 = vsel %vm1132_vm12, %v6306_v37, -inf }
 0x507   :  { %v5221_v47 = vpop.f32.mrf.mxu1  ;;  %1161 = vmax.xlane.f32.xlu0 %v1160_v46  ;;  %v5216_v48 = vpop.f32.mrf.mxu0 }
 0x508   :  { %v6311_v52 = vadd.f32 %v6273_v63, %v1088_v45 }
 0x509   :  { %v1025_v53 = vpop.f32.mrf.mxu1  ;;  %v1072_v54 = vpop.f32.mrf.mxu0 }
 0x50a   :  { %v1089_v55 = vmul.f32 0.25, %v1072_v54  ;;  %v1163_v56 = vsel %vm1132_vm12, %v6311_v52, -inf }
 0x50b   :  { %v5222_v57 = vpop.f32.mrf.mxu1  ;;  %1164 = vmax.xlane.f32.xlu1 %v1163_v56  ;;  %v5227_v59 = vpop.f32.mrf.mxu0 }
 0x50c   :  { %v6316_v10 = vadd.f32 %v6281_v32, %v1089_v55 }
 0x50d   :  { %v1075_v12 = vpop.f32.mrf.mxu0 }
 0x50e   :  { %v1166_v21 = vsel %vm1132_vm12, %v6316_v10, -inf }
 0x50f   :  { %1167 = vmax.xlane.f32.xlu0 %v1166_v21  ;;  %v5228_v22 = vpop.f32.mrf.mxu0 }
 0x51c   :  { %1566 = vrot.lane.b32.xlu1 %v6109_v0, %s5857_s21 }
 0x520   :  { %1614 = vrot.lane.b32.xlu1 %v6117_v11, %s5857_s21 }
 0x523   :  { %v1135_v35 = vpop.xlane.xlu0 %1134 }
 0x524   :  { %v1169_v60 = vsub.f32 %v6246_v27, %v1135_v35 }
 0x525   :  { %1518 = vrot.lane.b32.xlu0 %v6089_v62, %s5857_s21 }
 0x526   :  { %v1181_v0 = vmul.f32 1.442695, %v1169_v60 }
 0x527   :  { %v1138_v23 = vpop.xlane.xlu1 %1137 }
 0x528   :  { %v1170_v36 = vsub.f32 %v6254_v38, %v1138_v23  ;;  %5661 = vpow2.f32 %v1181_v0 }
 0x52a   :  { %v1183_v45 = vmul.f32 1.442695, %v1170_v36 }
 0x52b   :  { %v1141_v43 = vpop.xlane.xlu0 %1140 }
 0x52c   :  { %v1171_v44 = vsub.f32 %v6262_v50, %v1141_v43  ;;  %5663 = vpow2.f32 %v1183_v45 }
 0x52e   :  { %v1185_v47 = vmul.f32 1.442695, %v1171_v44 }
 0x52f   :  { %v1144_v46 = vpop.xlane.xlu0 %1143 }
 0x530   :  { %v1172_v11 = vsub.f32 %v6270_v61, %v1144_v46  ;;  %5665 = vpow2.f32 %v1185_v47 }
 0x532   :  { %v1187_v48 = vmul.f32 1.442695, %v1172_v11 }
 0x533   :  { %v1147_v53 = vpop.xlane.xlu1 %1146 }
 0x534   :  { %v1173_v62 = vsub.f32 %v6278_v31, %v1147_v53  ;;  %5667 = vpow2.f32 %v1187_v48 }
 0x535   :  { %v6338_v50 = vpop.eup %5661 }
 0x536   :  { %v1189_v27 = vmul.f32 1.442695, %v1173_v62  ;;  %v1205_v57 = vsel %vm1132_vm12, %v6338_v50, 0.0 }
 0x537   :  { %v1150_v54 = vpop.xlane.xlu0 %1149 }
 0x538   :  { %v1174_v38 = vsub.f32 %v6286_v42, %v1150_v54  ;;  %5669 = vpow2.f32 %v1189_v27 }
 0x539   :  { %v6340_v56 = vpop.eup %5663 }
 0x53a   :  { %v1191_v55 = vmul.f32 1.442695, %v1174_v38  ;;  %v1208_v31 = vsel %vm1132_vm12, %v6340_v56, 0.0 }
 0x53c   :  { %5671 = vpow2.f32 %v1191_v55 }
 0x53d   :  { %v6342_v61 = vpop.eup %5665 }
 0x53e   :  { %v1211_v42 = vsel %vm1132_vm12, %v6342_v61, 0.0 }
 0x541   :  { %v6348_v59 = vpop.eup %5667 }
 0x542   :  { %v1214_v12 = vsel %vm1132_vm12, %v6348_v59, 0.0 }
 0x544   :  { %1206 = vadd.xlane.f32.xlu1 %v1205_v57  ;;  %1209 = vadd.xlane.f32.xlu0 %v1208_v31 }
 0x545   :  { %v6354_v21 = vpop.eup %5669 }
 0x546   :  { %v1217_v23 = vsel %vm1132_vm12, %v6354_v21, 0.0 }
 0x548   :  { %1212 = vadd.xlane.f32.xlu1 %v1211_v42  ;;  %1215 = vadd.xlane.f32.xlu0 %v1214_v12 }
 0x549   :  { %v6356_v22 = vpop.eup %5671 }
 0x54a   :  { %v1220_v35 = vsel %vm1132_vm12, %v6356_v22, 0.0 }
 0x54c   :  { %1221 = vadd.xlane.f32.xlu0 %v1220_v35  ;;  %1218 = vadd.xlane.f32.xlu1 %v1217_v23 }
 0x584   :  { %v1153_v60 = vpop.xlane.xlu1 %1152 }
 0x585   :  { %v1175_v36 = vsub.f32 %v6291_v49, %v1153_v60 }
 0x587   :  { %v1193_v43 = vmul.f32 1.442695, %v1175_v36 }
 0x588   :  { %v1156_v0 = vpop.xlane.xlu0 %1155 }
 0x589   :  { %5673 = vpow2.f32 %v1193_v43  ;;  %v1176_v44 = vsub.f32 %v6296_v58, %v1156_v0 }
 0x58b   :  { %v1195_v45 = vmul.f32 1.442695, %v1176_v44 }
 0x58c   :  { %v1159_v49 = vpop.xlane.xlu1 %1158 }
 0x58d   :  { %5675 = vpow2.f32 %v1195_v45  ;;  %v1177_v58 = vsub.f32 %v6301_v25, %v1159_v49 }
 0x58f   :  { %v1197_v54 = vmul.f32 1.442695, %v1177_v58 }
 0x590   :  { %v1162_v53 = vpop.xlane.xlu0 %1161 }
 0x591   :  { %v1178_v27 = vsub.f32 %v6306_v37, %v1162_v53  ;;  %5677 = vpow2.f32 %v1197_v54 }
 0x593   :  { %v1199_v57 = vmul.f32 1.442695, %v1178_v27 }
 0x594   :  { %v1165_v62 = vpop.xlane.xlu1 %1164 }
 0x595   :  { %v1179_v38 = vsub.f32 %v6311_v52, %v1165_v62  ;;  %5679 = vpow2.f32 %v1199_v57 }
 0x596   :  { %v6364_v46 = vpop.eup %5673 }
 0x597   :  { %v1223_v11 = vsel %vm1132_vm12, %v6364_v46, 0.0  ;;  %v1201_v31 = vmul.f32 1.442695, %v1179_v38 }
 0x598   :  { %1224 = vadd.xlane.f32.xlu1 %v1223_v11  ;;  %v1168_v55 = vpop.xlane.xlu0 %1167 }
 0x599   :  { %v1180_v42 = vsub.f32 %v6316_v10, %v1168_v55  ;;  %5681 = vpow2.f32 %v1201_v31  ;;  %v1428_v31 = vsel %vm1282_vm10, %v6326_v24, 0 }
 0x59a   :  { %v6368_v47 = vpop.eup %5675 }
 0x59b   :  { %v1226_v48 = vsel %vm1132_vm12, %v6368_v47, 0.0 }
 0x59c   :  { %1227 = vadd.xlane.f32.xlu0 %v1226_v48  ;;  %v1519_v12 = vpop.permute.xlu0 %1518 }
 0x59e   :  { %v6382_v25 = vpop.eup %5677 }
 0x59f   :  { %v1229_v52 = vsel %vm1132_vm12, %v6382_v25, 0.0 }
 0x5a2   :  { %v6386_v37 = vpop.eup %5679 }
 0x5a3   :  { %v1232_v36 = vsel %vm1132_vm12, %v6386_v37, 0.0 }
 0x5a6   :  { %v6390_v23 = vpop.eup %5681 }
 0x5a7   :  { %v1235_v43 = vsel %vm1132_vm12, %v6390_v23, 0.0 }
 0x5a9   :  { %1710 = vrot.lane.b32.xlu1 %v6133_v3, %s5857_s21  ;;  %v1203_v3 = vmul.f32 1.442695, %v1180_v42  ;;  %v1380_v42 = vsel %vm1282_vm10, %v6322_v15, 0 }
 0x5ab   :  { %5683 = vpow2.f32 %v1203_v3  ;;  %v1524_v3 = vsel %vm1282_vm10, %v1519_v12, 0 }
 0x5b2   :  { %1662 = vrot.lane.b32.xlu0 %v6125_v16, %s5857_s21  ;;  %v6380_v16 = vpop.permute.xlu1 %1566 }
 0x5b6   :  { %v6384_v35 = vpop.permute.xlu1 %1614 }
 0x5b8   :  { %v6396_v0 = vpop.eup %5683 }
 0x5b9   :  { %v1238_v11 = vsel %vm1132_vm12, %v6396_v0, 0.0 }
 0x5cd   :  { %1230 = vadd.xlane.f32.xlu1 %v1229_v52  ;;  %v1210_v10 = vpop.xlane.xlu0 %1209  ;;  %v1207_v60 = vpop.xlane.xlu1 %1206  ;;  %v1476_v52 = vsel %vm1282_vm10, %v6328_v33, 0 }
 0x5ce   :  { %5685 = vrcp.f32 %v1210_v10 }
 0x5cf   :  { %5687 = vrcp.f32 %v1207_v60 }
 0x5d1   :  { %1233 = vadd.xlane.f32.xlu0 %v1232_v36  ;;  %1236 = vadd.xlane.f32.xlu1 %v1235_v43  ;;  %v1216_v44 = vpop.xlane.xlu0 %1215  ;;  %v1213_v45 = vpop.xlane.xlu1 %1212 }
 0x5d2   :  { %5689 = vrcp.f32 %v1216_v44 }
 0x5d3   :  { %5691 = vrcp.f32 %v1213_v45 }
 0x5d5   :  { %1239 = vadd.xlane.f32.xlu0 %v1238_v11  ;;  %v1222_v48 = vpop.xlane.xlu0 %1221  ;;  %v1219_v49 = vpop.xlane.xlu1 %1218 }
 0x5d6   :  { %5693 = vrcp.f32 %v1222_v48 }
 0x5d7   :  { %5695 = vrcp.f32 %v1219_v49 }
 0x5db   :  { %v5686_v58 = vpop.eup %5685 }
 0x5dc   :  { %v5688_v53 = vpop.eup %5687  ;;  %v1254_v62 = vmul.f32 %v5686_v58, %v6340_v56 }
 0x5dd   :  { %v1253_v27 = vmul.f32 %v5688_v53, %v6338_v50 }
 0x5de   :  { %v1266_v54 = vpack.c.bf16 %v1254_v62, %v1254_v62 }
 0x5df   :  { %v5690_v38 = vpop.eup %5689  ;;  %v1265_v55 = vpack.c.bf16 %v1253_v27, %v1253_v27 }
 0x5e0   :  { %v5692_v57 = vpop.eup %5691  ;;  %5238 = vmatmul.mubr.msk.bf16.vlgmr.msra.gmra.mxu0 %vm1132_vm12, %v1266_v54  ;;  %v1256_v50 = vmul.f32 %v5690_v38, %v6348_v59 }
 0x5e1   :  { %5232 = vmatmul.mubr.msk.bf16.vlgmr.msra.gmra.mxu1 %vm1132_vm12, %v1265_v55  ;;  %5248 = vmatpush3.bf16.msra.mxu0 %v1428_v31  ;;  %v1255_v24 = vmul.f32 %v5692_v57, %v6342_v61 }
 0x5e2   :  { %5242 = vmatpush3.bf16.msra.mxu1 %v1380_v42  ;;  %1806 = vrot.lane.b32.xlu1 %v6150_v26, %s5857_s21  ;;  %v1268_v15 = vpack.c.bf16 %v1256_v50, %v1256_v50 }
 0x5e3   :  { %5243 = vmatprep.mubr.msk.bf16.mxu1 %vm5854_vm0, %v5853_v1  ;;  %5249 = vmatprep.mubr.msk.bf16.mxu0 %vm5854_vm0, %v5853_v1  ;;  %v5694_v26 = vpop.eup %5693  ;;  %v1267_v56 = vpack.c.bf16 %v1255_v24, %v1255_v24 }
 0x5e4   :  { %5253 = vmatprep.subr.bf16.mxu1 %v5853_v1  ;;  %5259 = vmatprep.subr.bf16.mxu0 %v5853_v1  ;;  %v5696_v59 = vpop.eup %5695  ;;  %v1258_v61 = vmul.f32 %v5694_v26, %v6356_v22  ;;  %v1572_v22 = vsel %vm1282_vm10, %v6380_v16, 0 }
 0x5e6   :  { %1975 = vrot.lane.b32.xlu1 %v6020_v40, %s5859_s22  ;;  %v1257_v40 = vmul.f32 %v5696_v59, %v6354_v21  ;;  %v1270_v33 = vpack.c.bf16 %v1258_v61, %v1258_v61 }
 0x5e8   :  { %5250 = vmatmul.mubr.msk.bf16.vlgmr.msra.gmra.mxu0 %vm1132_vm12, %v1268_v15  ;;  %v1269_v12 = vpack.c.bf16 %v1257_v40, %v1257_v40 }
 0x5e9   :  { %5244 = vmatmul.mubr.msk.bf16.vlgmr.msra.gmra.mxu1 %vm1132_vm12, %v1267_v56  ;;  %5260 = vmatpush3.bf16.msra.mxu0 %v1524_v3 }
 0x5ea   :  { %5254 = vmatpush3.bf16.msra.mxu1 %v1476_v52  ;;  %5255 = vmatprep.mubr.msk.bf16.mxu1 %vm5854_vm0, %v5853_v1 }
 0x5eb   :  { %1758 = vrot.lane.b32.xlu0 %v6141_v7, %s5857_s21  ;;  %5261 = vmatprep.mubr.msk.bf16.mxu0 %vm5854_vm0, %v5853_v1  ;;  %v1620_v7 = vsel %vm1282_vm10, %v6384_v35, 0 }
 0x5ec   :  { %5265 = vmatprep.subr.bf16.mxu1 %v5853_v1  ;;  %5271 = vmatprep.subr.bf16.mxu0 %v5853_v1 }
 0x5ef   :  { %1881 = vrot.lane.b32.xlu0 %v6026_v41, %s5859_s22 }
 0x5f0   :  { %5262 = vmatmul.mubr.msk.bf16.vlgmr.msra.gmra.mxu0 %vm1132_vm12, %v1270_v33 }
 0x5f1   :  { %5256 = vmatmul.mubr.msk.bf16.vlgmr.msra.gmra.mxu1 %vm1132_vm12, %v1269_v12  ;;  %5272 = vmatpush3.bf16.msra.mxu0 %v1620_v7 }
 0x5f2   :  { %5266 = vmatpush3.bf16.msra.mxu1 %v1572_v22  ;;  %5267 = vmatprep.mubr.msk.bf16.mxu1 %vm5854_vm0, %v5853_v1 }
 0x5f3   :  { %5277 = vmatprep.subr.bf16.mxu1 %v5853_v1  ;;  %5273 = vmatprep.mubr.msk.bf16.mxu0 %vm5854_vm0, %v5853_v1 }
 0x5f4   :  { %5283 = vmatprep.subr.bf16.mxu0 %v5853_v1 }
 0x621   :  { %v1225_v41 = vpop.xlane.xlu1 %1224 }
 0x622   :  { %5697 = vrcp.f32 %v1225_v41 }
 0x625   :  { %v1228_v21 = vpop.xlane.xlu0 %1227  ;;  %v1711_v45 = vpop.permute.xlu1 %1710 }
 0x626   :  { %5699 = vrcp.f32 %v1228_v21  ;;  %v1716_v48 = vsel %vm1282_vm10, %v1711_v45, 0 }
 0x629   :  { %v1663_v10 = vpop.permute.xlu0 %1662 }
 0x62a   :  { %v1668_v43 = vsel %vm1282_vm10, %v1663_v10, 0 }
 0x62f   :  { %v5698_v35 = vpop.eup %5697 }
 0x630   :  { %v1259_v16 = vmul.f32 %v5698_v35, %v6364_v46 }
 0x632   :  { %v1271_v60 = vpack.c.bf16 %v1259_v16, %v1259_v16 }
 0x633   :  { %v5700_v36 = vpop.eup %5699 }
 0x634   :  { %5268 = vmatmul.mubr.msk.bf16.vlgmr.msra.gmra.mxu1 %vm1132_vm12, %v1271_v60  ;;  %v1260_v44 = vmul.f32 %v5700_v36, %v6368_v47 }
 0x635   :  { %5278 = vmatpush3.bf16.msra.mxu1 %v1668_v43  ;;  %5279 = vmatprep.mubr.msk.bf16.mxu1 %vm5854_vm0, %v5853_v1 }
 0x636   :  { %v1272_v11 = vpack.c.bf16 %v1260_v44, %v1260_v44  ;;  %5289 = vmatprep.subr.bf16.mxu1 %v5853_v1 }
 0x638   :  { %5274 = vmatmul.mubr.msk.bf16.vlgmr.msra.gmra.mxu0 %vm1132_vm12, %v1272_v11 }
 0x639   :  { %5284 = vmatpush3.bf16.msra.mxu0 %v1716_v48  ;;  %5285 = vmatprep.mubr.msk.bf16.mxu0 %vm5854_vm0, %v5853_v1 }
 0x63a   :  { %5295 = vmatprep.subr.bf16.mxu0 %v5853_v1 }
 0x656   :  { %v1231_v46 = vpop.xlane.xlu1 %1230 }
 0x657   :  { %5701 = vrcp.f32 %v1231_v46 }
 0x65a   :  { %v1234_v47 = vpop.xlane.xlu0 %1233  ;;  %v1237_v49 = vpop.xlane.xlu1 %1236 }
 0x65b   :  { %5703 = vrcp.f32 %v1234_v47 }
 0x65c   :  { %5705 = vrcp.f32 %v1237_v49 }
 0x65e   :  { %v1240_v58 = vpop.xlane.xlu0 %1239  ;;  %v1807_v42 = vpop.permute.xlu1 %1806 }
 0x65f   :  { %5707 = vrcp.f32 %v1240_v58  ;;  %v1812_v15 = vsel %vm1282_vm10, %v1807_v42, 0 }
 0x662   :  { %v1759_v27 = vpop.permute.xlu0 %1758  ;;  %v1976_v59 = vpop.permute.xlu1 %1975 }
 0x663   :  { %v1764_v57 = vsel %vm1282_vm10, %v1759_v27, 0 }
 0x664   :  { %v5702_v53 = vpop.eup %5701 }
 0x665   :  { %v1261_v62 = vmul.f32 %v5702_v53, %v6382_v25 }
 0x666   :  { %v1882_v56 = vpop.permute.xlu0 %1881 }
 0x667   :  { %v1273_v54 = vpack.c.bf16 %v1261_v62, %v1261_v62 }
 0x668   :  { %v5704_v38 = vpop.eup %5703 }
 0x669   :  { %v5706_v55 = vpop.eup %5705  ;;  %5280 = vmatmul.mubr.msk.bf16.vlgmr.msra.gmra.mxu1 %vm1132_vm12, %v1273_v54  ;;  %v1262_v31 = vmul.f32 %v5704_v38, %v6386_v37 }
 0x66a   :  { %5290 = vmatpush3.bf16.msra.mxu1 %v1764_v57  ;;  %5291 = vmatprep.mubr.msk.bf16.mxu1 %vm5854_vm0, %v5853_v1  ;;  %v1263_v24 = vmul.f32 %v5706_v55, %v6390_v23 }
 0x66b   :  { %v1274_v50 = vpack.c.bf16 %v1262_v31, %v1262_v31  ;;  %5301 = vmatprep.subr.bf16.mxu1 %v5853_v1 }
 0x66c   :  { %v5708_v25 = vpop.eup %5707  ;;  %v1275_v37 = vpack.c.bf16 %v1263_v24, %v1263_v24 }
 0x66d   :  { %5286 = vmatmul.mubr.msk.bf16.vlgmr.msra.gmra.mxu0 %vm1132_vm12, %v1274_v50  ;;  %v1264_v26 = vmul.f32 %v5708_v25, %v6396_v0 }
 0x66e   :  { %5296 = vmatpush3.bf16.msra.mxu0 %v1812_v15  ;;  %5297 = vmatprep.mubr.msk.bf16.mxu0 %vm5854_vm0, %v5853_v1 }
 0x66f   :  { %5315 = vmatprep.subr.bf16.mxu0 %v5853_v1  ;;  %v1276_v23 = vpack.c.bf16 %v1264_v26, %v1264_v26 }
 0x671   :  { %5292 = vmatmul.mubr.msk.bf16.vlgmr.msra.gmra.mxu1 %vm1132_vm12, %v1275_v37 }
 0x672   :  { %5302 = vmatpush3.bf16.msra.mxu1 %v1882_v56  ;;  %5303 = vmatprep.mubr.msk.bf16.mxu1 %vm5854_vm0, %v5853_v1 }
 0x673   :  { %5329 = vmatprep.subr.bf16.mxu1 %v5853_v1 }
 0x675   :  { %5298 = vmatmul.mubr.msk.bf16.vlgmr.msra.gmra.mxu0 %vm1132_vm12, %v1276_v23 }
 0x676   :  { %5316 = vmatpush3.bf16.msra.mxu0 %v1976_v59  ;;  %5317 = vmatprep.mubr.msk.bf16.mxu0 %vm5854_vm0, %v5853_v1 }
 0x677   :  { %5345 = vmatprep.subr.bf16.mxu0 %v5853_v1 }
 0x6a0   :  { %v1368_v0 = vpop.f32.mrf.mxu0 }
 0x6a1   :  { %v1320_v3 = vpop.f32.mrf.mxu1 }
 0x6a2   :  { %v4945_v52 = vpack.c.bf16 %v1368_v0, %v1320_v3  ;;  %v5239_v61 = vpop.f32.mrf.mxu0 }
 0x6a3   :  { %v5233_v40 = vpop.f32.mrf.mxu1 }
 0x6a4   :  { %5304 = vmatmul.mubr.msk.bf16.vlgmr.msra.gmra.mxu1 %vm491_vm9, %v4945_v52  ;;  %v1371_v33 = vpop.f32.mrf.mxu0 }
 0x6a5   :  { %v1323_v12 = vpop.f32.mrf.mxu1  ;;  %5307 = vmatprep.mubr.msk.bf16.mxu1 %vm5854_vm0, %v5853_v1 }
 0x6a6   :  { %v5240_v7 = vpop.f32.mrf.mxu0 }
 0x6a7   :  { %v5234_v22 = vpop.f32.mrf.mxu1 }
 0x6a8   :  { %v1464_v41 = vpop.f32.mrf.mxu0 }
 0x6a9   :  { %v1416_v21 = vpop.f32.mrf.mxu1 }
 0x6aa   :  { %v4946_v35 = vpack.c.bf16 %v1464_v41, %v1416_v21  ;;  %v5251_v16 = vpop.f32.mrf.mxu0 }
 0x6ab   :  { %v5245_v10 = vpop.f32.mrf.mxu1 }
 0x6ac   :  { %5308 = vmatmul.mubr.msk.bf16.gmra.mxu1 %vm491_vm9, %v4946_v35  ;;  %v1467_v60 = vpop.f32.mrf.mxu0  ;;  %v6504_v35 = vld [vmem:[%s7203_s5] sm:$0xff] }
 0x6ad   :  { %v1419_v36 = vpop.f32.mrf.mxu1  ;;  %5311 = vmatprep.mubr.msk.bf16.mxu1 %vm5854_vm0, %v5853_v1  ;;  %v1953_v16 = vrot.slane %v6504_v35, %v5931_v8 }
 0x6ae   :  { %v5252_v43 = vpop.f32.mrf.mxu0 }
 0x6af   :  { %v5246_v44 = vpop.f32.mrf.mxu1 }
 0x6b0   :  { %v1560_v45 = vpop.f32.mrf.mxu0 }
 0x6b1   :  { %v1512_v11 = vpop.f32.mrf.mxu1 }
 0x6b2   :  { %v4947_v48 = vpack.c.bf16 %v1560_v45, %v1512_v11  ;;  %v5263_v46 = vpop.f32.mrf.mxu0 }
 0x6b3   :  { %v5257_v47 = vpop.f32.mrf.mxu1 }
 0x6b4   :  { %5312 = vmatmul.mubr.msk.bf16.gmra.mxu1 %vm491_vm9, %v4947_v48  ;;  %v1563_v49 = vpop.f32.mrf.mxu0 }
 0x6b5   :  { %v1515_v58 = vpop.f32.mrf.mxu1  ;;  %5333 = vmatprep.mubr.msk.bf16.mxu1 %vm5854_vm0, %v5853_v1 }
 0x6b6   :  { %v5264_v53 = vpop.f32.mrf.mxu0 }
 0x6b7   :  { %v5258_v62 = vpop.f32.mrf.mxu1 }
 0x6f4   :  { %v1608_v27 = vpop.f32.mrf.mxu1 }
 0x6f6   :  { %v5269_v54 = vpop.f32.mrf.mxu1 }
 0x6f8   :  { %v1611_v38 = vpop.f32.mrf.mxu1  ;;  %v1656_v55 = vpop.f32.mrf.mxu0 }
 0x6f9   :  { %v4948_v57 = vpack.c.bf16 %v1656_v55, %v1608_v27 }
 0x6fa   :  { %v5270_v31 = vpop.f32.mrf.mxu1  ;;  %v5275_v42 = vpop.f32.mrf.mxu0 }
 0x6fb   :  { %5318 = vmatmul.mubr.msk.bf16.vlgmr.msra.gmra.mxu0 %vm491_vm9, %v4948_v57 }
 0x6fc   :  { %v1659_v50 = vpop.f32.mrf.mxu0  ;;  %5321 = vmatprep.mubr.msk.bf16.mxu0 %vm5854_vm0, %v5853_v1 }
 0x6fe   :  { %v5276_v24 = vpop.f32.mrf.mxu0 }
 0x729   :  { %v1704_v25 = vpop.f32.mrf.mxu1 }
 0x72b   :  { %v5281_v15 = vpop.f32.mrf.mxu1 }
 0x72d   :  { %v1707_v37 = vpop.f32.mrf.mxu1  ;;  %v1752_v26 = vpop.f32.mrf.mxu0 }
 0x72e   :  { %v4949_v56 = vpack.c.bf16 %v1752_v26, %v1704_v25 }
 0x72f   :  { %v5282_v23 = vpop.f32.mrf.mxu1  ;;  %v5287_v59 = vpop.f32.mrf.mxu0 }
 0x730   :  { %5322 = vmatmul.mubr.msk.bf16.gmra.mxu0 %vm491_vm9, %v4949_v56 }
 0x731   :  { %v1755_v0 = vpop.f32.mrf.mxu0  ;;  %v1800_v3 = vpop.f32.mrf.mxu1  ;;  %5325 = vmatprep.mubr.msk.bf16.mxu0 %vm5854_vm0, %v5853_v1 }
 0x733   :  { %v5288_v52 = vpop.f32.mrf.mxu0  ;;  %v5293_v61 = vpop.f32.mrf.mxu1 }
 0x735   :  { %v1803_v40 = vpop.f32.mrf.mxu1  ;;  %v1848_v33 = vpop.f32.mrf.mxu0 }
 0x736   :  { %v4950_v12 = vpack.c.bf16 %v1848_v33, %v1800_v3 }
 0x737   :  { %v5294_v7 = vpop.f32.mrf.mxu1  ;;  %v5299_v22 = vpop.f32.mrf.mxu0 }
 0x738   :  { %5326 = vmatmul.mubr.msk.bf16.gmra.mxu0 %vm491_vm9, %v4950_v12 }
 0x739   :  { %v1851_v41 = vpop.f32.mrf.mxu0  ;;  %5353 = vmatprep.mubr.msk.bf16.mxu0 %vm5854_vm0, %v5853_v1 }
 0x73b   :  { %v5300_v21 = vpop.f32.mrf.mxu0 }
 0x764   :  { %v1927_v10 = vpop.f32.mrf.mxu1 }
 0x765   :  { %v1954_v60 = vadd.f32 %v1953_v16, %v1927_v10 }
 0x766   :  { %v5305_v36 = vpop.f32.mrf.mxu1 }
 0x768   :  { %v1930_v43 = vpop.f32.mrf.mxu1 }
 0x769   :  { %v1955_v44 = vadd.f32 %v1953_v16, %v1930_v43 }
 0x76a   :  { %v5306_v45 = vpop.f32.mrf.mxu1 }
 0x76c   :  { %v1935_v11 = vpop.f32.mrf.mxu1 }
 0x76d   :  { %v1956_v48 = vadd.f32 %v1953_v16, %v1935_v11 }
 0x76e   :  { %v5309_v46 = vpop.f32.mrf.mxu1 }
 0x770   :  { %v1938_v47 = vpop.f32.mrf.mxu1 }
 0x771   :  { %v1957_v49 = vadd.f32 %v1953_v16, %v1938_v47 }
 0x772   :  { %v5310_v58 = vpop.f32.mrf.mxu1 }
 0x773   :  { %v5632_v58 = vld [vmem:[%s7200_s2 + $0x4] ss:$8 sps:$4 sm:$0xff]  }
 0x774   :  { %v1943_v53 = vpop.f32.mrf.mxu1 }
 0x775   :  { %v1958_v62 = vadd.f32 %v1953_v16, %v1943_v53 }
 0x776   :  { %v5313_v27 = vpop.f32.mrf.mxu1 }
 0x778   :  { %v1946_v54 = vpop.f32.mrf.mxu1 }
 0x779   :  { %v1959_v38 = vadd.f32 %v1953_v16, %v1946_v54 }
 0x77a   :  { %v5314_v55 = vpop.f32.mrf.mxu1 }
 0x7bb   :  { %v2021_v57 = vpop.f32.mrf.mxu0 }
 0x7bc   :  { %v2044_v31 = vadd.f32 %v2021_v57, %v1954_v60 }
 0x7bd   :  { %v5319_v42 = vpop.f32.mrf.mxu0 }
 0x7be   :  { %v2050_v50 = vadd.f32 %v2044_v31, %v6037_v17 }
 0x7bf   :  { %v2024_v24 = vpop.f32.mrf.mxu0 }
 0x7c0   :  { %v2045_v25 = vadd.f32 %v2024_v24, %v1955_v44  ;;  %v2056_v15 = vsel %vm220_vm8, %v2050_v50, 0.0 }
 0x7c1   :  { %2057 = vadd.xlane.f32.xlu0 %v2056_v15  ;;  %v5320_v37 = vpop.f32.mrf.mxu0 }
 0x7c2   :  { %v2051_v26 = vadd.f32 %v2045_v25, %v6039_v19 }
 0x7c4   :  { %v2059_v56 = vsel %vm220_vm8, %v2051_v26, 0.0 }
 0x7c5   :  { %2060 = vadd.xlane.f32.xlu1 %v2059_v56 }
 0x7f0   :  { %v2029_v23 = vpop.f32.mrf.mxu0 }
 0x7f1   :  { %v2046_v59 = vadd.f32 %v2029_v23, %v1956_v48 }
 0x7f2   :  { %v5323_v0 = vpop.f32.mrf.mxu0 }
 0x7f3   :  { %v2052_v3 = vadd.f32 %v2046_v59, %v6046_v28 }
 0x7f4   :  { %v2032_v52 = vpop.f32.mrf.mxu0 }
 0x7f5   :  { %v2047_v61 = vadd.f32 %v2032_v52, %v1957_v49  ;;  %v2062_v17 = vsel %vm220_vm8, %v2052_v3, 0.0 }
 0x7f6   :  { %2063 = vadd.xlane.f32.xlu0 %v2062_v17  ;;  %v5324_v40 = vpop.f32.mrf.mxu0 }
 0x7f7   :  { %v2053_v33 = vadd.f32 %v2047_v61, %v6048_v30 }
 0x7f8   :  { %v2037_v12 = vpop.f32.mrf.mxu0 }
 0x7f9   :  { %v2048_v7 = vadd.f32 %v2037_v12, %v1958_v62  ;;  %v2065_v19 = vsel %vm220_vm8, %v2053_v33, 0.0 }
 0x7fa   :  { %2066 = vadd.xlane.f32.xlu0 %v2065_v19  ;;  %v5327_v22 = vpop.f32.mrf.mxu0 }
 0x7fb   :  { %v2054_v41 = vadd.f32 %v2048_v7, %v6058_v34  ;;  %v2137_v7 = vrot.slane %v6504_v35, %v5923_v6  ;;  %v2147_v22 = vrot.slane %v6504_v35, %v5934_v9 }
 0x7fc   :  { %v2040_v21 = vpop.f32.mrf.mxu0 }
 0x7fd   :  { %v2049_v16 = vadd.f32 %v2040_v21, %v1959_v38  ;;  %v2068_v28 = vsel %vm220_vm8, %v2054_v41, 0.0 }
 0x7fe   :  { %2069 = vadd.xlane.f32.xlu1 %v2068_v28  ;;  %v5328_v10 = vpop.f32.mrf.mxu0 }
 0x7ff   :  { %v2055_v60 = vadd.f32 %v2049_v16, %v6056_v29  ;;  %v5631_v29 = vld [vmem:[%s7200_s2 + $0x14] ss:$8 sps:$4 sm:$0xff]  }
 0x800   :  { %5330 = vmatpush3.bf16.msra.mxu1 %v5631_v29 }
 0x801   :  { %v2071_v36 = vsel %vm220_vm8, %v2055_v60, 0.0  ;;  %5331 = vmatprep.subr.bf16.mxu1 %v5853_v1 }
 0x802   :  { %2072 = vadd.xlane.f32.xlu0 %v2071_v36 }
 0x804   :  { %5332 = vmatpush3.bf16.msra.mxu1 %v5632_v58 }
 0x805   :  { %5365 = vmatprep.subr.bf16.mxu1 %v5853_v1 }
 0x84a   :  { %v2058_v30 = vpop.xlane.xlu0 %2057 }
 0x84b   :  { %v2074_v43 = vmul.f32 0.03125, %v2058_v30 }
 0x84d   :  { %v2080_v44 = vsub.f32 %v2050_v50, %v2074_v43 }
 0x84e   :  { %v2061_v45 = vpop.xlane.xlu1 %2060 }
 0x84f   :  { %v2075_v11 = vmul.f32 0.03125, %v2061_v45  ;;  %v2086_v48 = vmul.f32 %v2080_v44, %v2080_v44 }
 0x851   :  { %v2081_v46 = vsub.f32 %v2051_v26, %v2075_v11  ;;  %v2092_v34 = vsel %vm220_vm8, %v2086_v48, 0.0 }
 0x852   :  { %2093 = vadd.xlane.f32.xlu1 %v2092_v34 }
 0x853   :  { %v2087_v47 = vmul.f32 %v2081_v46, %v2081_v46 }
 0x855   :  { %v2095_v49 = vsel %vm220_vm8, %v2087_v47, 0.0 }
 0x856   :  { %2096 = vadd.xlane.f32.xlu0 %v2095_v49 }
 0x87f   :  { %v2064_v53 = vpop.xlane.xlu0 %2063 }
 0x880   :  { %v2076_v62 = vmul.f32 0.03125, %v2064_v53 }
 0x882   :  { %v2082_v27 = vsub.f32 %v2052_v3, %v2076_v62 }
 0x883   :  { %v2067_v54 = vpop.xlane.xlu0 %2066 }
 0x884   :  { %v2077_v38 = vmul.f32 0.03125, %v2067_v54  ;;  %v2088_v55 = vmul.f32 %v2082_v27, %v2082_v27 }
 0x886   :  { %v2083_v57 = vsub.f32 %v2053_v33, %v2077_v38  ;;  %v2098_v31 = vsel %vm220_vm8, %v2088_v55, 0.0 }
 0x887   :  { %2099 = vadd.xlane.f32.xlu1 %v2098_v31  ;;  %v2070_v42 = vpop.xlane.xlu1 %2069 }
 0x888   :  { %v2078_v50 = vmul.f32 0.03125, %v2070_v42  ;;  %v2089_v24 = vmul.f32 %v2083_v57, %v2083_v57 }
 0x88a   :  { %v2084_v25 = vsub.f32 %v2054_v41, %v2078_v50  ;;  %v2101_v15 = vsel %vm220_vm8, %v2089_v24, 0.0 }
 0x88b   :  { %2102 = vadd.xlane.f32.xlu0 %v2101_v15  ;;  %v2073_v37 = vpop.xlane.xlu0 %2072 }
 0x88c   :  { %v2079_v26 = vmul.f32 0.03125, %v2073_v37  ;;  %v2090_v56 = vmul.f32 %v2084_v25, %v2084_v25 }
 0x88e   :  { %v2085_v23 = vsub.f32 %v2055_v60, %v2079_v26  ;;  %v2104_v59 = vsel %vm220_vm8, %v2090_v56, 0.0 }
 0x88f   :  { %2105 = vadd.xlane.f32.xlu1 %v2104_v59 }
 0x890   :  { %v2091_v0 = vmul.f32 %v2085_v23, %v2085_v23 }
 0x892   :  { %v2107_v3 = vsel %vm220_vm8, %v2091_v0, 0.0 }
 0x893   :  { %2108 = vadd.xlane.f32.xlu0 %v2107_v3 }
 0x8db   :  { %v2094_v52 = vpop.xlane.xlu1 %2093 }
 0x8dc   :  { %v2110_v61 = vmul.f32 0.03125, %v2094_v52 }
 0x8de   :  { %v2116_v17 = vadd.f32 1e-12, %v2110_v61  ;;  %v5635_v61 = vld [vmem:[%s7201_s3 + $0x8] sm:$0xff]  }
 0x8df   :  { %v2097_v40 = vpop.xlane.xlu0 %2096 }
 0x8e0   :  { %5709 = vrsqrt.f32 %v2116_v17  ;;  %v2111_v33 = vmul.f32 0.03125, %v2097_v40  ;;  %v5636_v17 = vld [vmem:[%s7201_s3] sm:$0xff]   ;;  %v2159_v40 = vsub.s32 6, %v5905_v2 }
 0x8e2   :  { %v2117_v12 = vadd.f32 1e-12, %v2111_v33  ;;  %v2160_v33 = vrot.slane %v6504_v35, %v2159_v40 }
 0x8e4   :  { %5711 = vrsqrt.f32 %v2117_v12 }
 0x8ed   :  { %v5710_v19 = vpop.eup %5709 }
 0x8ee   :  { %v2128_v41 = vmul.f32 %v5710_v19, %v2080_v44 }
 0x8f0   :  { %v2138_v21 = vmul.f32 %v2137_v7, %v2128_v41 }
 0x8f1   :  { %v5712_v16 = vpop.eup %5711 }
 0x8f2   :  { %v2129_v28 = vmul.f32 %v5712_v16, %v2081_v46  ;;  %v6538_v10 = vadd.f32 %v2147_v22, %v2138_v21 }
 0x8f4   :  { %v2139_v60 = vmul.f32 %v2137_v7, %v2129_v28 }
 0x8f6   :  { %v6540_v36 = vadd.f32 %v2147_v22, %v2139_v60 }
 0x8f8   :  { %v2154_v30 = vpack.c.bf16 %v6540_v36, %v6538_v10 }
 0x8fa   :  { %5334 = vmatmul.mubr.msk.bf16.vlgmr.msra.gmra.mxu1 %vm220_vm8, %v2154_v30 }
 0x8fb   :  { %5337 = vmatprep.mubr.msk.bf16.mxu1 %vm5854_vm0, %v5853_v1 }
 0x910   :  { %v2100_v43 = vpop.xlane.xlu1 %2099 }
 0x911   :  { %v2112_v45 = vmul.f32 0.03125, %v2100_v43 }
 0x913   :  { %v2118_v11 = vadd.f32 1e-12, %v2112_v45 }
 0x914   :  { %v2103_v44 = vpop.xlane.xlu0 %2102 }
 0x915   :  { %5713 = vrsqrt.f32 %v2118_v11  ;;  %v2113_v48 = vmul.f32 0.03125, %v2103_v44 }
 0x917   :  { %v2119_v46 = vadd.f32 1e-12, %v2113_v48 }
 0x918   :  { %v2106_v34 = vpop.xlane.xlu1 %2105 }
 0x919   :  { %5715 = vrsqrt.f32 %v2119_v46  ;;  %v2114_v47 = vmul.f32 0.03125, %v2106_v34 }
 0x91b   :  { %v2120_v49 = vadd.f32 1e-12, %v2114_v47 }
 0x91c   :  { %v2109_v29 = vpop.xlane.xlu0 %2108 }
 0x91d   :  { %5717 = vrsqrt.f32 %v2120_v49  ;;  %v2115_v58 = vmul.f32 0.03125, %v2109_v29 }
 0x91f   :  { %v2121_v53 = vadd.f32 1e-12, %v2115_v58 }
 0x921   :  { %5719 = vrsqrt.f32 %v2121_v53 }
 0x922   :  { %v5714_v62 = vpop.eup %5713 }
 0x923   :  { %v2130_v54 = vmul.f32 %v5714_v62, %v2082_v27 }
 0x925   :  { %v2140_v38 = vmul.f32 %v2137_v7, %v2130_v54 }
 0x926   :  { %v5716_v55 = vpop.eup %5715 }
 0x927   :  { %v2131_v31 = vmul.f32 %v5716_v55, %v2083_v57  ;;  %v6547_v42 = vadd.f32 %v2147_v22, %v2140_v38 }
 0x929   :  { %v2141_v50 = vmul.f32 %v2137_v7, %v2131_v31 }
 0x92a   :  { %v5718_v24 = vpop.eup %5717 }
 0x92b   :  { %v6549_v15 = vadd.f32 %v2147_v22, %v2141_v50  ;;  %v2132_v37 = vmul.f32 %v5718_v24, %v2084_v25  ;;  %v5633_v25 = vld [vmem:[%s7201_s3 + $0x18] sm:$0xff]  }
 0x92c   :  { %5346 = vmatpush3.bf16.msra.mxu0 %v5633_v25 }
 0x92d   :  { %v2155_v26 = vpack.c.bf16 %v6549_v15, %v6547_v42  ;;  %v2142_v56 = vmul.f32 %v2137_v7, %v2132_v37  ;;  %5347 = vmatprep.subr.bf16.mxu0 %v5853_v1 }
 0x92e   :  { %v5720_v59 = vpop.eup %5719 }
 0x92f   :  { %5338 = vmatmul.mubr.msk.bf16.gmra.mxu1 %vm220_vm8, %v2155_v26  ;;  %v2133_v0 = vmul.f32 %v5720_v59, %v2085_v23  ;;  %v6554_v3 = vadd.f32 %v2147_v22, %v2142_v56  ;;  %v5634_v23 = vld [vmem:[%s7201_s3 + $0x10] sm:$0xff]  }
 0x930   :  { %5341 = vmatprep.mubr.msk.bf16.mxu1 %vm5854_vm0, %v5853_v1  ;;  %5348 = vmatpush3.bf16.msra.mxu0 %v5634_v23 }
 0x931   :  { %v2143_v27 = vmul.f32 %v2137_v7, %v2133_v0  ;;  %5349 = vmatprep.subr.bf16.mxu0 %v5853_v1 }
 0x933   :  { %v6558_v57 = vadd.f32 %v2147_v22, %v2143_v27 }
 0x934   :  { %5350 = vmatpush3.bf16.msra.mxu0 %v5635_v61 }
 0x935   :  { %v2156_v52 = vpack.c.bf16 %v6558_v57, %v6554_v3  ;;  %5351 = vmatprep.subr.bf16.mxu0 %v5853_v1 }
 0x937   :  { %5342 = vmatmul.mubr.msk.bf16.gmra.mxu1 %vm220_vm8, %v2156_v52 }
 0x938   :  { %5369 = vmatprep.mubr.msk.bf16.mxu1 %vm5854_vm0, %v5853_v1  ;;  %5352 = vmatpush3.bf16.msra.mxu0 %v5636_v17 }
 0x939   :  { %5381 = vmatprep.subr.bf16.mxu0 %v5853_v1 }
 0x9ba   :  { %v2212_v12 = vpop.f32.mrf.mxu1 }
 0x9bb   :  { %v2213_v7 = vadd.f32 %v2212_v12, %v2160_v33 }
 0x9bc   :  { %v5335_v19 = vpop.f32.mrf.mxu1 }
 0x9bd   :  { %v2235_v22 = vmul.f32 %v2213_v7, %v2213_v7 }
 0x9be   :  { %v2215_v41 = vpop.f32.mrf.mxu1 }
 0x9bf   :  { %v2241_v21 = vmul.f32 %v2235_v22, %v2213_v7  ;;  %v2216_v16 = vadd.f32 %v2215_v41, %v2160_v33 }
 0x9c0   :  { %v5336_v28 = vpop.f32.mrf.mxu1 }
 0x9c1   :  { %v2247_v60 = vmul.f32 0.044715, %v2241_v21  ;;  %v2236_v30 = vmul.f32 %v2216_v16, %v2216_v16 }
 0x9c3   :  { %v2253_v43 = vadd.f32 %v2247_v60, %v2213_v7  ;;  %v2242_v45 = vmul.f32 %v2236_v30, %v2216_v16 }
 0x9c5   :  { %v2259_v11 = vmul.f32 0.7978846, %v2253_v43  ;;  %v2248_v44 = vmul.f32 0.044715, %v2242_v45 }
 0x9c7   :  { %5721 = vtanh.f32 %v2259_v11  ;;  %v2254_v48 = vadd.f32 %v2248_v44, %v2216_v16 }
 0x9c9   :  { %v2260_v46 = vmul.f32 0.7978846, %v2254_v48 }
 0x9cb   :  { %5723 = vtanh.f32 %v2260_v46 }
 0x9d4   :  { %v5722_v34 = vpop.eup %5721 }
 0x9d5   :  { %v2271_v47 = vadd.f32 1.0, %v5722_v34 }
 0x9d7   :  { %v2277_v29 = vmul.f32 0.5, %v2271_v47 }
 0x9d8   :  { %v5724_v49 = vpop.eup %5723 }
 0x9d9   :  { %v2272_v58 = vadd.f32 1.0, %v5724_v49  ;;  %v2283_v62 = vmul.f32 %v2277_v29, %v2213_v7 }
 0x9db   :  { %v2278_v53 = vmul.f32 0.5, %v2272_v58 }
 0x9dd   :  { %v2284_v54 = vmul.f32 %v2278_v53, %v2216_v16 }
 0x9df   :  { %v2289_v38 = vpack.c.bf16 %v2284_v54, %v2283_v62 }
 0x9e1   :  { %5354 = vmatmul.mubr.msk.bf16.vlgmr.msra.gmra.mxu0 %vm147_vm3, %v2289_v38 }
 0x9e2   :  { %5357 = vmatprep.mubr.msk.bf16.mxu0 %vm5854_vm0, %v5853_v1 }
 0x9ef   :  { %v2220_v55 = vpop.f32.mrf.mxu1 }
 0x9f0   :  { %v2221_v31 = vadd.f32 %v2220_v55, %v2160_v33 }
 0x9f1   :  { %v5339_v50 = vpop.f32.mrf.mxu1 }
 0x9f2   :  { %v2237_v24 = vmul.f32 %v2221_v31, %v2221_v31 }
 0x9f3   :  { %v2223_v37 = vpop.f32.mrf.mxu1 }
 0x9f4   :  { %v2243_v26 = vmul.f32 %v2237_v24, %v2221_v31  ;;  %v2224_v56 = vadd.f32 %v2223_v37, %v2160_v33 }
 0x9f5   :  { %v5340_v59 = vpop.f32.mrf.mxu1 }
 0x9f6   :  { %v2249_v0 = vmul.f32 0.044715, %v2243_v26  ;;  %v2238_v27 = vmul.f32 %v2224_v56, %v2224_v56 }
 0x9f7   :  { %v2228_v52 = vpop.f32.mrf.mxu1 }
 0x9f8   :  { %v2255_v25 = vadd.f32 %v2249_v0, %v2221_v31  ;;  %v2244_v23 = vmul.f32 %v2238_v27, %v2224_v56  ;;  %v2229_v61 = vadd.f32 %v2228_v52, %v2160_v33 }
 0x9f9   :  { %v5343_v17 = vpop.f32.mrf.mxu1 }
 0x9fa   :  { %v2261_v12 = vmul.f32 0.7978846, %v2255_v25  ;;  %v2250_v7 = vmul.f32 0.044715, %v2244_v23  ;;  %v2239_v19 = vmul.f32 %v2229_v61, %v2229_v61 }
 0x9fb   :  { %v2231_v22 = vpop.f32.mrf.mxu1 }
 0x9fc   :  { %5725 = vtanh.f32 %v2261_v12  ;;  %v2256_v41 = vadd.f32 %v2250_v7, %v2224_v56  ;;  %v2245_v21 = vmul.f32 %v2239_v19, %v2229_v61  ;;  %v2232_v16 = vadd.f32 %v2231_v22, %v2160_v33 }
 0x9fd   :  { %v5344_v28 = vpop.f32.mrf.mxu1 }
 0x9fe   :  { %v2262_v60 = vmul.f32 0.7978846, %v2256_v41  ;;  %v2251_v30 = vmul.f32 0.044715, %v2245_v21  ;;  %v2240_v43 = vmul.f32 %v2232_v16, %v2232_v16 }
 0xa00   :  { %5727 = vtanh.f32 %v2262_v60  ;;  %v2257_v45 = vadd.f32 %v2251_v30, %v2229_v61  ;;  %v2246_v11 = vmul.f32 %v2240_v43, %v2232_v16 }
 0xa02   :  { %v2263_v44 = vmul.f32 0.7978846, %v2257_v45  ;;  %v2252_v48 = vmul.f32 0.044715, %v2246_v11 }
 0xa04   :  { %5729 = vtanh.f32 %v2263_v44  ;;  %v2258_v46 = vadd.f32 %v2252_v48, %v2232_v16 }
 0xa06   :  { %v2264_v34 = vmul.f32 0.7978846, %v2258_v46 }
 0xa08   :  { %5731 = vtanh.f32 %v2264_v34 }
 0xa09   :  { %v5726_v47 = vpop.eup %5725 }
 0xa0a   :  { %v2273_v49 = vadd.f32 1.0, %v5726_v47 }
 0xa0c   :  { %v2279_v58 = vmul.f32 0.5, %v2273_v49 }
 0xa0d   :  { %v5728_v29 = vpop.eup %5727 }
 0xa0e   :  { %v2274_v53 = vadd.f32 1.0, %v5728_v29  ;;  %v2285_v54 = vmul.f32 %v2279_v58, %v2221_v31  ;;  %v2302_v31 = vsub.s32 7, %v5905_v2 }
 0xa10   :  { %v2280_v62 = vmul.f32 0.5, %v2274_v53 }
 0xa11   :  { %v5730_v33 = vpop.eup %5729 }
 0xa12   :  { %v2286_v38 = vmul.f32 %v2280_v62, %v2224_v56  ;;  %v2275_v55 = vadd.f32 1.0, %v5730_v33  ;;  %v2303_v56 = vrot.slane %v6504_v35, %v2302_v31 }
 0xa14   :  { %v2290_v50 = vpack.c.bf16 %v2286_v38, %v2285_v54  ;;  %v2281_v37 = vmul.f32 0.5, %v2275_v55 }
 0xa15   :  { %v5732_v24 = vpop.eup %5731 }
 0xa16   :  { %v2276_v26 = vadd.f32 1.0, %v5732_v24  ;;  %5358 = vmatmul.mubr.msk.bf16.gmra.mxu0 %vm147_vm3, %v2290_v50  ;;  %v2287_v0 = vmul.f32 %v2281_v37, %v2229_v61 }
 0xa17   :  { %5361 = vmatprep.mubr.msk.bf16.mxu0 %vm5854_vm0, %v5853_v1 }
 0xa18   :  { %v2282_v59 = vmul.f32 0.5, %v2276_v26 }
 0xa1a   :  { %v2288_v27 = vmul.f32 %v2282_v59, %v2232_v16  ;;  %v6621_v59 = vld [vmem:[%s7200_s2 + $0x20] ss:$8 sps:$4 sm:$0xff]  }
 0xa1c   :  { %v2291_v52 = vpack.c.bf16 %v2288_v27, %v2287_v0 }
 0xa1e   :  { %5362 = vmatmul.mubr.msk.bf16.gmra.mxu0 %vm147_vm3, %v2291_v52 }
 0xa1f   :  { %5383 = vmatprep.mubr.msk.bf16.mxu0 %vm5854_vm0, %v5853_v1 }
 0xaa1   :  { %v2371_v25 = vpop.f32.mrf.mxu0 }
 0xaa2   :  { %v2372_v23 = vadd.f32 %v2371_v25, %v2303_v56 }
 0xaa3   :  { %v5355_v17 = vpop.f32.mrf.mxu0 }
 0xaa4   :  { %v2394_v12 = vadd.f32 %v2372_v23, %v6538_v10 }
 0xaa5   :  { %v2374_v7 = vpop.f32.mrf.mxu0 }
 0xaa6   :  { %v2375_v61 = vadd.f32 %v2374_v7, %v2303_v56  ;;  %v2400_v19 = vsel %vm220_vm8, %v2394_v12, 0.0 }
 0xaa7   :  { %2401 = vadd.xlane.f32.xlu1 %v2400_v19  ;;  %v5356_v22 = vpop.f32.mrf.mxu0 }
 0xaa8   :  { %v2395_v41 = vadd.f32 %v2375_v61, %v6540_v36 }
 0xaaa   :  { %v2403_v21 = vsel %vm220_vm8, %v2395_v41, 0.0 }
 0xaab   :  { %2404 = vadd.xlane.f32.xlu0 %v2403_v21 }
 0xad6   :  { %v2379_v16 = vpop.f32.mrf.mxu0 }
 0xad7   :  { %v2380_v28 = vadd.f32 %v2379_v16, %v2303_v56 }
 0xad8   :  { %v5359_v60 = vpop.f32.mrf.mxu0 }
 0xad9   :  { %v2396_v30 = vadd.f32 %v2380_v28, %v6547_v42 }
 0xada   :  { %v2382_v43 = vpop.f32.mrf.mxu0 }
 0xadb   :  { %v2383_v45 = vadd.f32 %v2382_v43, %v2303_v56  ;;  %v2406_v10 = vsel %vm220_vm8, %v2396_v30, 0.0 }
 0xadc   :  { %2407 = vadd.xlane.f32.xlu1 %v2406_v10  ;;  %v5360_v11 = vpop.f32.mrf.mxu0 }
 0xadd   :  { %v2397_v44 = vadd.f32 %v2383_v45, %v6549_v15 }
 0xade   :  { %v2387_v48 = vpop.f32.mrf.mxu0 }
 0xadf   :  { %v2388_v46 = vadd.f32 %v2387_v48, %v2303_v56  ;;  %v2409_v36 = vsel %vm220_vm8, %v2397_v44, 0.0 }
 0xae0   :  { %2410 = vadd.xlane.f32.xlu0 %v2409_v36  ;;  %v5363_v34 = vpop.f32.mrf.mxu0 }
 0xae1   :  { %v2398_v47 = vadd.f32 %v2388_v46, %v6554_v3  ;;  %v2481_v34 = vrot.slane %v6504_v35, %v5960_v18 }
 0xae2   :  { %v2390_v49 = vpop.f32.mrf.mxu0 }
 0xae3   :  { %v2391_v29 = vadd.f32 %v2390_v49, %v2303_v56  ;;  %v2412_v42 = vsel %vm220_vm8, %v2398_v47, 0.0  ;;  %v2491_v49 = vrot.slane %v6504_v35, %v5950_v14 }
 0xae4   :  { %2413 = vadd.xlane.f32.xlu1 %v2412_v42  ;;  %v5364_v58 = vpop.f32.mrf.mxu0 }
 0xae5   :  { %v2399_v53 = vadd.f32 %v2391_v29, %v6558_v57  ;;  %v6615_v57 = vld [vmem:[%s7200_s2 + $0x30] ss:$8 sps:$4 sm:$0xff]  }
 0xae6   :  { %5366 = vmatpush3.bf16.msra.mxu1 %v6615_v57 }
 0xae7   :  { %v2415_v62 = vsel %vm220_vm8, %v2399_v53, 0.0  ;;  %5367 = vmatprep.subr.bf16.mxu1 %v5853_v1 }
 0xae8   :  { %2416 = vadd.xlane.f32.xlu0 %v2415_v62 }
 0xaea   :  { %5368 = vmatpush3.bf16.msra.mxu1 %v6621_v59 }
 0xaeb   :  { %5399 = vmatprep.subr.bf16.mxu1 %v5853_v1 }
 0xb30   :  { %v2402_v15 = vpop.xlane.xlu1 %2401 }
 0xb31   :  { %v2418_v33 = vmul.f32 0.03125, %v2402_v15 }
 0xb33   :  { %v2424_v54 = vsub.f32 %v2394_v12, %v2418_v33 }
 0xb34   :  { %v2405_v38 = vpop.xlane.xlu0 %2404 }
 0xb35   :  { %v2419_v55 = vmul.f32 0.03125, %v2405_v38  ;;  %v2430_v50 = vmul.f32 %v2424_v54, %v2424_v54 }
 0xb37   :  { %v2425_v24 = vsub.f32 %v2395_v41, %v2419_v55  ;;  %v2436_v3 = vsel %vm220_vm8, %v2430_v50, 0.0 }
 0xb38   :  { %2437 = vadd.xlane.f32.xlu1 %v2436_v3 }
 0xb39   :  { %v2431_v37 = vmul.f32 %v2425_v24, %v2425_v24 }
 0xb3b   :  { %v2439_v26 = vsel %vm220_vm8, %v2431_v37, 0.0 }
 0xb3c   :  { %2440 = vadd.xlane.f32.xlu0 %v2439_v26 }
 0xb65   :  { %v2408_v0 = vpop.xlane.xlu1 %2407 }
 0xb66   :  { %v2420_v27 = vmul.f32 0.03125, %v2408_v0 }
 0xb68   :  { %v2426_v52 = vsub.f32 %v2396_v30, %v2420_v27 }
 0xb69   :  { %v2411_v56 = vpop.xlane.xlu0 %2410 }
 0xb6a   :  { %v2421_v25 = vmul.f32 0.03125, %v2411_v56  ;;  %v2432_v23 = vmul.f32 %v2426_v52, %v2426_v52 }
 0xb6c   :  { %v2427_v17 = vsub.f32 %v2397_v44, %v2421_v25  ;;  %v2442_v12 = vsel %vm220_vm8, %v2432_v23, 0.0 }
 0xb6d   :  { %2443 = vadd.xlane.f32.xlu1 %v2442_v12  ;;  %v2414_v7 = vpop.xlane.xlu1 %2413 }
 0xb6e   :  { %v2422_v61 = vmul.f32 0.03125, %v2414_v7  ;;  %v2433_v19 = vmul.f32 %v2427_v17, %v2427_v17 }
 0xb70   :  { %v2428_v22 = vsub.f32 %v2398_v47, %v2422_v61  ;;  %v2445_v41 = vsel %vm220_vm8, %v2433_v19, 0.0 }
 0xb71   :  { %2446 = vadd.xlane.f32.xlu0 %v2445_v41  ;;  %v2417_v21 = vpop.xlane.xlu0 %2416 }
 0xb72   :  { %v2423_v16 = vmul.f32 0.03125, %v2417_v21  ;;  %v2434_v28 = vmul.f32 %v2428_v22, %v2428_v22 }
 0xb74   :  { %v2429_v60 = vsub.f32 %v2399_v53, %v2423_v16  ;;  %v2448_v30 = vsel %vm220_vm8, %v2434_v28, 0.0 }
 0xb75   :  { %2449 = vadd.xlane.f32.xlu1 %v2448_v30 }
 0xb76   :  { %v2435_v43 = vmul.f32 %v2429_v60, %v2429_v60 }
 0xb78   :  { %v2451_v45 = vsel %vm220_vm8, %v2435_v43, 0.0 }
 0xb79   :  { %2452 = vadd.xlane.f32.xlu0 %v2451_v45 }
 0xbc1   :  { %v2438_v10 = vpop.xlane.xlu1 %2437 }
 0xbc2   :  { %v2454_v11 = vmul.f32 0.03125, %v2438_v10 }
 0xbc4   :  { %v2460_v44 = vadd.f32 1e-12, %v2454_v11 }
 0xbc5   :  { %v2441_v48 = vpop.xlane.xlu0 %2440 }
 0xbc6   :  { %5733 = vrsqrt.f32 %v2460_v44  ;;  %v2455_v46 = vmul.f32 0.03125, %v2441_v48 }
 0xbc8   :  { %v2461_v36 = vadd.f32 1e-12, %v2455_v46 }
 0xbca   :  { %5735 = vrsqrt.f32 %v2461_v36 }
 0xbd3   :  { %v5734_v47 = vpop.eup %5733 }
 0xbd4   :  { %v2472_v29 = vmul.f32 %v5734_v47, %v2424_v54 }
 0xbd6   :  { %v2482_v42 = vmul.f32 %v2481_v34, %v2472_v29 }
 0xbd7   :  { %v5736_v58 = vpop.eup %5735 }
 0xbd8   :  { %v2473_v53 = vmul.f32 %v5736_v58, %v2425_v24  ;;  %v6634_v62 = vadd.f32 %v2491_v49, %v2482_v42 }
 0xbda   :  { %v2483_v15 = vmul.f32 %v2481_v34, %v2473_v53 }
 0xbdc   :  { %v6636_v33 = vadd.f32 %v2491_v49, %v2483_v15 }
 0xbde   :  { %v2503_v38 = vpack.c.bf16 %v6636_v33, %v6634_v62 }
 0xbe0   :  { %5370 = vmatmul.mubr.msk.bf16.vlgmr.msra.gmra.mxu1 %vm220_vm8, %v2503_v38 }
 0xbe1   :  { %5373 = vmatprep.mubr.msk.bf16.mxu1 %vm5854_vm0, %v5853_v1 }
 0xbf6   :  { %v2444_v55 = vpop.xlane.xlu1 %2443 }
 0xbf7   :  { %v2456_v50 = vmul.f32 0.03125, %v2444_v55 }
 0xbf9   :  { %v2462_v35 = vadd.f32 1e-12, %v2456_v50 }
 0xbfa   :  { %v2447_v54 = vpop.xlane.xlu0 %2446 }
 0xbfb   :  { %5737 = vrsqrt.f32 %v2462_v35  ;;  %v2457_v3 = vmul.f32 0.03125, %v2447_v54 }
 0xbfd   :  { %v2463_v24 = vadd.f32 1e-12, %v2457_v3 }
 0xbfe   :  { %v2450_v37 = vpop.xlane.xlu1 %2449 }
 0xbff   :  { %5739 = vrsqrt.f32 %v2463_v24  ;;  %v2458_v26 = vmul.f32 0.03125, %v2450_v37 }
 0xc01   :  { %v2464_v0 = vadd.f32 1e-12, %v2458_v26 }
 0xc02   :  { %v2453_v27 = vpop.xlane.xlu0 %2452 }
 0xc03   :  { %5741 = vrsqrt.f32 %v2464_v0  ;;  %v2459_v56 = vmul.f32 0.03125, %v2453_v27 }
 0xc05   :  { %v2465_v25 = vadd.f32 1e-12, %v2459_v56 }
 0xc07   :  { %5743 = vrsqrt.f32 %v2465_v25 }
 0xc08   :  { %v5738_v23 = vpop.eup %5737 }
 0xc09   :  { %v2474_v12 = vmul.f32 %v5738_v23, %v2426_v52 }
 0xc0b   :  { %v2484_v7 = vmul.f32 %v2481_v34, %v2474_v12 }
 0xc0c   :  { %v5740_v61 = vpop.eup %5739 }
 0xc0d   :  { %v2475_v19 = vmul.f32 %v5740_v61, %v2427_v17  ;;  %v6643_v41 = vadd.f32 %v2491_v49, %v2484_v7 }
 0xc0f   :  { %v2485_v21 = vmul.f32 %v2481_v34, %v2475_v19 }
 0xc10   :  { %v5742_v16 = vpop.eup %5741 }
 0xc11   :  { %v6645_v28 = vadd.f32 %v2491_v49, %v2485_v21  ;;  %v2476_v30 = vmul.f32 %v5742_v16, %v2428_v22  ;;  %v28_v22 = vld [vmem:[%s7203_s5 + $0x8] sm:$0xff] }
 0xc13   :  { %v2504_v43 = vpack.c.bf16 %v6645_v28, %v6643_v41  ;;  %v2486_v45 = vmul.f32 %v2481_v34, %v2476_v30 }
 0xc14   :  { %v5744_v10 = vpop.eup %5743 }
 0xc15   :  { %5374 = vmatmul.mubr.msk.bf16.gmra.mxu1 %vm220_vm8, %v2504_v43  ;;  %v2477_v11 = vmul.f32 %v5744_v10, %v2429_v60  ;;  %v6650_v44 = vadd.f32 %v2491_v49, %v2486_v45  ;;  %v2509_v60 = vrot.slane %v28_v22, %v5920_v5 }
 0xc16   :  { %5377 = vmatprep.mubr.msk.bf16.mxu1 %vm5854_vm0, %v5853_v1 }
 0xc17   :  { %v2487_v52 = vmul.f32 %v2481_v34, %v2477_v11 }
 0xc19   :  { %v6654_v17 = vadd.f32 %v2491_v49, %v2487_v52 }
 0xc1b   :  { %v2505_v48 = vpack.c.bf16 %v6654_v17, %v6650_v44 }
 0xc1d   :  { %5378 = vmatmul.mubr.msk.bf16.gmra.mxu1 %vm220_vm8, %v2505_v48 }
 0xc1e   :  { %5401 = vmatprep.mubr.msk.bf16.mxu1 %vm5854_vm0, %v5853_v1 }
 0xca0   :  { %v2565_v46 = vpop.f32.mrf.mxu1 }
 0xca1   :  { %v2566_v36 = vadd.f32 %v2565_v46, %v2509_v60 }
 0xca2   :  { %v5371_v47 = vpop.f32.mrf.mxu1 }
 0xca3   :  { %v4951_v34 = vpack.c.bf16 %v2566_v36, %v2566_v36 }
 0xca4   :  { %v2568_v49 = vpop.f32.mrf.mxu1 }
 0xca5   :  { %v2569_v29 = vadd.f32 %v2568_v49, %v2509_v60  ;;  %2606 = vrot.lane.b32.xlu1 %v4951_v34, %s5855_s19 }
 0xca6   :  { %v5372_v42 = vpop.f32.mrf.mxu1 }
 0xca7   :  { %v6666_v58 = vpack.c.bf16 %v2569_v29, %v2569_v29 }
 0xca9   :  { %2608 = vrot.lane.b32.xlu0 %v6666_v58, %s5855_s19 }
 0xcd5   :  { %v2573_v53 = vpop.f32.mrf.mxu1 }
 0xcd6   :  { %v2574_v15 = vadd.f32 %v2573_v53, %v2509_v60 }
 0xcd7   :  { %v5375_v38 = vpop.f32.mrf.mxu1 }
 0xcd8   :  { %v6670_v55 = vpack.c.bf16 %v2574_v15, %v2574_v15 }
 0xcd9   :  { %v2576_v5 = vpop.f32.mrf.mxu1 }
 0xcda   :  { %v2577_v50 = vadd.f32 %v2576_v5, %v2509_v60  ;;  %2610 = vrot.lane.b32.xlu1 %v6670_v55, %s5855_s19 }
 0xcdb   :  { %v5376_v35 = vpop.f32.mrf.mxu1 }
 0xcdc   :  { %v4954_v54 = vpack.c.bf16 %v2577_v50, %v2577_v50 }
 0xcdd   :  { %v2581_v3 = vpop.f32.mrf.mxu1 }
 0xcde   :  { %v2582_v24 = vadd.f32 %v2581_v3, %v2509_v60  ;;  %2612 = vrot.lane.b32.xlu1 %v4954_v54, %s5855_s19 }
 0xcdf   :  { %v5379_v37 = vpop.f32.mrf.mxu1 }
 0xce0   :  { %v6675_v26 = vpack.c.bf16 %v2582_v24, %v2582_v24 }
 0xce1   :  { %v2584_v0 = vpop.f32.mrf.mxu1 }
 0xce2   :  { %v2585_v27 = vadd.f32 %v2584_v0, %v2509_v60  ;;  %2614 = vrot.lane.b32.xlu0 %v6675_v26, %s5855_s19 }
 0xce3   :  { %v5380_v56 = vpop.f32.mrf.mxu1 }
 0xce4   :  { %v6679_v25 = vpack.c.bf16 %v2585_v27, %v2585_v27 }
 0xce6   :  { %2618 = vrot.lane.b32.xlu0 %v4951_v34, %s5856_s20  ;;  %2616 = vrot.lane.b32.xlu1 %v6679_v25, %s5855_s19 }
 0xcea   :  { %2714 = vrot.lane.b32.xlu0 %v6670_v55, %s5856_s20  ;;  %2666 = vrot.lane.b32.xlu1 %v6666_v58, %s5856_s20 }
 0xcee   :  { %2810 = vrot.lane.b32.xlu0 %v6675_v26, %s5856_s20  ;;  %2762 = vrot.lane.b32.xlu1 %v4954_v54, %s5856_s20 }
 0xcf2   :  { %2858 = vrot.lane.b32.xlu1 %v6679_v25, %s5856_s20 }
 0xd17   :  { %v6693_v23 = vpop.permute.xlu1 %2606 }
 0xd18   :  { %v6697_v12 = vcombine.low %v6693_v23, %v6693_v23 }
 0xd1a   :  { %2908 = vrot.lane.b32.xlu0 %v6697_v12, %s5856_s20 }
 0xd1b   :  { %v6701_v7 = vpop.permute.xlu0 %2608 }
 0xd1c   :  { %v6705_v61 = vcombine.low %v6701_v7, %v6701_v7 }
 0xd1e   :  { %2958 = vrot.lane.b32.xlu1 %v6705_v61, %s5856_s20 }
 0xd4c   :  { %v6709_v19 = vpop.permute.xlu1 %2610 }
 0xd4d   :  { %v6713_v21 = vcombine.low %v6709_v19, %v6709_v19 }
 0xd4f   :  { %3008 = vrot.lane.b32.xlu0 %v6713_v21, %s5856_s20 }
 0xd50   :  { %v6717_v16 = vpop.permute.xlu1 %2612 }
 0xd51   :  { %v6721_v30 = vcombine.low %v6717_v16, %v6717_v16 }
 0xd53   :  { %3058 = vrot.lane.b32.xlu1 %v6721_v30, %s5856_s20 }
 0xd54   :  { %v6725_v43 = vpop.permute.xlu0 %2614 }
 0xd55   :  { %v6729_v45 = vcombine.low %v6725_v43, %v6725_v43 }
 0xd57   :  { %3108 = vrot.lane.b32.xlu0 %v6729_v45, %s5856_s20 }
 0xd58   :  { %v6733_v10 = vpop.permute.xlu1 %2616  ;;  %v2619_v11 = vpop.permute.xlu0 %2618 }
 0xd59   :  { %v6737_v52 = vcombine.low %v6733_v10, %v6733_v10  ;;  %v2624_v48 = vsel %vm491_vm9, %v2619_v11, 0 }
 0xd5a   :  { %5382 = vmatpush3.bf16.xpose.msra.mxu0 %v2624_v48 }
 0xd5b   :  { %3158 = vrot.lane.b32.xlu1 %v6737_v52, %s5856_s20  ;;  %3422 = vrot.lane.b32.xlu0 %v6666_v58, %s5857_s21 }
 0xd5c   :  { %v2667_v22 = vpop.permute.xlu1 %2666  ;;  %5387 = vmatprep.subr.bf16.mxu0 %v5853_v1  ;;  %v2715_v47 = vpop.permute.xlu0 %2714 }
 0xd5d   :  { %v2672_v46 = vsel %vm491_vm9, %v2667_v22, 0  ;;  %v2720_v29 = vsel %vm491_vm9, %v2715_v47, 0 }
 0xd5f   :  { %3374 = vrot.lane.b32.xlu1 %v4951_v34, %s5857_s21  ;;  %3518 = vrot.lane.b32.xlu0 %v4954_v54, %s5857_s21 }
 0xd60   :  { %v2763_v60 = vpop.permute.xlu1 %2762  ;;  %v2811_v42 = vpop.permute.xlu0 %2810 }
 0xd61   :  { %v2768_v36 = vsel %vm491_vm9, %v2763_v60, 0  ;;  %5384 = vmatmul.mubr.msk.bf16.vlgmr.msra.gmra.mxu0 %vm491_vm9, %v4951_v34  ;;  %v2816_v53 = vsel %vm491_vm9, %v2811_v42, 0 }
 0xd62   :  { %5388 = vmatpush3.bf16.xpose.msra.mxu0 %v2672_v46  ;;  %5400 = vmatpush3.bf16.xpose.msra.mxu1 %v2768_v36 }
 0xd63   :  { %3470 = vrot.lane.b32.xlu1 %v6670_v55, %s5857_s21  ;;  %5389 = vmatprep.mubr.msk.bf16.mxu0 %vm5854_vm0, %v5853_v1 }
 0xd64   :  { %5393 = vmatprep.subr.bf16.mxu0 %v5853_v1  ;;  %5411 = vmatprep.subr.bf16.mxu1 %v5853_v1  ;;  %v2859_v49 = vpop.permute.xlu1 %2858 }
 0xd65   :  { %v2864_v34 = vsel %vm491_vm9, %v2859_v49, 0 }
 0xd67   :  { %3566 = vrot.lane.b32.xlu1 %v6675_v26, %s5857_s21 }
 0xd69   :  { %5390 = vmatmul.mubr.msk.bf16.vlgmr.msra.gmra.mxu0 %vm491_vm9, %v6666_v58  ;;  %5402 = vmatmul.mubr.msk.bf16.vlgmr.msra.gmra.mxu1 %vm491_vm9, %v4954_v54 }
 0xd6a   :  { %5394 = vmatpush3.bf16.xpose.msra.mxu0 %v2720_v29  ;;  %5412 = vmatpush3.bf16.xpose.msra.mxu1 %v2864_v34 }
 0xd6b   :  { %5395 = vmatprep.mubr.msk.bf16.mxu0 %vm5854_vm0, %v5853_v1  ;;  %5413 = vmatprep.mubr.msk.bf16.mxu1 %vm5854_vm0, %v5853_v1 }
 0xd6c   :  { %5405 = vmatprep.subr.bf16.mxu0 %v5853_v1  ;;  %5423 = vmatprep.subr.bf16.mxu1 %v5853_v1 }
 0xd71   :  { %5396 = vmatmul.mubr.msk.bf16.vlgmr.msra.gmra.mxu0 %vm491_vm9, %v6670_v55  ;;  %5414 = vmatmul.mubr.msk.bf16.vlgmr.msra.gmra.mxu1 %vm491_vm9, %v6679_v25 }
 0xd72   :  { %5406 = vmatpush3.bf16.xpose.msra.mxu0 %v2816_v53  ;;  %5407 = vmatprep.mubr.msk.bf16.mxu0 %vm5854_vm0, %v5853_v1 }
 0xd73   :  { %5417 = vmatprep.subr.bf16.mxu0 %v5853_v1  ;;  %5425 = vmatprep.mubr.msk.bf16.mxu1 %vm5854_vm0, %v5853_v1 }
 0xd79   :  { %5408 = vmatmul.mubr.msk.bf16.vlgmr.msra.gmra.mxu0 %vm491_vm9, %v6675_v26 }
 0xd7a   :  { %5419 = vmatprep.mubr.msk.bf16.mxu0 %vm5854_vm0, %v5853_v1 }
 0xd8c   :  { %v2909_v58 = vpop.permute.xlu0 %2908 }
 0xd8d   :  { %v2914_v15 = vsel %vm491_vm9, %v2909_v58, 0 }
 0xd8e   :  { %5418 = vmatpush3.bf16.xpose.msra.mxu0 %v2914_v15 }
 0xd8f   :  { %5429 = vmatprep.subr.bf16.mxu0 %v5853_v1 }
 0xd90   :  { %v2959_v38 = vpop.permute.xlu1 %2958 }
 0xd91   :  { %v2964_v55 = vsel %vm491_vm9, %v2959_v38, 0 }
 0xd92   :  { %5424 = vmatpush3.bf16.xpose.msra.mxu1 %v2964_v55 }
 0xd93   :  { %5435 = vmatprep.subr.bf16.mxu1 %v5853_v1 }
 0xd95   :  { %5420 = vmatmul.mubr.msk.bf16.vlgmr.msra.gmra.mxu0 %vm491_vm9, %v6693_v23 }
 0xd96   :  { %5431 = vmatprep.mubr.msk.bf16.mxu0 %vm5854_vm0, %v5853_v1 }
 0xd99   :  { %5426 = vmatmul.mubr.msk.bf16.vlgmr.msra.gmra.mxu1 %vm491_vm9, %v6701_v7 }
 0xd9a   :  { %5437 = vmatprep.mubr.msk.bf16.mxu1 %vm5854_vm0, %v5853_v1 }
 0xdc1   :  { %v3009_v5 = vpop.permute.xlu0 %3008 }
 0xdc2   :  { %v3014_v50 = vsel %vm491_vm9, %v3009_v5, 0 }
 0xdc3   :  { %5430 = vmatpush3.bf16.xpose.msra.mxu0 %v3014_v50 }
 0xdc4   :  { %5441 = vmatprep.subr.bf16.mxu0 %v5853_v1 }
 0xdc5   :  { %v3059_v35 = vpop.permute.xlu1 %3058 }
 0xdc6   :  { %v3064_v54 = vsel %vm491_vm9, %v3059_v35, 0 }
 0xdc7   :  { %5436 = vmatpush3.bf16.xpose.msra.mxu1 %v3064_v54 }
 0xdc8   :  { %5447 = vmatprep.subr.bf16.mxu1 %v5853_v1 }
 0xdc9   :  { %v3109_v3 = vpop.permute.xlu0 %3108 }
 0xdca   :  { %v3114_v24 = vsel %vm491_vm9, %v3109_v3, 0  ;;  %5432 = vmatmul.mubr.msk.bf16.vlgmr.msra.gmra.mxu0 %vm491_vm9, %v6709_v19 }
 0xdcb   :  { %5442 = vmatpush3.bf16.xpose.msra.mxu0 %v3114_v24  ;;  %5443 = vmatprep.mubr.msk.bf16.mxu0 %vm5854_vm0, %v5853_v1 }
 0xdcc   :  { %5453 = vmatprep.subr.bf16.mxu0 %v5853_v1 }
 0xdcd   :  { %v3159_v37 = vpop.permute.xlu1 %3158  ;;  %v3423_v56 = vpop.permute.xlu0 %3422 }
 0xdce   :  { %v3164_v26 = vsel %vm491_vm9, %v3159_v37, 0  ;;  %5438 = vmatmul.mubr.msk.bf16.vlgmr.msra.gmra.mxu1 %vm491_vm9, %v6717_v16  ;;  %v3428_v23 = vsel %vm1282_vm10, %v3423_v56, 0 }
 0xdcf   :  { %5448 = vmatpush3.bf16.xpose.msra.mxu1 %v3164_v26  ;;  %5449 = vmatprep.mubr.msk.bf16.mxu1 %vm5854_vm0, %v5853_v1 }
 0xdd0   :  { %5459 = vmatprep.subr.bf16.mxu1 %v5853_v1 }
 0xdd1   :  { %v3375_v0 = vpop.permute.xlu1 %3374 }
 0xdd2   :  { %v3380_v27 = vsel %vm1282_vm10, %v3375_v0, 0  ;;  %5444 = vmatmul.mubr.msk.bf16.vlgmr.msra.gmra.mxu0 %vm491_vm9, %v6725_v43 }
 0xdd3   :  { %5454 = vmatpush3.bf16.msra.mxu0 %v3380_v27  ;;  %5455 = vmatprep.mubr.msk.bf16.mxu0 %vm5854_vm0, %v5853_v1 }
 0xdd4   :  { %5465 = vmatprep.subr.bf16.mxu0 %v5853_v1 }
 0xdd6   :  { %5450 = vmatmul.mubr.msk.bf16.vlgmr.msra.gmra.mxu1 %vm491_vm9, %v6733_v10 }
 0xdd7   :  { %5460 = vmatpush3.bf16.msra.mxu1 %v3428_v23  ;;  %5461 = vmatprep.mubr.msk.bf16.mxu1 %vm5854_vm0, %v5853_v1 }
 0xdd8   :  { %5471 = vmatprep.subr.bf16.mxu1 %v5853_v1 }
 0xe21   :  { %v2660_v7 = vpop.f32.mrf.mxu0 }
 0xe22   :  { %v3206_v19 = vmul.f32 0.25, %v2660_v7 }
 0xe23   :  { %v5385_v16 = vpop.f32.mrf.mxu0 }
 0xe24   :  { %v6824_v43 = vadd.f32 %v3206_v19, %v6243_v20 }
 0xe25   :  { %v2663_v11 = vpop.f32.mrf.mxu0 }
 0xe26   :  { %v3230_v48 = vsel %vm1132_vm12, %v6824_v43, -inf }
 0xe27   :  { %3231 = vmax.xlane.f32.xlu0 %v3230_v48  ;;  %v5386_v22 = vpop.f32.mrf.mxu0 }
 0xe29   :  { %v2708_v60 = vpop.f32.mrf.mxu0  ;;  %v2804_v10 = vpop.f32.mrf.mxu1 }
 0xe2a   :  { %v3207_v46 = vmul.f32 0.25, %v2708_v60  ;;  %v3209_v36 = vmul.f32 0.25, %v2804_v10 }
 0xe2b   :  { %v5391_v47 = vpop.f32.mrf.mxu0  ;;  %v5403_v49 = vpop.f32.mrf.mxu1 }
 0xe2c   :  { %v6829_v29 = vadd.f32 %v3207_v46, %v6249_v4  ;;  %v6832_v34 = vadd.f32 %v3209_v36, %v6265_v51 }
 0xe2d   :  { %v2711_v42 = vpop.f32.mrf.mxu0  ;;  %v2807_v53 = vpop.f32.mrf.mxu1 }
 0xe2e   :  { %v3239_v58 = vsel %vm1132_vm12, %v6832_v34, -inf  ;;  %v3233_v15 = vsel %vm1132_vm12, %v6829_v29, -inf }
 0xe2f   :  { %v5404_v38 = vpop.f32.mrf.mxu1  ;;  %3240 = vmax.xlane.f32.xlu0 %v3239_v58  ;;  %3234 = vmax.xlane.f32.xlu1 %v3233_v15  ;;  %v5392_v55 = vpop.f32.mrf.mxu0 }
 0xe31   :  { %v2756_v5 = vpop.f32.mrf.mxu0  ;;  %v2900_v50 = vpop.f32.mrf.mxu1 }
 0xe32   :  { %v3208_v35 = vmul.f32 0.25, %v2756_v5  ;;  %v3211_v54 = vmul.f32 0.25, %v2900_v50 }
 0xe33   :  { %v5397_v3 = vpop.f32.mrf.mxu0  ;;  %v5415_v24 = vpop.f32.mrf.mxu1 }
 0xe34   :  { %v6839_v37 = vadd.f32 %v3208_v35, %v6257_v39  ;;  %v6842_v27 = vadd.f32 %v3211_v54, %v6281_v32 }
 0xe35   :  { %v2759_v26 = vpop.f32.mrf.mxu0  ;;  %v2903_v0 = vpop.f32.mrf.mxu1 }
 0xe36   :  { %v3236_v56 = vsel %vm1132_vm12, %v6839_v37, -inf  ;;  %v3245_v11 = vsel %vm1132_vm12, %v6842_v27, -inf }
 0xe37   :  { %v5416_v23 = vpop.f32.mrf.mxu1  ;;  %3237 = vmax.xlane.f32.xlu0 %v3236_v56  ;;  %v5398_v7 = vpop.f32.mrf.mxu0 }
 0xe39   :  { %v2852_v19 = vpop.f32.mrf.mxu0 }
 0xe3a   :  { %v3210_v16 = vmul.f32 0.25, %v2852_v19 }
 0xe3b   :  { %3246 = vmax.xlane.f32.xlu0 %v3245_v11  ;;  %v5409_v48 = vpop.f32.mrf.mxu0 }
 0xe3c   :  { %v6849_v22 = vadd.f32 %v3210_v16, %v6273_v63 }
 0xe3d   :  { %v2855_v60 = vpop.f32.mrf.mxu0 }
 0xe3e   :  { %v3242_v10 = vsel %vm1132_vm12, %v6849_v22, -inf }
 0xe3f   :  { %3243 = vmax.xlane.f32.xlu1 %v3242_v10  ;;  %v5410_v46 = vpop.f32.mrf.mxu0 }
 0xe55   :  { %v2950_v36 = vpop.f32.mrf.mxu0 }
 0xe56   :  { %v3212_v47 = vmul.f32 0.25, %v2950_v36 }
 0xe57   :  { %v5421_v49 = vpop.f32.mrf.mxu0 }
 0xe58   :  { %v6854_v42 = vadd.f32 %v3212_v47, %v6243_v20 }
 0xe59   :  { %v2953_v53 = vpop.f32.mrf.mxu0  ;;  %v3000_v58 = vpop.f32.mrf.mxu1 }
 0xe5a   :  { %v3213_v15 = vmul.f32 0.25, %v3000_v58  ;;  %v3248_v38 = vsel %vm1132_vm12, %v6854_v42, -inf }
 0xe5b   :  { %v5427_v55 = vpop.f32.mrf.mxu1  ;;  %3249 = vmax.xlane.f32.xlu1 %v3248_v38  ;;  %v5422_v5 = vpop.f32.mrf.mxu0 }
 0xe5c   :  { %v6859_v50 = vadd.f32 %v3213_v15, %v6249_v4 }
 0xe5d   :  { %v3003_v35 = vpop.f32.mrf.mxu1 }
 0xe5e   :  { %v3251_v54 = vsel %vm1132_vm12, %v6859_v50, -inf }
 0xe5f   :  { %v5428_v3 = vpop.f32.mrf.mxu1  ;;  %3252 = vmax.xlane.f32.xlu0 %v3251_v54 }
 0xe60   :  { %v6889_v3 = vpop.permute.xlu0 %3518 }
 0xe8a   :  { %v3050_v20 = vpop.f32.mrf.mxu0 }
 0xe8b   :  { %v3214_v24 = vmul.f32 0.25, %v3050_v20 }
 0xe8c   :  { %v5433_v26 = vpop.f32.mrf.mxu0 }
 0xe8d   :  { %v6864_v0 = vadd.f32 %v3214_v24, %v6257_v39 }
 0xe8e   :  { %v3053_v56 = vpop.f32.mrf.mxu0  ;;  %v3100_v23 = vpop.f32.mrf.mxu1 }
 0xe8f   :  { %v3215_v7 = vmul.f32 0.25, %v3100_v23  ;;  %v3254_v19 = vsel %vm1132_vm12, %v6864_v0, -inf }
 0xe90   :  { %v5439_v4 = vpop.f32.mrf.mxu1  ;;  %3255 = vmax.xlane.f32.xlu1 %v3254_v19  ;;  %v5434_v16 = vpop.f32.mrf.mxu0 }
 0xe91   :  { %v6869_v11 = vadd.f32 %v3215_v7, %v6265_v51 }
 0xe92   :  { %v3103_v48 = vpop.f32.mrf.mxu1  ;;  %v3150_v60 = vpop.f32.mrf.mxu0 }
 0xe93   :  { %v3216_v10 = vmul.f32 0.25, %v3150_v60  ;;  %v3257_v46 = vsel %vm1132_vm12, %v6869_v11, -inf }
 0xe94   :  { %v5440_v39 = vpop.f32.mrf.mxu1  ;;  %3258 = vmax.xlane.f32.xlu0 %v3257_v46  ;;  %v5445_v36 = vpop.f32.mrf.mxu0 }
 0xe95   :  { %v6874_v47 = vadd.f32 %v3216_v10, %v6273_v63  ;;  %v6887_v63 = vpop.permute.xlu1 %3470 }
 0xe96   :  { %v3153_v49 = vpop.f32.mrf.mxu0  ;;  %v3200_v53 = vpop.f32.mrf.mxu1 }
 0xe97   :  { %v3217_v58 = vmul.f32 0.25, %v3200_v53  ;;  %v3260_v15 = vsel %vm1132_vm12, %v6874_v47, -inf }
 0xe98   :  { %v5451_v51 = vpop.f32.mrf.mxu1  ;;  %3261 = vmax.xlane.f32.xlu1 %v3260_v15  ;;  %v5446_v38 = vpop.f32.mrf.mxu0 }
 0xe99   :  { %v6879_v55 = vadd.f32 %v3217_v58, %v6281_v32  ;;  %v6893_v32 = vpop.permute.xlu1 %3566 }
 0xe9a   :  { %v3203_v5 = vpop.f32.mrf.mxu1 }
 0xe9b   :  { %v3263_v35 = vsel %vm1132_vm12, %v6879_v55, -inf }
 0xe9c   :  { %v5452_v54 = vpop.f32.mrf.mxu1  ;;  %3264 = vmax.xlane.f32.xlu0 %v3263_v35 }
 0xea9   :  { %3662 = vrot.lane.b32.xlu1 %v6697_v12, %s5857_s21 }
 0xead   :  { %3710 = vrot.lane.b32.xlu1 %v6705_v61, %s5857_s21 }
 0xeb0   :  { %v3232_v20 = vpop.xlane.xlu0 %3231 }
 0xeb1   :  { %v3266_v24 = vsub.f32 %v6824_v43, %v3232_v20 }
 0xeb2   :  { %3614 = vrot.lane.b32.xlu0 %v6679_v25, %s5857_s21 }
 0xeb3   :  { %v3278_v12 = vmul.f32 1.442695, %v3266_v24 }
 0xeb5   :  { %5745 = vpow2.f32 %v3278_v12 }
 0xeb8   :  { %v3235_v26 = vpop.xlane.xlu1 %3234  ;;  %v3241_v56 = vpop.xlane.xlu0 %3240 }
 0xeb9   :  { %v3267_v23 = vsub.f32 %v6829_v29, %v3235_v26  ;;  %v3269_v7 = vsub.f32 %v6832_v34, %v3241_v56 }
 0xebb   :  { %v3280_v61 = vmul.f32 1.442695, %v3267_v23  ;;  %v3284_v19 = vmul.f32 1.442695, %v3269_v7 }
 0xebd   :  { %5747 = vpow2.f32 %v3280_v61 }
 0xebe   :  { %5749 = vpow2.f32 %v3284_v19 }
 0xec0   :  { %v3238_v4 = vpop.xlane.xlu0 %3237 }
 0xec1   :  { %v3268_v16 = vsub.f32 %v6839_v37, %v3238_v4 }
 0xec2   :  { %v6901_v34 = vpop.eup %5745 }
 0xec3   :  { %v3282_v25 = vmul.f32 1.442695, %v3268_v16  ;;  %v3302_v36 = vsel %vm1132_vm12, %v6901_v34, 0.0 }
 0xec4   :  { %v3247_v48 = vpop.xlane.xlu0 %3246 }
 0xec5   :  { %5751 = vpow2.f32 %v3282_v25  ;;  %v3271_v43 = vsub.f32 %v6842_v27, %v3247_v48 }
 0xec7   :  { %v3288_v60 = vmul.f32 1.442695, %v3271_v43 }
 0xec8   :  { %v3244_v10 = vpop.xlane.xlu1 %3243 }
 0xec9   :  { %5753 = vpow2.f32 %v3288_v60  ;;  %v3270_v29 = vsub.f32 %v6849_v22, %v3244_v10 }
 0xeca   :  { %v6903_v39 = vpop.eup %5747 }
 0xecb   :  { %v3286_v46 = vmul.f32 1.442695, %v3270_v29  ;;  %v3305_v37 = vsel %vm1132_vm12, %v6903_v39, 0.0  ;;  %v6909_v49 = vpop.eup %5749 }
 0xecc   :  { %v3311_v53 = vsel %vm1132_vm12, %v6909_v49, 0.0 }
 0xecd   :  { %5755 = vpow2.f32 %v3286_v46 }
 0xed1   :  { %3306 = vadd.xlane.f32.xlu0 %v3305_v37  ;;  %3303 = vadd.xlane.f32.xlu1 %v3302_v36 }
 0xed2   :  { %v6911_v27 = vpop.eup %5751 }
 0xed3   :  { %v3308_v22 = vsel %vm1132_vm12, %v6911_v27, 0.0 }
 0xed5   :  { %3312 = vadd.xlane.f32.xlu0 %v3311_v53  ;;  %3309 = vadd.xlane.f32.xlu1 %v3308_v22 }
 0xed6   :  { %v6917_v58 = vpop.eup %5753 }
 0xed7   :  { %v3317_v15 = vsel %vm1132_vm12, %v6917_v58, 0.0 }
 0xed9   :  { %3318 = vadd.xlane.f32.xlu0 %v3317_v15 }
 0xeda   :  { %v6921_v51 = vpop.eup %5755 }
 0xedb   :  { %v3314_v38 = vsel %vm1132_vm12, %v6921_v51, 0.0 }
 0xedc   :  { %3315 = vadd.xlane.f32.xlu1 %v3314_v38 }
 0xee4   :  { %v3250_v5 = vpop.xlane.xlu1 %3249 }
 0xee5   :  { %v3272_v35 = vsub.f32 %v6854_v42, %v3250_v5 }
 0xee7   :  { %v3290_v54 = vmul.f32 1.442695, %v3272_v35 }
 0xee8   :  { %v3253_v20 = vpop.xlane.xlu0 %3252 }
 0xee9   :  { %5757 = vpow2.f32 %v3290_v54  ;;  %v3273_v24 = vsub.f32 %v6859_v50, %v3253_v20 }
 0xeeb   :  { %v3292_v26 = vmul.f32 1.442695, %v3273_v24 }
 0xeed   :  { %5759 = vpow2.f32 %v3292_v26 }
 0xef6   :  { %v6927_v56 = vpop.eup %5757 }
 0xef7   :  { %v3320_v23 = vsel %vm1132_vm12, %v6927_v56, 0.0 }
 0xef8   :  { %3321 = vadd.xlane.f32.xlu1 %v3320_v23 }
 0xefa   :  { %v6931_v12 = vpop.eup %5759 }
 0xefb   :  { %v3323_v7 = vsel %vm1132_vm12, %v6931_v12, 0.0 }
 0xefc   :  { %3324 = vadd.xlane.f32.xlu0 %v3323_v7 }
 0xf09   :  { %3806 = vrot.lane.b32.xlu1 %v6721_v30, %s5857_s21 }
 0xf12   :  { %3758 = vrot.lane.b32.xlu0 %v6713_v21, %s5857_s21 }
 0xf19   :  { %v3256_v42 = vpop.xlane.xlu1 %3255 }
 0xf1a   :  { %v3274_v50 = vsub.f32 %v6864_v0, %v3256_v42  ;;  %v3524_v42 = vsel %vm1282_vm10, %v6889_v3, 0 }
 0xf1c   :  { %v3294_v61 = vmul.f32 1.442695, %v3274_v50  ;;  %v3476_v50 = vsel %vm1282_vm10, %v6887_v63, 0 }
 0xf1d   :  { %v3259_v19 = vpop.xlane.xlu0 %3258 }
 0xf1e   :  { %5761 = vpow2.f32 %v3294_v61  ;;  %v3275_v4 = vsub.f32 %v6869_v11, %v3259_v19 }
 0xf20   :  { %v3296_v16 = vmul.f32 1.442695, %v3275_v4 }
 0xf21   :  { %v3262_v25 = vpop.xlane.xlu1 %3261 }
 0xf22   :  { %5763 = vpow2.f32 %v3296_v16  ;;  %v3276_v48 = vsub.f32 %v6874_v47, %v3262_v25 }
 0xf24   :  { %v3298_v43 = vmul.f32 1.442695, %v3276_v48 }
 0xf25   :  { %v3265_v60 = vpop.xlane.xlu0 %3264  ;;  %v3663_v36 = vpop.permute.xlu1 %3662 }
 0xf26   :  { %5765 = vpow2.f32 %v3298_v43  ;;  %v3277_v30 = vsub.f32 %v6879_v55, %v3265_v60 }
 0xf28   :  { %v3300_v10 = vmul.f32 1.442695, %v3277_v30 }
 0xf29   :  { %v3615_v22 = vpop.permute.xlu0 %3614  ;;  %v3711_v53 = vpop.permute.xlu1 %3710 }
 0xf2a   :  { %5767 = vpow2.f32 %v3300_v10  ;;  %v3620_v4 = vsel %vm1282_vm10, %v3615_v22, 0  ;;  %v3716_v48 = vsel %vm1282_vm10, %v3711_v53, 0 }
 0xf2b   :  { %v6943_v21 = vpop.eup %5761 }
 0xf2c   :  { %v3326_v0 = vsel %vm1132_vm12, %v6943_v21, 0.0 }
 0xf2d   :  { %3327 = vadd.xlane.f32.xlu1 %v3326_v0 }
 0xf2f   :  { %v6947_v29 = vpop.eup %5763 }
 0xf30   :  { %v3329_v11 = vsel %vm1132_vm12, %v6947_v29, 0.0 }
 0xf31   :  { %3330 = vadd.xlane.f32.xlu0 %v3329_v11 }
 0xf33   :  { %v6951_v47 = vpop.eup %5765 }
 0xf34   :  { %v3332_v46 = vsel %vm1132_vm12, %v6951_v47, 0.0 }
 0xf35   :  { %3333 = vadd.xlane.f32.xlu1 %v3332_v46 }
 0xf37   :  { %v6955_v55 = vpop.eup %5767 }
 0xf38   :  { %v3335_v37 = vsel %vm1132_vm12, %v6955_v55, 0.0 }
 0xf39   :  { %3336 = vadd.xlane.f32.xlu0 %v3335_v37 }
 0xf46   :  { %3902 = vrot.lane.b32.xlu1 %v6737_v52, %s5857_s21 }
 0xf4a   :  { %4071 = vrot.lane.b32.xlu1 %v6615_v57, %s5859_s22 }
 0xf4f   :  { %3854 = vrot.lane.b32.xlu0 %v6729_v45, %s5857_s21 }
 0xf53   :  { %3977 = vrot.lane.b32.xlu0 %v6621_v59, %s5859_s22 }
 0xf5a   :  { %v3307_v15 = vpop.xlane.xlu0 %3306  ;;  %v3304_v38 = vpop.xlane.xlu1 %3303 }
 0xf5b   :  { %5769 = vrcp.f32 %v3307_v15 }
 0xf5c   :  { %5771 = vrcp.f32 %v3304_v38 }
 0xf5e   :  { %v3313_v5 = vpop.xlane.xlu0 %3312  ;;  %v3310_v35 = vpop.xlane.xlu1 %3309 }
 0xf5f   :  { %5773 = vrcp.f32 %v3313_v5 }
 0xf60   :  { %5775 = vrcp.f32 %v3310_v35 }
 0xf62   :  { %v3319_v52 = vpop.xlane.xlu0 %3318 }
 0xf63   :  { %5777 = vrcp.f32 %v3319_v52 }
 0xf65   :  { %v3316_v54 = vpop.xlane.xlu1 %3315 }
 0xf66   :  { %5779 = vrcp.f32 %v3316_v54 }
 0xf68   :  { %v5770_v57 = vpop.eup %5769 }
 0xf69   :  { %v5772_v45 = vpop.eup %5771  ;;  %v3351_v20 = vmul.f32 %v5770_v57, %v6903_v39 }
 0xf6a   :  { %v3350_v59 = vmul.f32 %v5772_v45, %v6901_v34 }
 0xf6b   :  { %v3363_v24 = vpack.c.bf16 %v3351_v20, %v3351_v20 }
 0xf6c   :  { %v5774_v26 = vpop.eup %5773  ;;  %v3362_v23 = vpack.c.bf16 %v3350_v59, %v3350_v59 }
 0xf6d   :  { %v5776_v7 = vpop.eup %5775  ;;  %5462 = vmatmul.mubr.msk.bf16.vlgmr.msra.gmra.mxu1 %vm1132_vm12, %v3363_v24  ;;  %v3353_v61 = vmul.f32 %v5774_v26, %v6909_v49  ;;  %v3572_v49 = vsel %vm1282_vm10, %v6893_v32, 0 }
 0xf6e   :  { %5456 = vmatmul.mubr.msk.bf16.vlgmr.msra.gmra.mxu0 %vm1132_vm12, %v3362_v23  ;;  %5472 = vmatpush3.bf16.msra.mxu1 %v3524_v42  ;;  %v3352_v34 = vmul.f32 %v5776_v7, %v6911_v27 }
 0xf6f   :  { %5466 = vmatpush3.bf16.msra.mxu0 %v3476_v50  ;;  %5467 = vmatprep.mubr.msk.bf16.mxu0 %vm5854_vm0, %v5853_v1  ;;  %v3365_v3 = vpack.c.bf16 %v3353_v61, %v3353_v61 }
 0xf70   :  { %5473 = vmatprep.mubr.msk.bf16.mxu1 %vm5854_vm0, %v5853_v1  ;;  %5477 = vmatprep.subr.bf16.mxu0 %v5853_v1  ;;  %v5778_v63 = vpop.eup %5777  ;;  %v3364_v39 = vpack.c.bf16 %v3352_v34, %v3352_v34 }
 0xf71   :  { %5483 = vmatprep.subr.bf16.mxu1 %v5853_v1  ;;  %v3355_v27 = vmul.f32 %v5778_v63, %v6917_v58  ;;  %v3668_v58 = vsel %vm1282_vm10, %v3663_v36, 0 }
 0xf73   :  { %v5780_v19 = vpop.eup %5779  ;;  %v3367_v25 = vpack.c.bf16 %v3355_v27, %v3355_v27 }
 0xf74   :  { %v3354_v16 = vmul.f32 %v5780_v19, %v6921_v51 }
 0xf75   :  { %5474 = vmatmul.mubr.msk.bf16.vlgmr.msra.gmra.mxu1 %vm1132_vm12, %v3365_v3 }
 0xf76   :  { %5468 = vmatmul.mubr.msk.bf16.vlgmr.msra.gmra.mxu0 %vm1132_vm12, %v3364_v39  ;;  %5484 = vmatpush3.bf16.msra.mxu1 %v3620_v4  ;;  %v3366_v32 = vpack.c.bf16 %v3354_v16, %v3354_v16 }
 0xf77   :  { %5478 = vmatpush3.bf16.msra.mxu0 %v3572_v49  ;;  %5479 = vmatprep.mubr.msk.bf16.mxu0 %vm5854_vm0, %v5853_v1 }
 0xf78   :  { %5485 = vmatprep.mubr.msk.bf16.mxu1 %vm5854_vm0, %v5853_v1  ;;  %5489 = vmatprep.subr.bf16.mxu0 %v5853_v1 }
 0xf79   :  { %5495 = vmatprep.subr.bf16.mxu1 %v5853_v1 }
 0xf7d   :  { %5486 = vmatmul.mubr.msk.bf16.vlgmr.msra.gmra.mxu1 %vm1132_vm12, %v3367_v25 }
 0xf7e   :  { %5480 = vmatmul.mubr.msk.bf16.vlgmr.msra.gmra.mxu0 %vm1132_vm12, %v3366_v32  ;;  %5496 = vmatpush3.bf16.msra.mxu1 %v3716_v48 }
 0xf7f   :  { %5490 = vmatpush3.bf16.msra.mxu0 %v3668_v58  ;;  %5491 = vmatprep.mubr.msk.bf16.mxu0 %vm5854_vm0, %v5853_v1 }
 0xf80   :  { %5501 = vmatprep.subr.bf16.mxu0 %v5853_v1  ;;  %5497 = vmatprep.mubr.msk.bf16.mxu1 %vm5854_vm0, %v5853_v1 }
 0xf81   :  { %v3322_v51 = vpop.xlane.xlu1 %3321  ;;  %5507 = vmatprep.subr.bf16.mxu1 %v5853_v1 }
 0xf82   :  { %5781 = vrcp.f32 %v3322_v51 }
 0xf85   :  { %v3325_v43 = vpop.xlane.xlu0 %3324  ;;  %v3807_v36 = vpop.permute.xlu1 %3806 }
 0xf86   :  { %5783 = vrcp.f32 %v3325_v43  ;;  %v3812_v53 = vsel %vm1282_vm10, %v3807_v36, 0 }
 0xf89   :  { %v3759_v10 = vpop.permute.xlu0 %3758 }
 0xf8a   :  { %v3764_v37 = vsel %vm1282_vm10, %v3759_v10, 0 }
 0xf8f   :  { %v5782_v60 = vpop.eup %5781 }
 0xf90   :  { %v3356_v30 = vmul.f32 %v5782_v60, %v6927_v56 }
 0xf92   :  { %v3368_v0 = vpack.c.bf16 %v3356_v30, %v3356_v30 }
 0xf93   :  { %v5784_v11 = vpop.eup %5783 }
 0xf94   :  { %v3357_v46 = vmul.f32 %v5784_v11, %v6931_v12  ;;  %5492 = vmatmul.mubr.msk.bf16.vlgmr.msra.gmra.mxu0 %vm1132_vm12, %v3368_v0 }
 0xf95   :  { %5502 = vmatpush3.bf16.msra.mxu0 %v3764_v37  ;;  %5503 = vmatprep.mubr.msk.bf16.mxu0 %vm5854_vm0, %v5853_v1 }
 0xf96   :  { %v3369_v22 = vpack.c.bf16 %v3357_v46, %v3357_v46  ;;  %5513 = vmatprep.subr.bf16.mxu0 %v5853_v1 }
 0xf98   :  { %5498 = vmatmul.mubr.msk.bf16.vlgmr.msra.gmra.mxu1 %vm1132_vm12, %v3369_v22 }
 0xf99   :  { %5508 = vmatpush3.bf16.msra.mxu1 %v3812_v53  ;;  %5509 = vmatprep.mubr.msk.bf16.mxu1 %vm5854_vm0, %v5853_v1 }
 0xf9a   :  { %5519 = vmatprep.subr.bf16.mxu1 %v5853_v1 }
 0xfb6   :  { %v3328_v56 = vpop.xlane.xlu1 %3327 }
 0xfb7   :  { %5785 = vrcp.f32 %v3328_v56 }
 0xfba   :  { %v3331_v12 = vpop.xlane.xlu0 %3330 }
 0xfbb   :  { %5787 = vrcp.f32 %v3331_v12 }
 0xfbe   :  { %v3334_v15 = vpop.xlane.xlu1 %3333 }
 0xfbf   :  { %5789 = vrcp.f32 %v3334_v15 }
 0xfc2   :  { %v3337_v38 = vpop.xlane.xlu0 %3336  ;;  %v3903_v59 = vpop.permute.xlu1 %3902 }
 0xfc3   :  { %5791 = vrcp.f32 %v3337_v38  ;;  %v3908_v23 = vsel %vm1282_vm10, %v3903_v59, 0 }
 0xfc4   :  { %v5786_v5 = vpop.eup %5785 }
 0xfc5   :  { %v3358_v35 = vmul.f32 %v5786_v5, %v6943_v21 }
 0xfc6   :  { %v3855_v52 = vpop.permute.xlu0 %3854  ;;  %v4072_v61 = vpop.permute.xlu1 %4071 }
 0xfc7   :  { %v3370_v54 = vpack.c.bf16 %v3358_v35, %v3358_v35  ;;  %v3860_v57 = vsel %vm1282_vm10, %v3855_v52, 0 }
 0xfc8   :  { %v5788_v45 = vpop.eup %5787 }
 0xfc9   :  { %v3359_v20 = vmul.f32 %v5788_v45, %v6947_v29  ;;  %5504 = vmatmul.mubr.msk.bf16.vlgmr.msra.gmra.mxu0 %vm1132_vm12, %v3370_v54 }
 0xfca   :  { %5514 = vmatpush3.bf16.msra.mxu0 %v3860_v57  ;;  %5515 = vmatprep.mubr.msk.bf16.mxu0 %vm5854_vm0, %v5853_v1  ;;  %v3978_v7 = vpop.permute.xlu0 %3977 }
 0xfcb   :  { %v3371_v24 = vpack.c.bf16 %v3359_v20, %v3359_v20  ;;  %5525 = vmatprep.subr.bf16.mxu0 %v5853_v1 }
 0xfcc   :  { %v5790_v26 = vpop.eup %5789 }
 0xfcd   :  { %v3360_v21 = vmul.f32 %v5790_v26, %v6951_v47  ;;  %5510 = vmatmul.mubr.msk.bf16.vlgmr.msra.gmra.mxu1 %vm1132_vm12, %v3371_v24 }
 0xfce   :  { %5520 = vmatpush3.bf16.msra.mxu1 %v3908_v23  ;;  %5521 = vmatprep.mubr.msk.bf16.mxu1 %vm5854_vm0, %v5853_v1 }
 0xfcf   :  { %v3372_v29 = vpack.c.bf16 %v3360_v21, %v3360_v21  ;;  %5539 = vmatprep.subr.bf16.mxu1 %v5853_v1 }
 0xfd0   :  { %v5792_v42 = vpop.eup %5791 }
 0xfd1   :  { %v3361_v50 = vmul.f32 %v5792_v42, %v6955_v55  ;;  %5516 = vmatmul.mubr.msk.bf16.vlgmr.msra.gmra.mxu0 %vm1132_vm12, %v3372_v29 }
 0xfd2   :  { %5526 = vmatpush3.bf16.msra.mxu0 %v3978_v7  ;;  %5527 = vmatprep.mubr.msk.bf16.mxu0 %vm5854_vm0, %v5853_v1 }
 0xfd3   :  { %v3373_v47 = vpack.c.bf16 %v3361_v50, %v3361_v50  ;;  %5553 = vmatprep.subr.bf16.mxu0 %v5853_v1 }
 0xfd5   :  { %5522 = vmatmul.mubr.msk.bf16.vlgmr.msra.gmra.mxu1 %vm1132_vm12, %v3373_v47 }
 0xfd6   :  { %5541 = vmatprep.mubr.msk.bf16.mxu1 %vm5854_vm0, %v5853_v1  ;;  %5540 = vmatpush3.bf16.msra.mxu1 %v4072_v61 }
 0xfd7   :  { %5569 = vmatprep.subr.bf16.mxu1 %v5853_v1 }
0x102d   :  { %v3464_v34 = vpop.f32.mrf.mxu1 }
0x102e   :  { %v3416_v55 = vpop.f32.mrf.mxu0 }
0x102f   :  { %v4957_v3 = vpack.c.bf16 %v3464_v34, %v3416_v55  ;;  %v5463_v63 = vpop.f32.mrf.mxu1 }
0x1030   :  { %v5457_v39 = vpop.f32.mrf.mxu0 }
0x1031   :  { %5528 = vmatmul.mubr.msk.bf16.vlgmr.msra.gmra.mxu0 %vm491_vm9, %v4957_v3  ;;  %v3467_v19 = vpop.f32.mrf.mxu1 }
0x1032   :  { %v3419_v4 = vpop.f32.mrf.mxu0  ;;  %5531 = vmatprep.mubr.msk.bf16.mxu0 %vm5854_vm0, %v5853_v1 }
0x1033   :  { %v5464_v49 = vpop.f32.mrf.mxu1 }
0x1034   :  { %v5458_v27 = vpop.f32.mrf.mxu0 }
0x1035   :  { %v3560_v16 = vpop.f32.mrf.mxu1 }
0x1036   :  { %v3512_v25 = vpop.f32.mrf.mxu0 }
0x1037   :  { %v4958_v32 = vpack.c.bf16 %v3560_v16, %v3512_v25  ;;  %v5475_v48 = vpop.f32.mrf.mxu1  ;;  %v7061_v25 = vld [vmem:[%s7203_s5 + $0x8] sm:$0xff] }
0x1038   :  { %v5469_v58 = vpop.f32.mrf.mxu0 }
0x1039   :  { %5532 = vmatmul.mubr.msk.bf16.gmra.mxu0 %vm491_vm9, %v4958_v32  ;;  %v3563_v51 = vpop.f32.mrf.mxu1  ;;  %v4049_v32 = vrot.slane %v7061_v25, %v5931_v8 }
0x103a   :  { %v3515_v43 = vpop.f32.mrf.mxu0  ;;  %5535 = vmatprep.mubr.msk.bf16.mxu0 %vm5854_vm0, %v5853_v1 }
0x103b   :  { %v5476_v60 = vpop.f32.mrf.mxu1 }
0x103c   :  { %v5470_v30 = vpop.f32.mrf.mxu0 }
0x103d   :  { %v3656_v10 = vpop.f32.mrf.mxu1 }
0x103e   :  { %v3608_v0 = vpop.f32.mrf.mxu0 }
0x103f   :  { %v4959_v11 = vpack.c.bf16 %v3656_v10, %v3608_v0  ;;  %v5487_v46 = vpop.f32.mrf.mxu1 }
0x1040   :  { %v5481_v37 = vpop.f32.mrf.mxu0 }
0x1041   :  { %5536 = vmatmul.mubr.msk.bf16.gmra.mxu0 %vm491_vm9, %v4959_v11  ;;  %v3659_v36 = vpop.f32.mrf.mxu1 }
0x1042   :  { %v3611_v22 = vpop.f32.mrf.mxu0  ;;  %5557 = vmatprep.mubr.msk.bf16.mxu0 %vm5854_vm0, %v5853_v1 }
0x1043   :  { %v5488_v53 = vpop.f32.mrf.mxu1 }
0x1044   :  { %v5482_v56 = vpop.f32.mrf.mxu0 }
0x1054   :  { %v3704_v12 = vpop.f32.mrf.mxu0 }
0x1056   :  { %v5493_v15 = vpop.f32.mrf.mxu0 }
0x1058   :  { %v3707_v38 = vpop.f32.mrf.mxu0  ;;  %v3752_v5 = vpop.f32.mrf.mxu1 }
0x1059   :  { %v4960_v35 = vpack.c.bf16 %v3752_v5, %v3704_v12 }
0x105a   :  { %v5494_v52 = vpop.f32.mrf.mxu0  ;;  %v5499_v54 = vpop.f32.mrf.mxu1 }
0x105b   :  { %5542 = vmatmul.mubr.msk.bf16.vlgmr.msra.gmra.mxu1 %vm491_vm9, %v4960_v35 }
0x105c   :  { %v3755_v57 = vpop.f32.mrf.mxu1  ;;  %5545 = vmatprep.mubr.msk.bf16.mxu1 %vm5854_vm0, %v5853_v1 }
0x105e   :  { %v5500_v45 = vpop.f32.mrf.mxu1 }
0x1089   :  { %v3800_v20 = vpop.f32.mrf.mxu0 }
0x108b   :  { %v5505_v59 = vpop.f32.mrf.mxu0 }
0x108d   :  { %v3803_v24 = vpop.f32.mrf.mxu0  ;;  %v3848_v26 = vpop.f32.mrf.mxu1 }
0x108e   :  { %v4961_v21 = vpack.c.bf16 %v3848_v26, %v3800_v20 }
0x108f   :  { %v5506_v23 = vpop.f32.mrf.mxu0  ;;  %v5511_v29 = vpop.f32.mrf.mxu1 }
0x1090   :  { %5546 = vmatmul.mubr.msk.bf16.gmra.mxu1 %vm491_vm9, %v4961_v21 }
0x1091   :  { %v3851_v7 = vpop.f32.mrf.mxu1  ;;  %v3896_v42 = vpop.f32.mrf.mxu0  ;;  %5549 = vmatprep.mubr.msk.bf16.mxu1 %vm5854_vm0, %v5853_v1 }
0x1093   :  { %v5512_v50 = vpop.f32.mrf.mxu1  ;;  %v5517_v47 = vpop.f32.mrf.mxu0 }
0x1095   :  { %v3899_v61 = vpop.f32.mrf.mxu0  ;;  %v3944_v34 = vpop.f32.mrf.mxu1 }
0x1096   :  { %v4962_v55 = vpack.c.bf16 %v3944_v34, %v3896_v42 }
0x1097   :  { %v5518_v3 = vpop.f32.mrf.mxu0  ;;  %v5523_v63 = vpop.f32.mrf.mxu1 }
0x1098   :  { %5550 = vmatmul.mubr.msk.bf16.gmra.mxu1 %vm491_vm9, %v4962_v55 }
0x1099   :  { %v3947_v39 = vpop.f32.mrf.mxu1  ;;  %5577 = vmatprep.mubr.msk.bf16.mxu1 %vm5854_vm0, %v5853_v1 }
0x109b   :  { %v5524_v19 = vpop.f32.mrf.mxu1 }
0x10f1   :  { %v4023_v4 = vpop.f32.mrf.mxu0 }
0x10f2   :  { %v4050_v22 = vadd.f32 %v4049_v32, %v4023_v4 }
0x10f3   :  { %v5529_v49 = vpop.f32.mrf.mxu0 }
0x10f5   :  { %v4026_v27 = vpop.f32.mrf.mxu0 }
0x10f6   :  { %v4051_v15 = vadd.f32 %v4049_v32, %v4026_v27 }
0x10f7   :  { %v5530_v16 = vpop.f32.mrf.mxu0 }
0x10f9   :  { %v4031_v48 = vpop.f32.mrf.mxu0 }
0x10fa   :  { %v4052_v58 = vadd.f32 %v4049_v32, %v4031_v48 }
0x10fb   :  { %v5533_v51 = vpop.f32.mrf.mxu0 }
0x10fd   :  { %v4034_v43 = vpop.f32.mrf.mxu0 }
0x10fe   :  { %v4053_v60 = vadd.f32 %v4049_v32, %v4034_v43 }
0x10ff   :  { %v5534_v30 = vpop.f32.mrf.mxu0 }
0x1101   :  { %v4039_v10 = vpop.f32.mrf.mxu0 }
0x1102   :  { %v4054_v0 = vadd.f32 %v4049_v32, %v4039_v10 }
0x1103   :  { %v5537_v11 = vpop.f32.mrf.mxu0 }
0x1105   :  { %v4042_v46 = vpop.f32.mrf.mxu0 }
0x1106   :  { %v4055_v37 = vadd.f32 %v4049_v32, %v4042_v46 }
0x1107   :  { %v5538_v36 = vpop.f32.mrf.mxu0 }
0x111b   :  { %v4117_v53 = vpop.f32.mrf.mxu1 }
0x111c   :  { %v4140_v56 = vadd.f32 %v4117_v53, %v4050_v22 }
0x111d   :  { %v5543_v12 = vpop.f32.mrf.mxu1 }
0x111e   :  { %v4146_v38 = vadd.f32 %v4140_v56, %v6634_v62 }
0x111f   :  { %v4120_v8 = vpop.f32.mrf.mxu1 }
0x1120   :  { %v4141_v5 = vadd.f32 %v4120_v8, %v4051_v15  ;;  %v4152_v35 = vsel %vm220_vm8, %v4146_v38, 0.0 }
0x1121   :  { %v5544_v52 = vpop.f32.mrf.mxu1  ;;  %4153 = vadd.xlane.f32.xlu0 %v4152_v35 }
0x1122   :  { %v4147_v54 = vadd.f32 %v4141_v5, %v6636_v33 }
0x1124   :  { %v4155_v57 = vsel %vm220_vm8, %v4147_v54, 0.0 }
0x1125   :  { %4156 = vadd.xlane.f32.xlu1 %v4155_v57 }
0x1150   :  { %v4125_v45 = vpop.f32.mrf.mxu1 }
0x1151   :  { %v4142_v20 = vadd.f32 %v4125_v45, %v4052_v58  ;;  %v5642_v58 = vld [vmem:[%s7200_s2 + $0x24] ss:$8 sps:$4 sm:$0xff]  }
0x1152   :  { %v5547_v59 = vpop.f32.mrf.mxu1 }
0x1153   :  { %v4148_v24 = vadd.f32 %v4142_v20, %v6643_v41 }
0x1154   :  { %v4128_v26 = vpop.f32.mrf.mxu1 }
0x1155   :  { %v4143_v21 = vadd.f32 %v4128_v26, %v4053_v60  ;;  %v4158_v62 = vsel %vm220_vm8, %v4148_v24, 0.0  ;;  %v4233_v26 = vrot.slane %v7061_v25, %v5923_v6 }
0x1156   :  { %v5548_v23 = vpop.f32.mrf.mxu1  ;;  %4159 = vadd.xlane.f32.xlu0 %v4158_v62  ;;  %v4243_v62 = vrot.slane %v7061_v25, %v5934_v9 }
0x1157   :  { %v4149_v29 = vadd.f32 %v4143_v21, %v6645_v28 }
0x1158   :  { %v4133_v7 = vpop.f32.mrf.mxu1 }
0x1159   :  { %v4144_v42 = vadd.f32 %v4133_v7, %v4054_v0  ;;  %v4161_v33 = vsel %vm220_vm8, %v4149_v29, 0.0 }
0x115a   :  { %v5551_v50 = vpop.f32.mrf.mxu1  ;;  %4162 = vadd.xlane.f32.xlu0 %v4161_v33 }
0x115b   :  { %v4150_v47 = vadd.f32 %v4144_v42, %v6650_v44 }
0x115c   :  { %v4136_v61 = vpop.f32.mrf.mxu1 }
0x115d   :  { %v4145_v34 = vadd.f32 %v4136_v61, %v4055_v37  ;;  %v4164_v41 = vsel %vm220_vm8, %v4150_v47, 0.0 }
0x115e   :  { %v5552_v55 = vpop.f32.mrf.mxu1  ;;  %4165 = vadd.xlane.f32.xlu1 %v4164_v41 }
0x115f   :  { %v4151_v3 = vadd.f32 %v4145_v34, %v6654_v17  ;;  %v5641_v17 = vld [vmem:[%s7200_s2 + $0x34] ss:$8 sps:$4 sm:$0xff]  }
0x1160   :  { %5554 = vmatpush3.bf16.msra.mxu0 %v5641_v17 }
0x1161   :  { %v4167_v63 = vsel %vm220_vm8, %v4151_v3, 0.0  ;;  %5555 = vmatprep.subr.bf16.mxu0 %v5853_v1 }
0x1162   :  { %4168 = vadd.xlane.f32.xlu0 %v4167_v63 }
0x1164   :  { %5556 = vmatpush3.bf16.msra.mxu0 %v5642_v58 }
0x1165   :  { %5589 = vmatprep.subr.bf16.mxu0 %v5853_v1 }
0x11aa   :  { %v4154_v28 = vpop.xlane.xlu0 %4153 }
0x11ab   :  { %v4170_v39 = vmul.f32 0.03125, %v4154_v28 }
0x11ad   :  { %v4176_v19 = vsub.f32 %v4146_v38, %v4170_v39 }
0x11ae   :  { %v4157_v4 = vpop.xlane.xlu1 %4156 }
0x11af   :  { %v4171_v49 = vmul.f32 0.03125, %v4157_v4  ;;  %v4182_v27 = vmul.f32 %v4176_v19, %v4176_v19 }
0x11b1   :  { %v4177_v16 = vsub.f32 %v4147_v54, %v4171_v49  ;;  %v4188_v44 = vsel %vm220_vm8, %v4182_v27, 0.0 }
0x11b2   :  { %4189 = vadd.xlane.f32.xlu1 %v4188_v44 }
0x11b3   :  { %v4183_v32 = vmul.f32 %v4177_v16, %v4177_v16 }
0x11b5   :  { %v4191_v48 = vsel %vm220_vm8, %v4183_v32, 0.0 }
0x11b6   :  { %4192 = vadd.xlane.f32.xlu0 %v4191_v48 }
0x11df   :  { %v4160_v51 = vpop.xlane.xlu0 %4159 }
0x11e0   :  { %v4172_v43 = vmul.f32 0.03125, %v4160_v51 }
0x11e2   :  { %v4178_v60 = vsub.f32 %v4148_v24, %v4172_v43 }
0x11e3   :  { %v4163_v30 = vpop.xlane.xlu0 %4162 }
0x11e4   :  { %v4173_v10 = vmul.f32 0.03125, %v4163_v30  ;;  %v4184_v0 = vmul.f32 %v4178_v60, %v4178_v60 }
0x11e6   :  { %v4179_v11 = vsub.f32 %v4149_v29, %v4173_v10  ;;  %v4194_v46 = vsel %vm220_vm8, %v4184_v0, 0.0 }
0x11e7   :  { %4195 = vadd.xlane.f32.xlu1 %v4194_v46  ;;  %v4166_v37 = vpop.xlane.xlu1 %4165 }
0x11e8   :  { %v4174_v36 = vmul.f32 0.03125, %v4166_v37  ;;  %v4185_v22 = vmul.f32 %v4179_v11, %v4179_v11 }
0x11ea   :  { %v4180_v53 = vsub.f32 %v4150_v47, %v4174_v36  ;;  %v4197_v56 = vsel %vm220_vm8, %v4185_v22, 0.0 }
0x11eb   :  { %4198 = vadd.xlane.f32.xlu0 %v4197_v56  ;;  %v4169_v12 = vpop.xlane.xlu0 %4168  ;;  %v5644_v56 = vld [vmem:[%s7201_s3 + $0x30] sm:$0xff]  }
0x11ec   :  { %v4175_v15 = vmul.f32 0.03125, %v4169_v12  ;;  %v4186_v38 = vmul.f32 %v4180_v53, %v4180_v53  ;;  %v5645_v12 = vld [vmem:[%s7201_s3 + $0x28] sm:$0xff]  }
0x11ee   :  { %v4181_v8 = vsub.f32 %v4151_v3, %v4175_v15  ;;  %v4200_v5 = vsel %vm220_vm8, %v4186_v38, 0.0  ;;  %v5646_v15 = vld [vmem:[%s7201_s3 + $0x20] sm:$0xff]   ;;  %v4256_v38 = vrot.slane %v7061_v25, %v2159_v40 }
0x11ef   :  { %4201 = vadd.xlane.f32.xlu1 %v4200_v5 }
0x11f0   :  { %v4187_v35 = vmul.f32 %v4181_v8, %v4181_v8 }
0x11f2   :  { %v4203_v52 = vsel %vm220_vm8, %v4187_v35, 0.0 }
0x11f3   :  { %4204 = vadd.xlane.f32.xlu0 %v4203_v52 }
0x123b   :  { %v4190_v54 = vpop.xlane.xlu1 %4189 }
0x123c   :  { %v4206_v57 = vmul.f32 0.03125, %v4190_v54 }
0x123e   :  { %v4212_v45 = vadd.f32 1e-12, %v4206_v57 }
0x123f   :  { %v4193_v20 = vpop.xlane.xlu0 %4192 }
0x1240   :  { %5793 = vrsqrt.f32 %v4212_v45  ;;  %v4207_v59 = vmul.f32 0.03125, %v4193_v20 }
0x1242   :  { %v4213_v24 = vadd.f32 1e-12, %v4207_v59 }
0x1244   :  { %5795 = vrsqrt.f32 %v4213_v24 }
0x124d   :  { %v5794_v21 = vpop.eup %5793 }
0x124e   :  { %v4224_v23 = vmul.f32 %v5794_v21, %v4176_v19 }
0x1250   :  { %v4234_v29 = vmul.f32 %v4233_v26, %v4224_v23 }
0x1251   :  { %v5796_v7 = vpop.eup %5795 }
0x1252   :  { %v7095_v42 = vadd.f32 %v4243_v62, %v4234_v29  ;;  %v4225_v33 = vmul.f32 %v5796_v7, %v4177_v16 }
0x1254   :  { %v4235_v50 = vmul.f32 %v4233_v26, %v4225_v33 }
0x1256   :  { %v7097_v47 = vadd.f32 %v4243_v62, %v4235_v50 }
0x1258   :  { %v4250_v61 = vpack.c.bf16 %v7097_v47, %v7095_v42 }
0x125a   :  { %5558 = vmatmul.mubr.msk.bf16.vlgmr.msra.gmra.mxu0 %vm220_vm8, %v4250_v61 }
0x125b   :  { %5561 = vmatprep.mubr.msk.bf16.mxu0 %vm5854_vm0, %v5853_v1 }
0x1270   :  { %v4196_v6 = vpop.xlane.xlu1 %4195 }
0x1271   :  { %v4208_v34 = vmul.f32 0.03125, %v4196_v6 }
0x1273   :  { %v4214_v9 = vadd.f32 1e-12, %v4208_v34 }
0x1274   :  { %v4199_v41 = vpop.xlane.xlu0 %4198 }
0x1275   :  { %5797 = vrsqrt.f32 %v4214_v9  ;;  %v4209_v55 = vmul.f32 0.03125, %v4199_v41 }
0x1277   :  { %v4215_v3 = vadd.f32 1e-12, %v4209_v55 }
0x1278   :  { %v4202_v63 = vpop.xlane.xlu1 %4201 }
0x1279   :  { %5799 = vrsqrt.f32 %v4215_v3  ;;  %v4210_v28 = vmul.f32 0.03125, %v4202_v63 }
0x127b   :  { %v4216_v39 = vadd.f32 1e-12, %v4210_v28 }
0x127c   :  { %v4205_v19 = vpop.xlane.xlu0 %4204 }
0x127d   :  { %5801 = vrsqrt.f32 %v4216_v39  ;;  %v4211_v4 = vmul.f32 0.03125, %v4205_v19 }
0x127f   :  { %v4217_v49 = vadd.f32 1e-12, %v4211_v4 }
0x1281   :  { %5803 = vrsqrt.f32 %v4217_v49 }
0x1282   :  { %v5798_v27 = vpop.eup %5797 }
0x1283   :  { %v4226_v16 = vmul.f32 %v5798_v27, %v4178_v60 }
0x1285   :  { %v4236_v44 = vmul.f32 %v4233_v26, %v4226_v16 }
0x1286   :  { %v5800_v32 = vpop.eup %5799 }
0x1287   :  { %v4227_v48 = vmul.f32 %v5800_v32, %v4179_v11  ;;  %v7104_v17 = vadd.f32 %v4243_v62, %v4236_v44 }
0x1289   :  { %v4237_v58 = vmul.f32 %v4233_v26, %v4227_v48 }
0x128a   :  { %v5802_v51 = vpop.eup %5801 }
0x128b   :  { %v4228_v43 = vmul.f32 %v5802_v51, %v4180_v53  ;;  %v7106_v30 = vadd.f32 %v4243_v62, %v4237_v58  ;;  %v5643_v53 = vld [vmem:[%s7201_s3 + $0x38] sm:$0xff]  }
0x128c   :  { %5570 = vmatpush3.bf16.msra.mxu1 %v5643_v53 }
0x128d   :  { %v4251_v10 = vpack.c.bf16 %v7106_v30, %v7104_v17  ;;  %v4238_v0 = vmul.f32 %v4233_v26, %v4228_v43  ;;  %5571 = vmatprep.subr.bf16.mxu1 %v5853_v1 }
0x128e   :  { %v5804_v46 = vpop.eup %5803 }
0x128f   :  { %v4229_v37 = vmul.f32 %v5804_v46, %v4181_v8  ;;  %5562 = vmatmul.mubr.msk.bf16.gmra.mxu0 %vm220_vm8, %v4251_v10  ;;  %v7111_v36 = vadd.f32 %v4243_v62, %v4238_v0 }
0x1290   :  { %5565 = vmatprep.mubr.msk.bf16.mxu0 %vm5854_vm0, %v5853_v1  ;;  %5572 = vmatpush3.bf16.msra.mxu1 %v5644_v56 }
0x1291   :  { %v4239_v60 = vmul.f32 %v4233_v26, %v4229_v37  ;;  %5573 = vmatprep.subr.bf16.mxu1 %v5853_v1 }
0x1293   :  { %v7115_v11 = vadd.f32 %v4243_v62, %v4239_v60 }
0x1294   :  { %5574 = vmatpush3.bf16.msra.mxu1 %v5645_v12 }
0x1295   :  { %v4252_v22 = vpack.c.bf16 %v7115_v11, %v7111_v36  ;;  %5575 = vmatprep.subr.bf16.mxu1 %v5853_v1 }
0x1297   :  { %5566 = vmatmul.mubr.msk.bf16.gmra.mxu0 %vm220_vm8, %v4252_v22 }
0x1298   :  { %5593 = vmatprep.mubr.msk.bf16.mxu0 %vm5854_vm0, %v5853_v1  ;;  %5576 = vmatpush3.bf16.msra.mxu1 %v5646_v15 }
0x131a   :  { %v4308_v8 = vpop.f32.mrf.mxu0 }
0x131b   :  { %v4309_v5 = vadd.f32 %v4308_v8, %v4256_v38 }
0x131c   :  { %v5559_v35 = vpop.f32.mrf.mxu0 }
0x131d   :  { %v4331_v52 = vmul.f32 %v4309_v5, %v4309_v5 }
0x131e   :  { %v4311_v54 = vpop.f32.mrf.mxu0 }
0x131f   :  { %v4337_v57 = vmul.f32 %v4331_v52, %v4309_v5  ;;  %v4312_v45 = vadd.f32 %v4311_v54, %v4256_v38 }
0x1320   :  { %v5560_v20 = vpop.f32.mrf.mxu0 }
0x1321   :  { %v4343_v59 = vmul.f32 0.044715, %v4337_v57  ;;  %v4332_v24 = vmul.f32 %v4312_v45, %v4312_v45 }
0x1323   :  { %v4349_v26 = vadd.f32 %v4343_v59, %v4309_v5  ;;  %v4338_v21 = vmul.f32 %v4332_v24, %v4312_v45 }
0x1325   :  { %v4355_v62 = vmul.f32 0.7978846, %v4349_v26  ;;  %v4344_v23 = vmul.f32 0.044715, %v4338_v21 }
0x1327   :  { %5805 = vtanh.f32 %v4355_v62  ;;  %v4350_v29 = vadd.f32 %v4344_v23, %v4312_v45 }
0x1329   :  { %v4356_v7 = vmul.f32 0.7978846, %v4350_v29 }
0x132b   :  { %5807 = vtanh.f32 %v4356_v7 }
0x1334   :  { %v5806_v33 = vpop.eup %5805 }
0x1335   :  { %v4367_v40 = vadd.f32 1.0, %v5806_v33 }
0x1337   :  { %v4373_v61 = vmul.f32 0.5, %v4367_v40 }
0x1338   :  { %v5808_v50 = vpop.eup %5807 }
0x1339   :  { %v4368_v6 = vadd.f32 1.0, %v5808_v50  ;;  %v4379_v9 = vmul.f32 %v4373_v61, %v4309_v5 }
0x133b   :  { %v4374_v34 = vmul.f32 0.5, %v4368_v6 }
0x133d   :  { %v4380_v41 = vmul.f32 %v4374_v34, %v4312_v45 }
0x133f   :  { %v4385_v55 = vpack.c.bf16 %v4380_v41, %v4379_v9 }
0x1341   :  { %5578 = vmatmul.mubr.msk.bf16.vlgmr.msra.gmra.mxu1 %vm147_vm3, %v4385_v55  ;;  %v4400_v55 = vrot.slane %v7061_v25, %v2302_v31 }
0x1342   :  { %5581 = vmatprep.mubr.msk.bf16.mxu1 %vm5854_vm0, %v5853_v1 }
0x134f   :  { %v4316_v3 = vpop.f32.mrf.mxu0 }
0x1350   :  { %v4317_v63 = vadd.f32 %v4316_v3, %v4256_v38 }
0x1351   :  { %v5563_v28 = vpop.f32.mrf.mxu0 }
0x1352   :  { %v4333_v39 = vmul.f32 %v4317_v63, %v4317_v63 }
0x1353   :  { %v4319_v19 = vpop.f32.mrf.mxu0 }
0x1354   :  { %v4339_v4 = vmul.f32 %v4333_v39, %v4317_v63  ;;  %v4320_v49 = vadd.f32 %v4319_v19, %v4256_v38 }
0x1355   :  { %v5564_v27 = vpop.f32.mrf.mxu0 }
0x1356   :  { %v4345_v16 = vmul.f32 0.044715, %v4339_v4  ;;  %v4334_v44 = vmul.f32 %v4320_v49, %v4320_v49 }
0x1357   :  { %v4324_v32 = vpop.f32.mrf.mxu0 }
0x1358   :  { %v4351_v48 = vadd.f32 %v4345_v16, %v4317_v63  ;;  %v4340_v58 = vmul.f32 %v4334_v44, %v4320_v49  ;;  %v4325_v51 = vadd.f32 %v4324_v32, %v4256_v38 }
0x1359   :  { %v5567_v43 = vpop.f32.mrf.mxu0 }
0x135a   :  { %v4357_v10 = vmul.f32 0.7978846, %v4351_v48  ;;  %v4346_v0 = vmul.f32 0.044715, %v4340_v58  ;;  %v4335_v46 = vmul.f32 %v4325_v51, %v4325_v51 }
0x135b   :  { %v4327_v37 = vpop.f32.mrf.mxu0 }
0x135c   :  { %5809 = vtanh.f32 %v4357_v10  ;;  %v4352_v60 = vadd.f32 %v4346_v0, %v4320_v49  ;;  %v4341_v22 = vmul.f32 %v4335_v46, %v4325_v51  ;;  %v4328_v53 = vadd.f32 %v4327_v37, %v4256_v38 }
0x135d   :  { %v5568_v56 = vpop.f32.mrf.mxu0 }
0x135e   :  { %v4358_v12 = vmul.f32 0.7978846, %v4352_v60  ;;  %v4347_v15 = vmul.f32 0.044715, %v4341_v22  ;;  %v4336_v8 = vmul.f32 %v4328_v53, %v4328_v53 }
0x1360   :  { %5811 = vtanh.f32 %v4358_v12  ;;  %v4353_v5 = vadd.f32 %v4347_v15, %v4325_v51  ;;  %v4342_v35 = vmul.f32 %v4336_v8, %v4328_v53 }
0x1362   :  { %v4359_v52 = vmul.f32 0.7978846, %v4353_v5  ;;  %v4348_v54 = vmul.f32 0.044715, %v4342_v35 }
0x1364   :  { %5813 = vtanh.f32 %v4359_v52  ;;  %v4354_v57 = vadd.f32 %v4348_v54, %v4328_v53 }
0x1366   :  { %v4360_v45 = vmul.f32 0.7978846, %v4354_v57 }
0x1368   :  { %5815 = vtanh.f32 %v4360_v45 }
0x1369   :  { %v5810_v20 = vpop.eup %5809 }
0x136a   :  { %v4369_v59 = vadd.f32 1.0, %v5810_v20 }
0x136c   :  { %v4375_v26 = vmul.f32 0.5, %v4369_v59  ;;  %v5648_v59 = vld [vmem:[%s7202_s4] sm:$0xff]  }
0x136d   :  { %v5812_v24 = vpop.eup %5811 }
0x136e   :  { %v4370_v21 = vadd.f32 1.0, %v5812_v24  ;;  %v4381_v23 = vmul.f32 %v4375_v26, %v4317_v63 }
0x1370   :  { %v4376_v62 = vmul.f32 0.5, %v4370_v21 }
0x1371   :  { %v5814_v38 = vpop.eup %5813 }
0x1372   :  { %v4382_v29 = vmul.f32 %v4376_v62, %v4320_v49  ;;  %v4371_v7 = vadd.f32 1.0, %v5814_v38 }
0x1374   :  { %v4386_v33 = vpack.c.bf16 %v4382_v29, %v4381_v23  ;;  %v4377_v50 = vmul.f32 0.5, %v4371_v7 }
0x1375   :  { %v5816_v40 = vpop.eup %5815 }
0x1376   :  { %v4372_v61 = vadd.f32 1.0, %v5816_v40  ;;  %5582 = vmatmul.mubr.msk.bf16.gmra.mxu1 %vm147_vm3, %v4386_v33  ;;  %v4383_v34 = vmul.f32 %v4377_v50, %v4325_v51 }
0x1377   :  { %5585 = vmatprep.mubr.msk.bf16.mxu1 %vm5854_vm0, %v5853_v1 }
0x1378   :  { %v4378_v6 = vmul.f32 0.5, %v4372_v61 }
0x137a   :  { %v4384_v9 = vmul.f32 %v4378_v6, %v4328_v53 }
0x137c   :  { %v4387_v41 = vpack.c.bf16 %v4384_v9, %v4383_v34 }
0x137e   :  { %5586 = vmatmul.mubr.msk.bf16.gmra.mxu1 %vm147_vm3, %v4387_v41 }
0x1401   :  { %v4468_v3 = vpop.f32.mrf.mxu1 }
0x1402   :  { %v4469_v63 = vadd.f32 %v4468_v3, %v4400_v55 }
0x1403   :  { %v5579_v28 = vpop.f32.mrf.mxu1 }
0x1404   :  { %v4491_v39 = vadd.f32 %v4469_v63, %v7095_v42 }
0x1405   :  { %v4471_v19 = vpop.f32.mrf.mxu1 }
0x1406   :  { %v4472_v4 = vadd.f32 %v4471_v19, %v4400_v55  ;;  %v4497_v49 = vsel %vm220_vm8, %v4491_v39, 0.0 }
0x1407   :  { %4498 = vadd.xlane.f32.xlu1 %v4497_v49  ;;  %v5580_v27 = vpop.f32.mrf.mxu1 }
0x1408   :  { %v4492_v16 = vadd.f32 %v4472_v4, %v7097_v47 }
0x140a   :  { %v4500_v44 = vsel %vm220_vm8, %v4492_v16, 0.0 }
0x140b   :  { %4501 = vadd.xlane.f32.xlu0 %v4500_v44  ;;  %v4578_v44 = vrot.slane %v7061_v25, %v5960_v18 }
0x1436   :  { %v4476_v32 = vpop.f32.mrf.mxu1 }
0x1437   :  { %v4477_v2 = vadd.f32 %v4476_v32, %v4400_v55 }
0x1438   :  { %v5583_v48 = vpop.f32.mrf.mxu1 }
0x1439   :  { %v4493_v31 = vadd.f32 %v4477_v2, %v7104_v17  ;;  %v4588_v2 = vrot.slane %v7061_v25, %v5950_v14 }
0x143a   :  { %v4479_v58 = vpop.f32.mrf.mxu1 }
0x143b   :  { %v4480_v51 = vadd.f32 %v4479_v58, %v4400_v55  ;;  %v4503_v42 = vsel %vm220_vm8, %v4493_v31, 0.0 }
0x143c   :  { %4504 = vadd.xlane.f32.xlu1 %v4503_v42  ;;  %v5584_v43 = vpop.f32.mrf.mxu1 }
0x143d   :  { %v4494_v10 = vadd.f32 %v4480_v51, %v7106_v30 }
0x143e   :  { %v4484_v0 = vpop.f32.mrf.mxu1 }
0x143f   :  { %v4485_v46 = vadd.f32 %v4484_v0, %v4400_v55  ;;  %v4506_v47 = vsel %vm220_vm8, %v4494_v10, 0.0 }
0x1440   :  { %4507 = vadd.xlane.f32.xlu0 %v4506_v47  ;;  %v5587_v37 = vpop.f32.mrf.mxu1 }
0x1441   :  { %v4495_v60 = vadd.f32 %v4485_v46, %v7111_v36 }
0x1442   :  { %v4487_v22 = vpop.f32.mrf.mxu1 }
0x1443   :  { %v4488_v53 = vadd.f32 %v4487_v22, %v4400_v55  ;;  %v4509_v17 = vsel %vm220_vm8, %v4495_v60, 0.0 }
0x1444   :  { %4510 = vadd.xlane.f32.xlu1 %v4509_v17  ;;  %v5588_v56 = vpop.f32.mrf.mxu1 }
0x1445   :  { %v4496_v12 = vadd.f32 %v4488_v53, %v7115_v11  ;;  %v5647_v11 = vld [vmem:[%s7202_s4 + $0x8] sm:$0xff]   ;;  %s5860_s4 = smov [#allocation2]  }
0x1446   :  { %5590 = vmatpush3.bf16.msra.mxu0 %v5647_v11  ;;  %s4758_s9 = sshll.u32 %s5860_s4, 4  ;;  %s4759_s9 = int_to_ptr.vmem [resolvable:$true] %s4758_s9 }
0x1447   :  { %v4512_v15 = vsel %vm220_vm8, %v4496_v12, 0.0  ;;  %5591 = vmatprep.subr.bf16.mxu0 %v5853_v1  ;;  %s5831_s10 = scalar_lea.vmem %s4759_s9, 768  ;;  %p5836_p1 = scmp.lt.s32.totalorder %s4759_s9, %s4759_s9 }
0x1448   :  { %4513 = vadd.xlane.f32.xlu0 %v4512_v15  ;;  %p5832_p0 = scmp.ne.s32.totalorder %s4759_s9, %s5831_s10  ;;  %p5837_p2 = scmp.lt.s32.totalorder %s5831_s10, %s5831_s10 }
0x144a   :  { %5592 = vmatpush3.bf16.msra.mxu0 %v5648_v59  ;;  %p5838_p3 = por %p5837_p2, %p5836_p1 }
0x144c   :  { %p5839_p4 = pnand %p5838_p3, %p5832_p0 }
0x1490   :  { %v4499_v30 = vpop.xlane.xlu1 %4498 }
0x1491   :  { %v4515_v8 = vmul.f32 0.03125, %v4499_v30 }
0x1493   :  { %v4521_v5 = vsub.f32 %v4491_v39, %v4515_v8 }
0x1494   :  { %v4502_v35 = vpop.xlane.xlu0 %4501 }
0x1495   :  { %v4516_v52 = vmul.f32 0.03125, %v4502_v35  ;;  %v4527_v54 = vmul.f32 %v4521_v5, %v4521_v5 }
0x1497   :  { %v4522_v57 = vsub.f32 %v4492_v16, %v4516_v52  ;;  %v4533_v36 = vsel %vm220_vm8, %v4527_v54, 0.0 }
0x1498   :  { %4534 = vadd.xlane.f32.xlu1 %v4533_v36 }
0x1499   :  { %v4528_v45 = vmul.f32 %v4522_v57, %v4522_v57 }
0x149b   :  { %v4536_v20 = vsel %vm220_vm8, %v4528_v45, 0.0 }
0x149c   :  { %4537 = vadd.xlane.f32.xlu0 %v4536_v20 }
0x14c5   :  { %v4505_v24 = vpop.xlane.xlu1 %4504 }
0x14c6   :  { %v4517_v26 = vmul.f32 0.03125, %v4505_v24 }
0x14c8   :  { %v4523_v21 = vsub.f32 %v4493_v31, %v4517_v26 }
0x14c9   :  { %v4508_v62 = vpop.xlane.xlu0 %4507 }
0x14ca   :  { %v4518_v38 = vmul.f32 0.03125, %v4508_v62  ;;  %v4529_v23 = vmul.f32 %v4523_v21, %v4523_v21 }
0x14cc   :  { %v4524_v29 = vsub.f32 %v4494_v10, %v4518_v38  ;;  %v4539_v7 = vsel %vm220_vm8, %v4529_v23, 0.0 }
0x14cd   :  { %4540 = vadd.xlane.f32.xlu1 %v4539_v7  ;;  %v4511_v33 = vpop.xlane.xlu1 %4510 }
0x14ce   :  { %v4519_v40 = vmul.f32 0.03125, %v4511_v33  ;;  %v4530_v50 = vmul.f32 %v4524_v29, %v4524_v29 }
0x14d0   :  { %v4525_v61 = vsub.f32 %v4495_v60, %v4519_v40  ;;  %v4542_v6 = vsel %vm220_vm8, %v4530_v50, 0.0 }
0x14d1   :  { %4543 = vadd.xlane.f32.xlu0 %v4542_v6  ;;  %v4514_v34 = vpop.xlane.xlu0 %4513 }
0x14d2   :  { %v4520_v9 = vmul.f32 0.03125, %v4514_v34  ;;  %v4531_v41 = vmul.f32 %v4525_v61, %v4525_v61 }
0x14d4   :  { %v4526_v55 = vsub.f32 %v4496_v12, %v4520_v9  ;;  %v4545_v3 = vsel %vm220_vm8, %v4531_v41, 0.0 }
0x14d5   :  { %4546 = vadd.xlane.f32.xlu1 %v4545_v3 }
0x14d6   :  { %v4532_v63 = vmul.f32 %v4526_v55, %v4526_v55 }
0x14d8   :  { %v4548_v28 = vsel %vm220_vm8, %v4532_v63, 0.0 }
0x14d9   :  { %4549 = vadd.xlane.f32.xlu0 %v4548_v28 }
0x1521   :  { %v4535_v39 = vpop.xlane.xlu1 %4534 }
0x1522   :  { %v4551_v19 = vmul.f32 0.03125, %v4535_v39 }
0x1524   :  { %v4557_v4 = vadd.f32 1e-12, %v4551_v19 }
0x1525   :  { %v4538_v49 = vpop.xlane.xlu0 %4537 }
0x1526   :  { %5817 = vrsqrt.f32 %v4557_v4  ;;  %v4552_v27 = vmul.f32 0.03125, %v4538_v49 }
0x1528   :  { %v4558_v16 = vadd.f32 1e-12, %v4552_v27 }
0x152a   :  { %5819 = vrsqrt.f32 %v4558_v16 }
0x1533   :  { %v5818_v32 = vpop.eup %5817 }
0x1534   :  { %v4569_v48 = vmul.f32 %v5818_v32, %v4521_v5 }
0x1536   :  { %v4579_v31 = vmul.f32 %v4578_v44, %v4569_v48 }
0x1537   :  { %v5820_v58 = vpop.eup %5819 }
0x1538   :  { %v4589_v51 = vadd.f32 %v4588_v2, %v4579_v31  ;;  %v4570_v42 = vmul.f32 %v5820_v58, %v4522_v57 }
0x153a   :  { %v4580_v43 = vmul.f32 %v4578_v44, %v4570_v42 }
0x153c   :  { %v4590_v10 = vadd.f32 %v4588_v2, %v4580_v43 }
0x153e   :  { %v4595_v0 = vpack.c.bf16 %v4590_v10, %v4589_v51 }
0x1540   :  { %5594 = vmatmul.mubr.msk.bf16.vlgmr.msra.gmra.mxu0 %vm220_vm8, %v4595_v0 }
0x1541   :  { %5597 = vmatprep.mubr.msk.bf16.mxu0 %vm5854_vm0, %v5853_v1 }
0x1556   :  { %v4541_v46 = vpop.xlane.xlu1 %4540 }
0x1557   :  { %v4553_v47 = vmul.f32 0.03125, %v4541_v46 }
0x1559   :  { %v4559_v18 = vadd.f32 1e-12, %v4553_v47 }
0x155a   :  { %v4544_v37 = vpop.xlane.xlu0 %4543 }
0x155b   :  { %5821 = vrsqrt.f32 %v4559_v18  ;;  %v4554_v60 = vmul.f32 0.03125, %v4544_v37 }
0x155d   :  { %v4560_v14 = vadd.f32 1e-12, %v4554_v60 }
0x155e   :  { %v4547_v25 = vpop.xlane.xlu1 %4546 }
0x155f   :  { %5823 = vrsqrt.f32 %v4560_v14  ;;  %v4555_v22 = vmul.f32 0.03125, %v4547_v25 }
0x1561   :  { %v4561_v53 = vadd.f32 1e-12, %v4555_v22 }
0x1562   :  { %v4550_v17 = vpop.xlane.xlu0 %4549 }
0x1563   :  { %5825 = vrsqrt.f32 %v4561_v53  ;;  %v4556_v56 = vmul.f32 0.03125, %v4550_v17 }
0x1565   :  { %v4562_v12 = vadd.f32 1e-12, %v4556_v56 }
0x1567   :  { %5827 = vrsqrt.f32 %v4562_v12 }
0x1568   :  { %v5822_v15 = vpop.eup %5821 }
0x1569   :  { %v4571_v30 = vmul.f32 %v5822_v15, %v4523_v21 }
0x156b   :  { %v4581_v8 = vmul.f32 %v4578_v44, %v4571_v30 }
0x156c   :  { %v5824_v5 = vpop.eup %5823 }
0x156d   :  { %v4572_v35 = vmul.f32 %v5824_v5, %v4524_v29  ;;  %v4591_v52 = vadd.f32 %v4588_v2, %v4581_v8 }
0x156f   :  { %v4582_v54 = vmul.f32 %v4578_v44, %v4572_v35 }
0x1570   :  { %v5826_v57 = vpop.eup %5825 }
0x1571   :  { %v4573_v36 = vmul.f32 %v5826_v57, %v4525_v61  ;;  %v4592_v45 = vadd.f32 %v4588_v2, %v4582_v54 }
0x1573   :  { %v4596_v20 = vpack.c.bf16 %v4592_v45, %v4591_v52  ;;  %v4583_v11 = vmul.f32 %v4578_v44, %v4573_v36 }
0x1574   :  { %v5828_v59 = vpop.eup %5827 }
0x1575   :  { %v4574_v24 = vmul.f32 %v5828_v59, %v4526_v55  ;;  %5598 = vmatmul.mubr.msk.bf16.gmra.mxu0 %vm220_vm8, %v4596_v20  ;;  %v4593_v26 = vadd.f32 %v4588_v2, %v4583_v11 }
0x1576   :  { %5601 = vmatprep.mubr.msk.bf16.mxu0 %vm5854_vm0, %v5853_v1 }
0x1577   :  { %v4584_v62 = vmul.f32 %v4578_v44, %v4574_v24 }
0x1579   :  { %v4594_v21 = vadd.f32 %v4588_v2, %v4584_v62 }
0x157b   :  { %v4597_v38 = vpack.c.bf16 %v4594_v21, %v4593_v26 }
0x157d   :  { %5602 = vmatmul.mubr.msk.bf16.gmra.mxu0 %vm220_vm8, %v4597_v38 }
0x1600   :  { %v4661_v23 = vpop.f32.mrf.mxu0 }
0x1601   :  { %v4662_v29 = vadd.f32 %v4661_v23, %v5947_v13 }
0x1602   :  { %v5595_v7 = vpop.f32.mrf.mxu0 }
0x1603   :  { %4684 = vst [vmem:[#allocation2] sm:$0xff] %v4662_v29  ;;  %v4690_v6 = vrot.slane %v4662_v29, 4 }
0x1604   :  { %v4664_v33 = vpop.f32.mrf.mxu0 }
0x1605   :  { %v4665_v40 = vadd.f32 %v4664_v33, %v5947_v13  ;;  %v4691_v55 = vadd.f32 %v4690_v6, %v4662_v29 }
0x1606   :  { %v5596_v50 = vpop.f32.mrf.mxu0 }
0x1607   :  { %4685 = vst [vmem:[#allocation2 + $0x8] sm:$0xff] %v4665_v40  ;;  %v4696_v61 = vrot.slane %v4665_v40, 4  ;;  %v4692_v49 = vrot.slane %v4691_v55, 2 }
0x1609   :  { %v4697_v9 = vadd.f32 %v4696_v61, %v4665_v40  ;;  %v4693_v51 = vadd.f32 %v4692_v49, %v4691_v55 }
0x160b   :  { %v4698_v28 = vrot.slane %v4697_v9, 2  ;;  %v4694_v14 = vrot.slane %v4693_v51, 1 }
0x160d   :  { %v4699_v32 = vadd.f32 %v4698_v28, %v4697_v9 }
0x160f   :  { %v4700_v0 = vrot.slane %v4699_v32, 1 }
0x1635   :  { %v4669_v34 = vpop.f32.mrf.mxu0 }
0x1636   :  { %v4670_v1 = vadd.f32 %v4669_v34, %v5947_v13 }
0x1637   :  { %v5599_v41 = vpop.f32.mrf.mxu0 }
0x1638   :  { %4686 = vst [vmem:[#allocation2 + $0x10] sm:$0xff] %v4670_v1  ;;  %v4702_v3 = vrot.slane %v4670_v1, 4 }
0x1639   :  { %v4672_v63 = vpop.f32.mrf.mxu0 }
0x163a   :  { %v4703_v39 = vadd.f32 %v4702_v3, %v4670_v1  ;;  %v4673_v19 = vadd.f32 %v4672_v63, %v5947_v13 }
0x163b   :  { %v5600_v4 = vpop.f32.mrf.mxu0 }
0x163c   :  { %v4704_v27 = vrot.slane %v4703_v39, 2  ;;  %4687 = vst [vmem:[#allocation2 + $0x18] sm:$0xff] %v4673_v19  ;;  %v4708_v16 = vrot.slane %v4673_v19, 4 }
0x163d   :  { %v4677_v44 = vpop.f32.mrf.mxu0 }
0x163e   :  { %v4709_v2 = vadd.f32 %v4708_v16, %v4673_v19  ;;  %v4678_v48 = vadd.f32 %v4677_v44, %v5947_v13  ;;  %v4705_v31 = vadd.f32 %v4704_v27, %v4703_v39 }
0x163f   :  { %v5603_v58 = vpop.f32.mrf.mxu0 }
0x1640   :  { %v4710_v42 = vrot.slane %v4709_v2, 2  ;;  %4688 = vst [vmem:[#allocation2 + $0x20] sm:$0xff] %v4678_v48  ;;  %v4714_v43 = vrot.slane %v4678_v48, 4  ;;  %v4706_v37 = vrot.slane %v4705_v31, 1 }
0x1641   :  { %v4680_v10 = vpop.f32.mrf.mxu0 }
0x1642   :  { %v4711_v46 = vadd.f32 %v4710_v42, %v4709_v2  ;;  %v4715_v47 = vadd.f32 %v4714_v43, %v4678_v48  ;;  %v4681_v18 = vadd.f32 %v4680_v10, %v5947_v13 }
0x1643   :  { %v5604_v60 = vpop.f32.mrf.mxu0 }
0x1644   :  { %v4712_v25 = vrot.slane %v4711_v46, 1  ;;  %v4716_v22 = vrot.slane %v4715_v47, 2  ;;  %4689 = vst [vmem:[#allocation2 + $0x28] sm:$0xff] %v4681_v18  ;;  %v4720_v53 = vrot.slane %v4681_v18, 4 }
0x1645   :  { %5842 = shalt.err (!%p5839_p4)
}
0x1646   :  { %s5861_s11 = smov 128   ;;  %s5862_s1 = smov 8   ;;  %v4701_v13 = vadd.f32 %v4700_v0, %v4699_v32  ;;  %v4717_v17 = vadd.f32 %v4716_v22, %v4715_v47  ;;  %v4721_v56 = vadd.f32 %v4720_v53, %v4681_v18  ;;  %v4707_v12 = vadd.f32 %v4706_v37, %v4705_v31 }
0x1647   :  { %4764 = dma.vmem_to_hbm [thread:$0]  %s4759_s9, 768, %s7204_s6, [#allocation3], %s5861_s11, %s5861_s11, %s5862_s1   ;;  %v4695_v15 = vadd.f32 %v4694_v14, %v4693_v51  ;;  %v4713_v30 = vadd.f32 %v4712_v25, %v4711_v46  ;;  %vm4739_vm13 = vcmask 1041409   ;;  %vm4741_vm14 = vcmask 1042434  }
0x1648   :  { %v4718_v8 = vrot.slane %v4717_v17, 1  ;;  %v4722_v5 = vrot.slane %v4721_v56, 2  ;;  %v4728_v35 = vmul.f32 0.125, %v4701_v13  ;;  %v4729_v57 = vmul.f32 0.125, %v4707_v12 }
0x1649   :  { %v4727_v36 = vmul.f32 0.125, %v4695_v15  ;;  %v4730_v45 = vmul.f32 0.125, %v4713_v30  ;;  %vm4743_vm15 = vcmask 1043459   ;;  %vm4745_vm0 = vcmask 1044484  }
0x164a   :  { %v4719_v52 = vadd.f32 %v4718_v8, %v4717_v17  ;;  %v4723_v54 = vadd.f32 %v4722_v5, %v4721_v56  ;;  %vm4747_vm1 = vcmask 1045509   ;;  %vm4750_vm2 = vcmask 1045504  }
0x164b   :  { %v4740_v59 = vsel %vm4739_vm13, %v4728_v35, %v4727_v36 }
0x164c   :  { %v4724_v20 = vrot.slane %v4723_v54, 1  ;;  %v4731_v11 = vmul.f32 0.125, %v4719_v52  ;;  %v4742_v26 = vsel %vm4741_vm14, %v4729_v57, %v4740_v59 }
0x164d   :  { %v4744_v62 = vsel %vm4743_vm15, %v4730_v45, %v4742_v26 }
0x164e   :  { %v4725_v24 = vadd.f32 %v4724_v20, %v4723_v54  ;;  %v4746_v38 = vsel %vm4745_vm0, %v4731_v11, %v4744_v62 }
0x1650   :  { %v4732_v21 = vmul.f32 0.125, %v4725_v24 }
0x1652   :  { %v4748_v23 = vsel %vm4747_vm1, %v4732_v21, %v4746_v38 }
0x1653   :  { %v4751_v29 = vsel %vm4750_vm2, %v4748_v23, 0.0 }
0x1654   :  { %4752 = vst [vmem:[%s7205_s7] sm:$0xff] %v4751_v29 }
0x1655   :  { %5851 = dma.done.wait [#allocation3], 768  }
0x1656   :  { %5852 = vsyncadd [#allocation3], 4294966528 }
0x1657   :  { %4772 = vsyncpa [#allocation3], 1 }

</bundles_post_ra>
